<compile_context>
chip_gen: v7x
topology: tpu7x:2x2x1
jax: 0.10.0
libtpu: 0.0.40
codegen_flags: <defaults>
</compile_context>

<pallas_src>
import functools

import jax
import jax.numpy as jnp
import numpy as np
from jax.experimental import pallas as pl
from jax.experimental.pallas import tpu as pltpu


def _ffn_kernel(xy_ref, wblk_ref, wd_ref, wc_ref, wag_ref, bag_ref,
                o_ref, stack_scr, *, shifts, C, HW, bps):
    """One grid step: (2C, L) stack with L = bps*HW lanes."""

    def depthwise3x3(t, w_ref):
        # Tap weights are pre-masked (padding=1 border zeros) and lane-
        # broadcast, so each tap is: XLU roll + vld(weight) + FMA. No selects.
        acc = t * w_ref[4]                               # centre tap: no roll
        for k in range(9):
            if k == 4:
                continue
            acc = acc + pltpu.roll(t, shifts[k], axis=1) * w_ref[k]
        return acc

    xy = xy_ref[...]                                     # (2C, L) = [x ; y]

    # project_m / project_s fused into one block-diagonal MXU matmul.
    pre = jnp.dot(wblk_ref[...], xy, preferred_element_type=jnp.float32)

    # project_dwm / project_dws fused on the stacked tensor: stack = [m ; s].
    stack = depthwise3x3(pre, wd_ref)

    # AdaptiveAvgPool2d(1) per folded batch segment, halves swapped so m-rows
    # see sw (mean of s) and s-rows see mw:  scaled = [m*sw + m ; s*mw + s].
    parts = []
    for b in range(bps):                                 # static loop, bps small
        seg = stack[:, b * HW:(b + 1) * HW]              # lane-aligned slice
        mean_b = jnp.mean(seg, axis=1, keepdims=True)    # (2C, 1) = [mw; sw]
        swap_b = jnp.concatenate([mean_b[C:], mean_b[:C]], axis=0)  # [sw; mw]
        parts.append(seg * (swap_b + 1.0))
    scaled = parts[0] if bps == 1 else jnp.concatenate(parts, axis=1)

    # Park `stack` in VMEM so it is not live in vregs across the second
    # depthwise + ag matmul (register-pressure relief); reloaded at the end.
    stack_scr[...] = stack

    # dwconv_m / dwconv_s + ReLU, fused on the stack.
    dw2 = jnp.maximum(depthwise3x3(scaled, wc_ref), 0.0)

    # ag: 1x1 conv on the channel concat == one (C, 2C) @ (2C, L) matmul + bias.
    fms = jnp.dot(wag_ref[...], dw2, preferred_element_type=jnp.float32)
    fms = fms + bag_ref[...]

    m = stack_scr[pl.ds(0, C), :]
    s = stack_scr[pl.ds(C, C), :]
    o_ref[...] = (m + jax.nn.sigmoid(fms) * s).astype(o_ref.dtype)


def _full_spec(arr):
    nd = arr.ndim
    return pl.BlockSpec(arr.shape, lambda g, _nd=nd: (0,) * _nd)


def ffn_pallas(x_nchw, y_nchw, torch_weights, num_steps=None):
    """x, y: (N, C, H, W) f32.  torch_weights: PyTorch-layout parameter tuple."""
    wm, wdm, ws, wds, wcm, wcs, wag, bag = torch_weights
    N, C, H, W = x_nchw.shape
    HW = H * W
    C2 = 2 * C

    # Grid-step policy: keep a 2-way "parallel" axis when possible (both v7x
    # TensorCores busy); fold the rest of the batch onto the lane axis.
    if num_steps is None:
        num_steps = 2 if (N % 2 == 0) else 1
    assert N % num_steps == 0
    G = num_steps
    bps = N // G                                         # batch elems per step
    L = bps * HW

    # --- weight re-layout (plain-JAX glue, outside the kernel) --------------
    # project_m / project_s -> block-diagonal (2C, 2C) pointwise weight.
    wblk = jnp.zeros((C2, C2), jnp.float32)
    wblk = wblk.at[:C, :C].set(wm[:, :, 0, 0])
    wblk = wblk.at[C:, C:].set(ws[:, :, 0, 0])

    def dw9(w):                                          # (C, 1, 3, 3) -> (C, 9)
        return w[:, 0].reshape(C, 9)

    wd_stack = jnp.concatenate([dw9(wdm), dw9(wds)], axis=0)   # (2C, 9)
    wc_stack = jnp.concatenate([dw9(wcm), dw9(wcs)], axis=0)   # (2C, 9)

    # Pre-masked, lane-broadcast tap weights (9, 2C, L): tap k already carries
    # the padding=1 border mask (derived from lane % HW so it is also valid for
    # rolls that would cross a folded batch-segment boundary).
    lane = np.arange(HW)
    h_idx, w_idx = lane // W, lane % W
    masks, shifts = [], []
    for di in (-1, 0, 1):
        for dj in (-1, 0, 1):
            ok = ((h_idx + di >= 0) & (h_idx + di < H) &
                  (w_idx + dj >= 0) & (w_idx + dj < W))
            masks.append(ok.astype(np.float32))
            # rolled[p] = t[(p + di*W + dj) mod L]
            shifts.append(int((-(di * W + dj)) % L))
    mask = jnp.asarray(np.tile(np.stack(masks, 0), (1, bps)))  # (9, L)
    wd_b = wd_stack.T[:, :, None] * mask[:, None, :]           # (9, 2C, L)
    wc_b = wc_stack.T[:, :, None] * mask[:, None, :]           # (9, 2C, L)

    wag_mat = wag[:, :, 0, 0]                            # (C, 2C)
    bag_col = bag.reshape(C, 1)                          # (C, 1)

    # Inputs stacked along channel, spatially flattened, and (optionally)
    # batch-folded onto the lane axis: (G, 2C, bps*HW), lane-dense.
    xy = jnp.concatenate([x_nchw, y_nchw], axis=1).reshape(N, C2, HW)
    xy = xy.reshape(G, bps, C2, HW).transpose(0, 2, 1, 3).reshape(G, C2, L)

    kernel = functools.partial(_ffn_kernel, shifts=tuple(shifts),
                               C=C, HW=HW, bps=bps)

    # Advisory cost estimate (two pointwise matmuls, two depthwise 3x3 passes,
    # misc elementwise; sigmoid counted as transcendentals).
    flops = int(N * HW * (2 * C2 * C2 + 2 * C * C2 + 2 * 2 * 9 * C2 + 8 * C2))
    bytes_accessed = int(4 * (N * C2 * HW + N * C * HW + C2 * C2
                              + 2 * 9 * C2 * L + C * C2 + C))
    cost = pl.CostEstimate(flops=flops,
                           transcendentals=int(N * C * HW),
                           bytes_accessed=bytes_accessed)

    io_in = pl.BlockSpec((None, C2, L), lambda g: (g, 0, 0))
    io_out = pl.BlockSpec((None, C, L), lambda g: (g, 0, 0))

    out = pl.pallas_call(
        kernel,
        out_shape=jax.ShapeDtypeStruct((G, C, L), jnp.float32),
        grid_spec=pltpu.PrefetchScalarGridSpec(
            num_scalar_prefetch=0,
            grid=(G,),
            in_specs=[io_in,
                      _full_spec(wblk), _full_spec(wd_b), _full_spec(wc_b),
                      _full_spec(wag_mat), _full_spec(bag_col)],
            out_specs=io_out,
            scratch_shapes=[pltpu.VMEM((C2, L), jnp.float32)],
        ),
        compiler_params=pltpu.CompilerParams(
            # Grid steps are independent -> shard across v7x's 2 TensorCores.
            dimension_semantics=("parallel",)),
        cost_estimate=cost,
    )(xy, wblk, wd_b, wc_b, wag_mat, bag_col)

    # Un-fold the batch from the lane axis: (G, C, bps*HW) -> (N, C, H, W).
    out = out.reshape(G, C, bps, HW).transpose(0, 2, 1, 3)
    return out.reshape(N, C, H, W)


def ffn_ref(x, y, torch_weights):
    """Pure-JAX NCHW reference using lax.conv_general_dilated."""
    wm, wdm, ws, wds, wcm, wcs, wag, bag = torch_weights
    C = x.shape[1]
    dn = ('NCHW', 'OIHW', 'NCHW')

    def pw(t, w):
        return jax.lax.conv_general_dilated(t, w, (1, 1), 'VALID',
                                            dimension_numbers=dn)

    def dwc(t, w):
        return jax.lax.conv_general_dilated(t, w, (1, 1), ((1, 1), (1, 1)),
                                            dimension_numbers=dn,
                                            feature_group_count=C)

    m = dwc(pw(x, wm), wdm)
    s = dwc(pw(y, ws), wds)
    mw = jnp.mean(m, axis=(2, 3), keepdims=True)
    sw = jnp.mean(s, axis=(2, 3), keepdims=True)
    m_sw = m * sw + m
    s_mw = s * mw + s
    a = jax.nn.relu(dwc(m_sw, wcm))
    b = jax.nn.relu(dwc(s_mw, wcs))
    fms = pw(jnp.concatenate([a, b], axis=1), wag) + bag.reshape(1, C, 1, 1)
    return m + jax.nn.sigmoid(fms) * s


if __name__ == "__main__":
    key = jax.random.PRNGKey(0)
    C, H, W = 32, 16, 16                   # input_dim == output_dim == C
    ks = jax.random.split(key, 8)

    # Deterministic synthetic parameters in PyTorch layouts.
    w_proj_m   = 0.2 * jax.random.normal(ks[0], (C, C, 1, 1), jnp.float32)
    w_proj_dwm = 0.2 * jax.random.normal(ks[1], (C, 1, 3, 3), jnp.float32)
    w_proj_s   = 0.2 * jax.random.normal(ks[2], (C, C, 1, 1), jnp.float32)
    w_proj_dws = 0.2 * jax.random.normal(ks[3], (C, 1, 3, 3), jnp.float32)
    w_dwconv_m = 0.2 * jax.random.normal(ks[4], (C, 1, 3, 3), jnp.float32)
    w_dwconv_s = 0.2 * jax.random.normal(ks[5], (C, 1, 3, 3), jnp.float32)
    w_ag       = 0.2 * jax.random.normal(ks[6], (C, 2 * C, 1, 1), jnp.float32)
    b_ag       = 0.1 * jax.random.normal(ks[7], (C,), jnp.float32)  # ag bias

    torch_weights = (w_proj_m, w_proj_dwm, w_proj_s, w_proj_dws,
                     w_dwconv_m, w_dwconv_s, w_ag, b_ag)

    # N=2: one batch element per grid step (2-way parallel axis for v7x).
    # N=4: exercises the batch-on-lanes fold (2 steps x 2 elements per step).
    for N in (2, 4):
        kx, ky = jax.random.split(jax.random.fold_in(key, N))
        x = jax.random.normal(kx, (N, C, H, W), jnp.float32)
        y = jax.random.normal(ky, (N, C, H, W), jnp.float32)

        out = jax.block_until_ready(ffn_pallas(x, y, torch_weights))
        ref = jax.block_until_ready(ffn_ref(x, y, torch_weights))
        np.testing.assert_allclose(np.asarray(out), np.asarray(ref),
                                   rtol=1e-3, atol=1e-3)

    print("KERNEL_OK")
</pallas_src>

<mosaic_0001>
module attributes {stable_mosaic.version = 11 : i64} {
  func.func @_ffn_kernel(%arg0: i32, %arg1: memref<1x64x256xf32, #tpu.memory_space<vmem>>, %arg2: memref<64x64xf32, #tpu.memory_space<vmem>>, %arg3: memref<9x64x256xf32, #tpu.memory_space<vmem>>, %arg4: memref<9x64x256xf32, #tpu.memory_space<vmem>>, %arg5: memref<32x64xf32, #tpu.memory_space<vmem>>, %arg6: memref<32x1xf32, #tpu.memory_space<vmem>>, %arg7: memref<1x32x256xf32, #tpu.memory_space<vmem>>, %arg8: memref<64x256xf32, #tpu.memory_space<vmem>>) attributes {dimension_semantics = [#tpu.dimension_semantics<parallel>], iteration_bounds = array<i64: 2>, scalar_prefetch = 0 : i64, scratch_operands = 1 : i64, tpu.core_type = #tpu.core_type<tc>, window_params = [{transform_indices = @transform_0, window_bounds = array<i64: 1, 64, 256>}, {pipeline_mode = #tpu.pipeline_mode<synchronous>, transform_indices = @transform_1, window_bounds = array<i64: 64, 64>}, {pipeline_mode = #tpu.pipeline_mode<synchronous>, transform_indices = @transform_2, window_bounds = array<i64: 9, 64, 256>}, {pipeline_mode = #tpu.pipeline_mode<synchronous>, transform_indices = @transform_3, window_bounds = array<i64: 9, 64, 256>}, {pipeline_mode = #tpu.pipeline_mode<synchronous>, transform_indices = @transform_4, window_bounds = array<i64: 32, 64>}, {pipeline_mode = #tpu.pipeline_mode<synchronous>, transform_indices = @transform_5, window_bounds = array<i64: 32, 1>}, {transform_indices = @transform_6, window_bounds = array<i64: 1, 32, 256>}]} {
    %c0 = arith.constant 0 : index
    %c0_0 = arith.constant 0 : index
    %c0_1 = arith.constant 0 : index
    %0 = vector.load %arg1[%c0, %c0_0, %c0_1] : memref<1x64x256xf32, #tpu.memory_space<vmem>>, vector<1x64x256xf32>
    %1 = vector.shape_cast %0 : vector<1x64x256xf32> to vector<64x256xf32>
    %c0_2 = arith.constant 0 : index
    %c0_3 = arith.constant 0 : index
    %2 = vector.load %arg2[%c0_2, %c0_3] : memref<64x64xf32, #tpu.memory_space<vmem>>, vector<64x64xf32>
    %cst = arith.constant dense<0.000000e+00> : vector<64x256xf32>
    %3 = tpu.matmul %2, %1, %cst {dimension_numbers = #tpu.dot_dimension_numbers<[1], [0], [0], [1], [0, 0, 1, 1], [], []>} : vector<64x64xf32>, vector<64x256xf32>, vector<64x256xf32> -> vector<64x256xf32>
    %c4 = arith.constant 4 : index
    %c0_4 = arith.constant 0 : index
    %c0_5 = arith.constant 0 : index
    %4 = vector.load %arg3[%c4, %c0_4, %c0_5] : memref<9x64x256xf32, #tpu.memory_space<vmem>>, vector<1x64x256xf32>
    %5 = vector.shape_cast %4 : vector<1x64x256xf32> to vector<64x256xf32>
    %6 = arith.mulf %3, %5 : vector<64x256xf32>
    %c17_i32 = arith.constant 17 : i32
    %7 = tpu.dynamic_rotate %3 by %c17_i32 dim 1 : vector<64x256xf32>, i32 -> vector<64x256xf32>
    %c0_6 = arith.constant 0 : index
    %c0_7 = arith.constant 0 : index
    %c0_8 = arith.constant 0 : index
    %8 = vector.load %arg3[%c0_6, %c0_7, %c0_8] : memref<9x64x256xf32, #tpu.memory_space<vmem>>, vector<1x64x256xf32>
    %9 = vector.shape_cast %8 : vector<1x64x256xf32> to vector<64x256xf32>
    %10 = arith.mulf %7, %9 : vector<64x256xf32>
    %11 = arith.addf %6, %10 : vector<64x256xf32>
    %c16_i32 = arith.constant 16 : i32
    %12 = tpu.dynamic_rotate %3 by %c16_i32 dim 1 : vector<64x256xf32>, i32 -> vector<64x256xf32>
    %c1 = arith.constant 1 : index
    %c0_9 = arith.constant 0 : index
    %c0_10 = arith.constant 0 : index
    %13 = vector.load %arg3[%c1, %c0_9, %c0_10] : memref<9x64x256xf32, #tpu.memory_space<vmem>>, vector<1x64x256xf32>
    %14 = vector.shape_cast %13 : vector<1x64x256xf32> to vector<64x256xf32>
    %15 = arith.mulf %12, %14 : vector<64x256xf32>
    %16 = arith.addf %11, %15 : vector<64x256xf32>
    %c15_i32 = arith.constant 15 : i32
    %17 = tpu.dynamic_rotate %3 by %c15_i32 dim 1 : vector<64x256xf32>, i32 -> vector<64x256xf32>
    %c2 = arith.constant 2 : index
    %c0_11 = arith.constant 0 : index
    %c0_12 = arith.constant 0 : index
    %18 = vector.load %arg3[%c2, %c0_11, %c0_12] : memref<9x64x256xf32, #tpu.memory_space<vmem>>, vector<1x64x256xf32>
    %19 = vector.shape_cast %18 : vector<1x64x256xf32> to vector<64x256xf32>
    %20 = arith.mulf %17, %19 : vector<64x256xf32>
    %21 = arith.addf %16, %20 : vector<64x256xf32>
    %c1_i32 = arith.constant 1 : i32
    %22 = tpu.dynamic_rotate %3 by %c1_i32 dim 1 : vector<64x256xf32>, i32 -> vector<64x256xf32>
    %c3 = arith.constant 3 : index
    %c0_13 = arith.constant 0 : index
    %c0_14 = arith.constant 0 : index
    %23 = vector.load %arg3[%c3, %c0_13, %c0_14] : memref<9x64x256xf32, #tpu.memory_space<vmem>>, vector<1x64x256xf32>
    %24 = vector.shape_cast %23 : vector<1x64x256xf32> to vector<64x256xf32>
    %25 = arith.mulf %22, %24 : vector<64x256xf32>
    %26 = arith.addf %21, %25 : vector<64x256xf32>
    %c255_i32 = arith.constant 255 : i32
    %27 = tpu.dynamic_rotate %3 by %c255_i32 dim 1 : vector<64x256xf32>, i32 -> vector<64x256xf32>
    %c5 = arith.constant 5 : index
    %c0_15 = arith.constant 0 : index
    %c0_16 = arith.constant 0 : index
    %28 = vector.load %arg3[%c5, %c0_15, %c0_16] : memref<9x64x256xf32, #tpu.memory_space<vmem>>, vector<1x64x256xf32>
    %29 = vector.shape_cast %28 : vector<1x64x256xf32> to vector<64x256xf32>
    %30 = arith.mulf %27, %29 : vector<64x256xf32>
    %31 = arith.addf %26, %30 : vector<64x256xf32>
    %c241_i32 = arith.constant 241 : i32
    %32 = tpu.dynamic_rotate %3 by %c241_i32 dim 1 : vector<64x256xf32>, i32 -> vector<64x256xf32>
    %c6 = arith.constant 6 : index
    %c0_17 = arith.constant 0 : index
    %c0_18 = arith.constant 0 : index
    %33 = vector.load %arg3[%c6, %c0_17, %c0_18] : memref<9x64x256xf32, #tpu.memory_space<vmem>>, vector<1x64x256xf32>
    %34 = vector.shape_cast %33 : vector<1x64x256xf32> to vector<64x256xf32>
    %35 = arith.mulf %32, %34 : vector<64x256xf32>
    %36 = arith.addf %31, %35 : vector<64x256xf32>
    %c240_i32 = arith.constant 240 : i32
    %37 = tpu.dynamic_rotate %3 by %c240_i32 dim 1 : vector<64x256xf32>, i32 -> vector<64x256xf32>
    %c7 = arith.constant 7 : index
    %c0_19 = arith.constant 0 : index
    %c0_20 = arith.constant 0 : index
    %38 = vector.load %arg3[%c7, %c0_19, %c0_20] : memref<9x64x256xf32, #tpu.memory_space<vmem>>, vector<1x64x256xf32>
    %39 = vector.shape_cast %38 : vector<1x64x256xf32> to vector<64x256xf32>
    %40 = arith.mulf %37, %39 : vector<64x256xf32>
    %41 = arith.addf %36, %40 : vector<64x256xf32>
    %c239_i32 = arith.constant 239 : i32
    %42 = tpu.dynamic_rotate %3 by %c239_i32 dim 1 : vector<64x256xf32>, i32 -> vector<64x256xf32>
    %c8 = arith.constant 8 : index
    %c0_21 = arith.constant 0 : index
    %c0_22 = arith.constant 0 : index
    %43 = vector.load %arg3[%c8, %c0_21, %c0_22] : memref<9x64x256xf32, #tpu.memory_space<vmem>>, vector<1x64x256xf32>
    %44 = vector.shape_cast %43 : vector<1x64x256xf32> to vector<64x256xf32>
    %45 = arith.mulf %42, %44 : vector<64x256xf32>
    %46 = arith.addf %41, %45 : vector<64x256xf32>
    %cst_23 = arith.constant dense<0.000000e+00> : vector<64xf32>
    %47 = vector.multi_reduction <add>, %46, %cst_23 [1] : vector<64x256xf32> to vector<64xf32>
    %48 = vector.shape_cast %47 : vector<64xf32> to vector<64x1xf32>
    %cst_24 = arith.constant 2.560000e+02 : f32
    %49 = vector.broadcast %cst_24 : f32 to vector<64x1xf32>
    %50 = arith.divf %48, %49 : vector<64x1xf32>
    %51 = vector.extract_strided_slice %50 {offsets = [32, 0], sizes = [32, 1], strides = [1, 1]} : vector<64x1xf32> to vector<32x1xf32>
    %52 = vector.extract_strided_slice %50 {offsets = [0, 0], sizes = [32, 1], strides = [1, 1]} : vector<64x1xf32> to vector<32x1xf32>
    %53 = tpu.concatenate %51, %52 in 0 : vector<32x1xf32>, vector<32x1xf32> -> vector<64x1xf32>
    %cst_25 = arith.constant 1.000000e+00 : f32
    %54 = vector.broadcast %cst_25 : f32 to vector<64x1xf32>
    %55 = arith.addf %53, %54 : vector<64x1xf32>
    %56 = vector.broadcast %55 : vector<64x1xf32> to vector<64x256xf32>
    %57 = arith.mulf %46, %56 : vector<64x256xf32>
    %c0_26 = arith.constant 0 : index
    %c0_27 = arith.constant 0 : index
    %58 = vector.load %arg8[%c0_26, %c0_27] : memref<64x256xf32, #tpu.memory_space<vmem>>, vector<64x256xf32>
    tpu.vector_store %arg8[%c0_26, %c0_27], %46 {strides = array<i32>} : memref<64x256xf32, #tpu.memory_space<vmem>>, vector<64x256xf32>,
    %c4_28 = arith.constant 4 : index
    %c0_29 = arith.constant 0 : index
    %c0_30 = arith.constant 0 : index
    %59 = vector.load %arg4[%c4_28, %c0_29, %c0_30] : memref<9x64x256xf32, #tpu.memory_space<vmem>>, vector<1x64x256xf32>
    %60 = vector.shape_cast %59 : vector<1x64x256xf32> to vector<64x256xf32>
    %61 = arith.mulf %57, %60 : vector<64x256xf32>
    %c17_i32_31 = arith.constant 17 : i32
    %62 = tpu.dynamic_rotate %57 by %c17_i32_31 dim 1 : vector<64x256xf32>, i32 -> vector<64x256xf32>
    %c0_32 = arith.constant 0 : index
    %c0_33 = arith.constant 0 : index
    %c0_34 = arith.constant 0 : index
    %63 = vector.load %arg4[%c0_32, %c0_33, %c0_34] : memref<9x64x256xf32, #tpu.memory_space<vmem>>, vector<1x64x256xf32>
    %64 = vector.shape_cast %63 : vector<1x64x256xf32> to vector<64x256xf32>
    %65 = arith.mulf %62, %64 : vector<64x256xf32>
    %66 = arith.addf %61, %65 : vector<64x256xf32>
    %c16_i32_35 = arith.constant 16 : i32
    %67 = tpu.dynamic_rotate %57 by %c16_i32_35 dim 1 : vector<64x256xf32>, i32 -> vector<64x256xf32>
    %c1_36 = arith.constant 1 : index
    %c0_37 = arith.constant 0 : index
    %c0_38 = arith.constant 0 : index
    %68 = vector.load %arg4[%c1_36, %c0_37, %c0_38] : memref<9x64x256xf32, #tpu.memory_space<vmem>>, vector<1x64x256xf32>
    %69 = vector.shape_cast %68 : vector<1x64x256xf32> to vector<64x256xf32>
    %70 = arith.mulf %67, %69 : vector<64x256xf32>
    %71 = arith.addf %66, %70 : vector<64x256xf32>
    %c15_i32_39 = arith.constant 15 : i32
    %72 = tpu.dynamic_rotate %57 by %c15_i32_39 dim 1 : vector<64x256xf32>, i32 -> vector<64x256xf32>
    %c2_40 = arith.constant 2 : index
    %c0_41 = arith.constant 0 : index
    %c0_42 = arith.constant 0 : index
    %73 = vector.load %arg4[%c2_40, %c0_41, %c0_42] : memref<9x64x256xf32, #tpu.memory_space<vmem>>, vector<1x64x256xf32>
    %74 = vector.shape_cast %73 : vector<1x64x256xf32> to vector<64x256xf32>
    %75 = arith.mulf %72, %74 : vector<64x256xf32>
    %76 = arith.addf %71, %75 : vector<64x256xf32>
    %c1_i32_43 = arith.constant 1 : i32
    %77 = tpu.dynamic_rotate %57 by %c1_i32_43 dim 1 : vector<64x256xf32>, i32 -> vector<64x256xf32>
    %c3_44 = arith.constant 3 : index
    %c0_45 = arith.constant 0 : index
    %c0_46 = arith.constant 0 : index
    %78 = vector.load %arg4[%c3_44, %c0_45, %c0_46] : memref<9x64x256xf32, #tpu.memory_space<vmem>>, vector<1x64x256xf32>
    %79 = vector.shape_cast %78 : vector<1x64x256xf32> to vector<64x256xf32>
    %80 = arith.mulf %77, %79 : vector<64x256xf32>
    %81 = arith.addf %76, %80 : vector<64x256xf32>
    %c255_i32_47 = arith.constant 255 : i32
    %82 = tpu.dynamic_rotate %57 by %c255_i32_47 dim 1 : vector<64x256xf32>, i32 -> vector<64x256xf32>
    %c5_48 = arith.constant 5 : index
    %c0_49 = arith.constant 0 : index
    %c0_50 = arith.constant 0 : index
    %83 = vector.load %arg4[%c5_48, %c0_49, %c0_50] : memref<9x64x256xf32, #tpu.memory_space<vmem>>, vector<1x64x256xf32>
    %84 = vector.shape_cast %83 : vector<1x64x256xf32> to vector<64x256xf32>
    %85 = arith.mulf %82, %84 : vector<64x256xf32>
    %86 = arith.addf %81, %85 : vector<64x256xf32>
    %c241_i32_51 = arith.constant 241 : i32
    %87 = tpu.dynamic_rotate %57 by %c241_i32_51 dim 1 : vector<64x256xf32>, i32 -> vector<64x256xf32>
    %c6_52 = arith.constant 6 : index
    %c0_53 = arith.constant 0 : index
    %c0_54 = arith.constant 0 : index
    %88 = vector.load %arg4[%c6_52, %c0_53, %c0_54] : memref<9x64x256xf32, #tpu.memory_space<vmem>>, vector<1x64x256xf32>
    %89 = vector.shape_cast %88 : vector<1x64x256xf32> to vector<64x256xf32>
    %90 = arith.mulf %87, %89 : vector<64x256xf32>
    %91 = arith.addf %86, %90 : vector<64x256xf32>
    %c240_i32_55 = arith.constant 240 : i32
    %92 = tpu.dynamic_rotate %57 by %c240_i32_55 dim 1 : vector<64x256xf32>, i32 -> vector<64x256xf32>
    %c7_56 = arith.constant 7 : index
    %c0_57 = arith.constant 0 : index
    %c0_58 = arith.constant 0 : index
    %93 = vector.load %arg4[%c7_56, %c0_57, %c0_58] : memref<9x64x256xf32, #tpu.memory_space<vmem>>, vector<1x64x256xf32>
    %94 = vector.shape_cast %93 : vector<1x64x256xf32> to vector<64x256xf32>
    %95 = arith.mulf %92, %94 : vector<64x256xf32>
    %96 = arith.addf %91, %95 : vector<64x256xf32>
    %c239_i32_59 = arith.constant 239 : i32
    %97 = tpu.dynamic_rotate %57 by %c239_i32_59 dim 1 : vector<64x256xf32>, i32 -> vector<64x256xf32>
    %c8_60 = arith.constant 8 : index
    %c0_61 = arith.constant 0 : index
    %c0_62 = arith.constant 0 : index
    %98 = vector.load %arg4[%c8_60, %c0_61, %c0_62] : memref<9x64x256xf32, #tpu.memory_space<vmem>>, vector<1x64x256xf32>
    %99 = vector.shape_cast %98 : vector<1x64x256xf32> to vector<64x256xf32>
    %100 = arith.mulf %97, %99 : vector<64x256xf32>
    %101 = arith.addf %96, %100 : vector<64x256xf32>
    %cst_63 = arith.constant 0.000000e+00 : f32
    %102 = vector.broadcast %cst_63 : f32 to vector<64x256xf32>
    %103 = arith.maximumf %101, %102 : vector<64x256xf32>
    %c0_64 = arith.constant 0 : index
    %c0_65 = arith.constant 0 : index
    %104 = vector.load %arg5[%c0_64, %c0_65] : memref<32x64xf32, #tpu.memory_space<vmem>>, vector<32x64xf32>
    %cst_66 = arith.constant dense<0.000000e+00> : vector<32x256xf32>
    %105 = tpu.matmul %104, %103, %cst_66 {dimension_numbers = #tpu.dot_dimension_numbers<[1], [0], [0], [1], [0, 0, 1, 1], [], []>} : vector<32x64xf32>, vector<64x256xf32>, vector<32x256xf32> -> vector<32x256xf32>
    %c0_67 = arith.constant 0 : index
    %c0_68 = arith.constant 0 : index
    %106 = vector.load %arg6[%c0_67, %c0_68] : memref<32x1xf32, #tpu.memory_space<vmem>>, vector<32x1xf32>
    %107 = vector.broadcast %106 : vector<32x1xf32> to vector<32x256xf32>
    %108 = arith.addf %105, %107 : vector<32x256xf32>
    %c0_69 = arith.constant 0 : index
    %c0_70 = arith.constant 0 : index
    %109 = vector.load %arg8[%c0_69, %c0_70] : memref<64x256xf32, #tpu.memory_space<vmem>>, vector<32x256xf32>
    %c32 = arith.constant 32 : index
    %c0_71 = arith.constant 0 : index
    %110 = vector.load %arg8[%c32, %c0_71] : memref<64x256xf32, #tpu.memory_space<vmem>>, vector<32x256xf32>
    %111 = arith.negf %108 : vector<32x256xf32>
    %112 = math.exp %111 : vector<32x256xf32>
    %cst_72 = arith.constant 1.000000e+00 : f32
    %113 = vector.broadcast %cst_72 : f32 to vector<32x256xf32>
    %114 = arith.addf %113, %112 : vector<32x256xf32>
    %115 = arith.divf %113, %114 : vector<32x256xf32>
    %116 = arith.mulf %115, %110 : vector<32x256xf32>
    %117 = arith.addf %109, %116 : vector<32x256xf32>
    %c0_73 = arith.constant 0 : index
    %c0_74 = arith.constant 0 : index
    %c0_75 = arith.constant 0 : index
    %118 = vector.load %arg7[%c0_73, %c0_74, %c0_75] : memref<1x32x256xf32, #tpu.memory_space<vmem>>, vector<1x32x256xf32>
    %119 = vector.shape_cast %118 : vector<1x32x256xf32> to vector<32x256xf32>
    %120 = vector.shape_cast %117 : vector<32x256xf32> to vector<1x32x256xf32>
    tpu.vector_store %arg7[%c0_73, %c0_74, %c0_75], %120 {strides = array<i32>} : memref<1x32x256xf32, #tpu.memory_space<vmem>>, vector<1x32x256xf32>,
    return
  }
  func.func @transform_0(%arg0: i32) -> (i32, i32, i32) {
    %c0_i32 = arith.constant 0 : i32
    %c0_i32_0 = arith.constant 0 : i32
    %c0_i32_1 = arith.constant 0 : i32
    return %arg0, %c0_i32, %c0_i32_0 : i32, i32, i32
  }
  func.func @transform_1(%arg0: i32) -> (i32, i32) {
    %c0_i32 = arith.constant 0 : i32
    %c0_i32_0 = arith.constant 0 : i32
    %c0_i32_1 = arith.constant 0 : i32
    return %c0_i32, %c0_i32_0 : i32, i32
  }
  func.func @transform_2(%arg0: i32) -> (i32, i32, i32) {
    %c0_i32 = arith.constant 0 : i32
    %c0_i32_0 = arith.constant 0 : i32
    %c0_i32_1 = arith.constant 0 : i32
    %c0_i32_2 = arith.constant 0 : i32
    return %c0_i32, %c0_i32_0, %c0_i32_1 : i32, i32, i32
  }
  func.func @transform_3(%arg0: i32) -> (i32, i32, i32) {
    %c0_i32 = arith.constant 0 : i32
    %c0_i32_0 = arith.constant 0 : i32
    %c0_i32_1 = arith.constant 0 : i32
    %c0_i32_2 = arith.constant 0 : i32
    return %c0_i32, %c0_i32_0, %c0_i32_1 : i32, i32, i32
  }
  func.func @transform_4(%arg0: i32) -> (i32, i32) {
    %c0_i32 = arith.constant 0 : i32
    %c0_i32_0 = arith.constant 0 : i32
    %c0_i32_1 = arith.constant 0 : i32
    return %c0_i32, %c0_i32_0 : i32, i32
  }
  func.func @transform_5(%arg0: i32) -> (i32, i32) {
    %c0_i32 = arith.constant 0 : i32
    %c0_i32_0 = arith.constant 0 : i32
    %c0_i32_1 = arith.constant 0 : i32
    return %c0_i32, %c0_i32_0 : i32, i32
  }
  func.func @transform_6(%arg0: i32) -> (i32, i32, i32) {
    %c0_i32 = arith.constant 0 : i32
    %c0_i32_0 = arith.constant 0 : i32
    %c0_i32_1 = arith.constant 0 : i32
    return %arg0, %c0_i32, %c0_i32_0 : i32, i32, i32
  }
}

</mosaic_0001>

<bundles_post_ra>
// kernel: tpu_custom_call.1
= control target key start
LH: loop header
LB: loop body
LE: loop exit
PB: predicated region body
PF: predicated region fallthrough
CT: control target
= control target key end

     0   :  { %s5113_s0 = inlined_call_operand.hbm [shape: f32[2,64,256], index: 0, kind: input, shape index: {}]   ;;  %s5114_s1 = inlined_call_operand.hbm [shape: f32[64,64], index: 1, kind: input, shape index: {}]   ;;  %s5115_s2 = inlined_call_operand.hbm [shape: f32[9,64,256], index: 2, kind: input, shape index: {}]   ;;  %s5116_s3 = inlined_call_operand.hbm [shape: f32[9,64,256], index: 3, kind: input, shape index: {}]   ;;  %s5117_s4 = inlined_call_operand.vmem [shape: f32[32,64], index: 4, kind: input, shape index: {}]   ;;  %s5118_s5 = inlined_call_operand.vmem [shape: f32[32,1], index: 5, kind: input, shape index: {}]   ;;  %s5119_s6 = inlined_call_operand.hbm [shape: f32[2,32,256], index: 6, kind: output, shape index: {}]  }
   0x1   :  { %5165 = sst [smem:[#allocation40_spill]] %s5114_s1 }
   0x2   :  { %11 = vsyncpa [#allocation4], 0 }
   0x3   :  { %13 = vsyncpa [#allocation4 + $0x1], 0 }
   0x4   :  { %14 = vsyncpa [#allocation7], 0 }
   0x5   :  { %15 = vsyncpa [#allocation10], 0 }
   0x6   :  { %16 = vsyncpa [#allocation5], 0 }
   0x7   :  { %18 = vsyncpa [#allocation5 + $0x1], 0  ;;  %s3009_s21 = smov 0   ;;  %s3011_s22 = smov 0  }
   0x8   :  { %s3013_s23 = smov 0   ;;  %s3015_s24 = smov 0  }
   0x9 LB: > { %s3030_s25 = sadd.s32 4294967295, %s2952_s24   ;;  %s2564_s26 = sadd.s32 4294967294, %s2952_s24   ;;  %s2952_s24 = sphi %s3015_s24, %s5271_s24   ;;  %s2948_s23 = sphi %s3013_s23, %s5270_s23   ;;  %s2944_s22 = sphi %s3011_s22, %s5269_s22   ;;  %s2940_s21 = sphi %s3009_s21, %s5268_s21  }
   0xa   : > { %p44_p0 = scmp.ne.s32.totalorder %s2944_s22, %s2940_s21  ;;  %p5120_p1 = scmp.eq.s32.totalorder %s3030_s25, 0 }
   0xb   : > { %p179_p3 = scmp.eq.s32.totalorder %s2564_s26, 1  ;;  %p2565_p5 = scmp.ge.s32.totalorder %s2952_s24, 1 }
   0xc   : > { %p3039_p4 = por %p5120_p1, %p44_p0  ;;  %p186_p7 = scmp.lt.s32.totalorder %s2952_s24, 3 }
   0xd   : > { %p3044_p6 = por %p179_p3, %p44_p0  ;;  %s2954_s30 = smov [#allocation6]  }
   0xe   : > { %s5166_s27 = scalar_select %p3039_p4, 1, 0 }
   0xf   : > { %s5167_s28 = scalar_select %p3044_p6, 1, 0 }
  0x10   : > { %p3049_p8 = pnand %p2565_p5, %p186_p7  ;;  %s198_s7 = sshll.u32 %s2954_s30, 4  ;;  %s3053_s7 = int_to_ptr.vmem [resolvable:$true] %s198_s7 }
  0x11   : > { %s2955_s9 = smov [#allocation8]   ;;  %s5170_s1 = sld [smem:[#allocation40_spill]] }
  0x12   : > { %s5168_s29 = scalar_select %p3049_p8, 1, 0 }
  0x13   : > { %p2654_p9 = pneg %p3049_p8  ;;  %s211_s10 = sshll.u32 %s2955_s9, 4  ;;  %s3064_s10 = int_to_ptr.vmem [resolvable:$true] %s211_s10 }
  0x15   : > { %p3060_p11 = pnand %p2654_p9, %p5120_p1 }
  0x17   : > { %s2764_s13 = scalar_lea.hbm %s5170_s1, 1024  ;;  %p3074_p13 = pneg %p3060_p11 }
  0x18   : > { %p2765_p12 = scmp.ne.s32.totalorder %s5170_s1, %s2764_s13  ;;  %p2771_p5 = scmp.lt.u32.totalorder %s2764_s13, %s5170_s1 }
  0x1a   : > { %p2767_p0 = pnand %p3074_p13, %p2765_p12 }
  0x1c   : > { %p2768_p3 = pneg %p2767_p0 }
  0x1e   : > { %p2773_p7 = pnand %p2771_p5, %p2768_p3 }
  0x20   : > { %2776 = shalt.err (!%p2773_p7)
}
  0x21   : > { %s2777_s19 = scalar_lea.vmem %s3053_s7, 1024  ;;  %p2785_p2 = scmp.lt.s32.totalorder %s3053_s7, %s3053_s7 }
  0x22   : > { %p2778_p9 = scmp.ne.s32.totalorder %s3053_s7, %s2777_s19  ;;  %p2786_p6 = scmp.lt.s32.totalorder %s2777_s19, %s2777_s19 }
  0x24   : > { %p2780_p10 = pnand %p2778_p9, %p3074_p13  ;;  %p2787_p12 = por %p2786_p6, %p2785_p2 }
  0x26   : > { %p2781_p1 = pneg %p2780_p10 }
  0x28   : > { %p2788_p0 = pnand %p2787_p12, %p2781_p1 }
  0x2a   : > { %2791 = shalt.err (!%p2788_p0)
}
  0x2b   : > { %s2956_s20 = smov 128   ;;  %s2957_s26 = smov 8  }
  0x2c   : > { %2657 = dma.hbm_to_vmem [thread:$0]  (!%p3060_p11), %s5170_s1, 1024, %s3053_s7, [#allocation7], %s2956_s20, %s2956_s20, %s2957_s26  }
  0x2d   : > { %s2792_s13 = scalar_lea.hbm %s5115_s2, 18432 }
  0x2e   : > { %p2793_p2 = scmp.ne.s32.totalorder %s5115_s2, %s2792_s13  ;;  %p2799_p10 = scmp.lt.u32.totalorder %s2792_s13, %s5115_s2 }
  0x30   : > { %p2795_p1 = pnand %p2793_p2, %p3074_p13 }
  0x32   : > { %p2796_p6 = pneg %p2795_p1 }
  0x34   : > { %p2801_p3 = pnand %p2799_p10, %p2796_p6 }
  0x36   : > { %2804 = shalt.err (!%p2801_p3)
}
  0x37   : > { %s2805_s7 = scalar_lea.vmem %s3064_s10, 18432  ;;  %p2813_p12 = scmp.lt.s32.totalorder %s3064_s10, %s3064_s10 }
  0x38   : > { %p2806_p5 = scmp.ne.s32.totalorder %s3064_s10, %s2805_s7  ;;  %p2814_p0 = scmp.lt.s32.totalorder %s2805_s7, %s2805_s7 }
  0x3a   : > { %p2808_p7 = pnand %p2806_p5, %p3074_p13  ;;  %p2815_p2 = por %p2814_p0, %p2813_p12 }
  0x3c   : > { %p2809_p9 = pneg %p2808_p7 }
  0x3e   : > { %p2816_p1 = pnand %p2815_p2, %p2809_p9 }
  0x40   : > { %2819 = shalt.err (!%p2816_p1)
}
  0x41   : > { %s2958_s19 = smov 256   ;;  %s2959_s20 = smov 16  }
  0x42   : > { %2660 = dma.hbm_to_vmem [thread:$0]  (!%p3060_p11), %s5115_s2, 18432, %s3064_s10, [#allocation7], %s2958_s19, %s2958_s19, %s2959_s20  }
  0x43   : > { %s2960_s9 = smov [#allocation9]   ;;  %s3122_s12 = sadd.s32 1, %s2952_s24  }
  0x44   : > { %s224_s11 = sshll.u32 %s2960_s9, 4  ;;  %s2820_s15 = scalar_lea.hbm %s5116_s3, 18432  ;;  %s225_s11 = int_to_ptr.vmem [resolvable:$true] %s224_s11 }
  0x45   : > { %p2821_p6 = scmp.ne.s32.totalorder %s5116_s3, %s2820_s15  ;;  %p2827_p5 = scmp.lt.u32.totalorder %s2820_s15, %s5116_s3 }
  0x47   : > { %p2823_p10 = pnand %p2821_p6, %p3074_p13 }
  0x49   : > { %p2824_p3 = pneg %p2823_p10 }
  0x4b   : > { %p2829_p7 = pnand %p2827_p5, %p2824_p3 }
  0x4d   : > { %2832 = shalt.err (!%p2829_p7)
}
  0x4e   : > { %s2833_s10 = scalar_lea.vmem %s225_s11, 18432  ;;  %p2841_p2 = scmp.lt.s32.totalorder %s225_s11, %s225_s11 }
  0x4f   : > { %p2834_p9 = scmp.ne.s32.totalorder %s225_s11, %s2833_s10  ;;  %p2842_p1 = scmp.lt.s32.totalorder %s2833_s10, %s2833_s10 }
  0x51   : > { %p2836_p12 = pnand %p2834_p9, %p3074_p13  ;;  %p2843_p4 = por %p2842_p1, %p2841_p2 }
  0x53   : > { %p2837_p0 = pneg %p2836_p12 }
  0x55   : > { %p2844_p8 = pnand %p2843_p4, %p2837_p0 }
  0x57   : > { %2847 = shalt.err (!%p2844_p8)
}
  0x58   : > { %2663 = dma.hbm_to_vmem [thread:$0]  (!%p3060_p11), %s5116_s3, 18432, %s225_s11, [#allocation10], %s2958_s19, %s2958_s19, %s2959_s20  }
  0x59   : > { %s28_s16 = ssub.s32 %s2952_s24, %s3122_s12  ;;  %s31_s8 = sadd.s32 1, %s2948_s23 }
  0x5a   : > { %p29_p4 = scmp.eq.s32.totalorder %s28_s16, 0  ;;  %p38_p8 = scmp.ne.s32.totalorder %s2948_s23, %s2944_s22 }
  0x5b   : > { %p39_p13 = scmp.eq.s32.totalorder %s2952_s24, 0  ;;  %p2675_p6 = scmp.lt.s32.totalorder %s2952_s24, 2 }
  0x5c   : > { %s3153_s30 = scalar_select %p29_p4, %s2948_s23, %s31_s8  }
  0x5d   : > { %p40_p10 = por %p39_p13, %p38_p8  ;;  %p5172_p3 = scmp.eq.s32.totalorder %s3030_s25, 1 }
  0x5e   : > { %s244_s13 = sand.u32 1, %s2948_s23   ;;  %s2604_s14 = sshll.u32 %s2952_s24, 11 }
  0x5f   : > { %p3157_p5 = por %p5172_p3, %p38_p8  ;;  %s2570_s15 = sshll.u32 %s244_s13, 7 }
  0x60   : > { %s3166_s11 = scalar_lea.hbm %s5113_s0, %s2604_s14  ;;  %s248_s7 = scalar_lea.vmem [#allocation3], %s2570_s15 }
  0x61   : > { %s255_s10 = sshll.u32 %s248_s7, 4  ;;  %p3168_p11 = pnand %p2675_p6, %p40_p10  ;;  %s3172_s10 = int_to_ptr.vmem [resolvable:$true] %s255_s10 }
  0x62   : > { %s3174_s26 = scalar_lea.sflag [#allocation4], %s244_s13  ;;  %s2848_s16 = scalar_lea.hbm %s3166_s11, 2048 }
  0x63   : > { %p2849_p7 = scmp.ne.s32.totalorder %s3166_s11, %s2848_s16  ;;  %p2850_p9 = pneg %p3168_p11 }
  0x64   : > { %s2853_s15 = scalar_lea.hbm %s5113_s0, 4096  ;;  %p2854_p2 = scmp.lt.u32.totalorder %s3166_s11, %s5113_s0 }
  0x65   : > { %p2851_p12 = pnand %p2850_p9, %p2849_p7  ;;  %p2855_p1 = scmp.lt.u32.totalorder %s2853_s15, %s2848_s16 }
  0x66   : > { %p2857_p8 = scmp.lt.u32.totalorder %s2848_s16, %s3166_s11 }
  0x67   : > { %p2852_p0 = pneg %p2851_p12  ;;  %p2856_p4 = por %p2855_p1, %p2854_p2 }
  0x69   : > { %p2858_p13 = por %p2857_p8, %p2856_p4 }
  0x6b   : > { %p2859_p6 = pnand %p2858_p13, %p2852_p0 }
  0x6d   : > { %2862 = shalt.err (!%p2859_p6)
}
  0x6e   : > { %s2863_s13 = scalar_lea.vmem %s3172_s10, 2048  ;;  %s2961_s7 = smov [#allocation3]  }
  0x6f   : > { %p2864_p10 = scmp.ne.s32.totalorder %s3172_s10, %s2863_s13  ;;  %s2868_s8 = sshll.u32 %s2961_s7, 4  ;;  %s2869_s8 = int_to_ptr.vmem [resolvable:$false] %s2868_s8 }
  0x70   : > { %s2870_s14 = scalar_lea.vmem %s2869_s8, 4096  ;;  %p2871_p12 = scmp.lt.s32.totalorder %s3172_s10, %s2869_s8 }
  0x71   : > { %p2866_p3 = pnand %p2864_p10, %p2850_p9  ;;  %p2872_p2 = scmp.lt.s32.totalorder %s2870_s14, %s2863_s13 }
  0x73   : > { %p2867_p7 = pneg %p2866_p3  ;;  %p2873_p1 = por %p2872_p2, %p2871_p12 }
  0x75   : > { %p2874_p4 = pnand %p2873_p1, %p2867_p7 }
  0x77   : > { %2877 = shalt.err (!%p2874_p4)
}
  0x78   : > { %2667 = dma.hbm_to_vmem [thread:$0]  (!%p3168_p11), %s3166_s11, 2048, %s3172_s10, %s3174_s26, %s2958_s19, %s2958_s19, %s2959_s20  }
  0x79   : > { %p5175_p9 = scmp.ne.s32.totalorder %s5168_s29, 0 }
  0x7b   : > { %267 = sbr.rel (%p5175_p9) target bundleno = 1602 (0x642), region = 44 }
  0x82   : > { %s3208_s16 = sand.u32 1, %s2944_s22   ;;  %p5176_p0 = scmp.ne.s32.totalorder %s5166_s27, 0 }
  0x83   : > { %s2574_s15 = sshll.u32 %s3208_s16, 7  ;;  %s270_s17 = scalar_lea.sflag [#allocation4], %s3208_s16 }
  0x84   : > { %s3212_s18 = scalar_lea.vmem [#allocation3], %s2574_s15 }
  0x85   : > { %2923 = dma.done.wait (%p5176_p0), %s270_s17, 2048  }
  0x86   : > { %2925 = vsyncadd (%p5176_p0), %s270_s17, 4294965248  ;;  %p5177_p11 = scmp.eq.s32.totalorder %s3030_s25, 0 }
  0x88   : > { %2927 = dma.done.wait (%p5177_p11), [#allocation7], 19456   ;;  %p5178_p8 = pmov %p5177_p11 }
  0x8a   : > { %2929 = vsyncadd (%p5178_p8), [#allocation7], 4294947840  ;;  %p5179_p13 = pmov %p5178_p8 }
  0x8b   : > { %p5180_p6 = pmov %p5178_p8 }
  0x8c   : > { %2931 = dma.done.wait (%p5179_p13), [#allocation10], 18432  }
  0x8d   : > { %2933 = vsyncadd (%p5180_p6), [#allocation10], 4294948864  ;;  %v5123_v0 = vmov 0.0   ;;  %v315_v1 = vld [vmem:[%s3212_s18 + $0x8] sm:$0xff]  ;;  %v317_v2 = vld [vmem:[%s3212_s18 + $0x18] sm:$0xff]  ;;  %vm338_vm0 = vcmask 523264  }
  0x8e   : > { %427 = vmatprep.mubr.f32.mxu0 %v5123_v0  ;;  %2335 = vmatprep.mubr.f32.mxu1 %v5123_v0  ;;  %v314_v3 = vld [vmem:[%s3212_s18] sm:$0xff]  ;;  %v2606_v4 = vpack.c.bf16 %v317_v2, %v315_v1  ;;  %v316_v5 = vld [vmem:[%s3212_s18 + $0x10] sm:$0xff]  ;;  %v319_v6 = vld [vmem:[%s3212_s18 + $0x28] sm:$0xff]  ;;  %s2963_s27 = smov 17   ;;  %s2964_s29 = smov 16  }
  0x8f   : > { %v321_v7 = vld [vmem:[%s3212_s18 + $0x38] sm:$0xff]  ;;  %v2608_v8 = vpack.c.bf16 %v316_v5, %v314_v3  ;;  %v318_v10 = vld [vmem:[%s3212_s18 + $0x20] sm:$0xff]  ;;  %v320_v11 = vld [vmem:[%s3212_s18 + $0x30] sm:$0xff]  ;;  %s2965_s19 = smov 15   ;;  %s2966_s20 = smov 1  }
  0x90   : > { %v2610_v9 = vpack.c.bf16 %v321_v7, %v319_v6  ;;  %v323_v12 = vld [vmem:[%s3212_s18 + $0x48] sm:$0xff]  ;;  %2607 = vmatprep.subr.bf16.mxu0 %v2606_v4  ;;  %v325_v13 = vld [vmem:[%s3212_s18 + $0x58] sm:$0xff]  ;;  %v2612_v14 = vpack.c.bf16 %v320_v11, %v318_v10  ;;  %v322_v16 = vld [vmem:[%s3212_s18 + $0x40] sm:$0xff]  ;;  %s2967_s11 = smov 127   ;;  %s2968_s10 = smov 113  }
  0x91   : > { %2609 = vmatpush1.bf16.msra.mxu0 %v2608_v8  ;;  %v2614_v15 = vpack.c.bf16 %v325_v13, %v323_v12  ;;  %v324_v17 = vld [vmem:[%s3212_s18 + $0x50] sm:$0xff]  ;;  %v327_v18 = vld [vmem:[%s3212_s18 + $0x68] sm:$0xff]  ;;  %v329_v19 = vld [vmem:[%s3212_s18 + $0x78] sm:$0xff]  ;;  %s2969_s1 = smov 112   ;;  %s2970_s26 = smov 111  }
  0x92   : > { %2611 = vmatprep.subr.bf16.mxu0 %v2610_v9  ;;  %v2616_v20 = vpack.c.bf16 %v324_v17, %v322_v16  ;;  %v2618_v21 = vpack.c.bf16 %v329_v19, %v327_v18  ;;  %v326_v22 = vld [vmem:[%s3212_s18 + $0x60] sm:$0xff]  ;;  %v328_v23 = vld [vmem:[%s3212_s18 + $0x70] sm:$0xff]  ;;  %v331_v26 = vld [vmem:[#allocation6 + $0x8] sm:$0xff]  ;;  %s2578_s8 = sshll.u32 %s3208_s16, 6  ;;  %s2605_s15 = sshll.u32 %s3030_s25, 10 }
  0x93   : > { %v2620_v24 = vpack.c.bf16 %v328_v23, %v326_v22  ;;  %v330_v25 = vld [vmem:[#allocation6] sm:$0xff]  ;;  %v332_v27 = vld [vmem:[#allocation6 + $0x10] sm:$0xff]  ;;  %v333_v28 = vld [vmem:[#allocation6 + $0x18] sm:$0xff]  ;;  %s313_s14 = scalar_lea.vmem [#allocation11], %s2578_s8  ;;  %s2449_s25 = scalar_lea.sflag [#allocation5], %s3208_s16 }
  0x94   : > { %v334_v29 = vld [vmem:[#allocation6 + $0x20] sm:$0xff]  ;;  %v335_v30 = vld [vmem:[#allocation6 + $0x28] sm:$0xff]  ;;  %v336_v31 = vld [vmem:[#allocation6 + $0x30] sm:$0xff]  ;;  %s2462_s17 = sshll.u32 %s313_s14, 4  ;;  %s5068_s17 = int_to_ptr.vmem [resolvable:$true] %s2462_s17 }
  0x95   : > { %2613 = vmatpush1.bf16.msra.mxu0 %v2612_v14  ;;  %v337_v32 = vld [vmem:[#allocation6 + $0x38] sm:$0xff] }
  0x96   : > { %2615 = vmatprep.subr.bf16.mxu0 %v2614_v15 }
  0x99   : > { %2617 = vmatpush1.bf16.msra.mxu0 %v2616_v20 }
  0x9a   : > { %2619 = vmatprep.subr.bf16.mxu0 %v2618_v21 }
  0x9d   : > { %2621 = vmatpush1.bf16.msra.mxu0 %v2620_v24 }
  0xa0   : > { %2579 = vmatmul.mubr.msk.f32.vlgmr.msra.gmra.mrb[0].mxu0 %vm338_vm0, %v330_v25 }
  0xa1   : > { %433 = vmatprep.mubr.f32.mxu0 %v5123_v0 }
  0xa4   : > { %2580 = vmatmul.mubr.msk.f32.gmra.mrb[2].mxu0 %vm338_vm0, %v331_v26 }
  0xa5   : > { %439 = vmatprep.mubr.f32.mxu0 %v5123_v0 }
  0xa8   : > { %2581 = vmatmul.mubr.msk.f32.gmra.mrb[4].mxu0 %vm338_vm0, %v332_v27 }
  0xa9   : > { %445 = vmatprep.mubr.f32.mxu0 %v5123_v0 }
  0xac   : > { %2582 = vmatmul.mubr.msk.f32.gmra.mrb[6].mxu0 %vm338_vm0, %v333_v28 }
  0xad   : > { %451 = vmatprep.mubr.f32.mxu0 %v5123_v0 }
  0xb0   : > { %2583 = vmatmul.mubr.msk.f32.gmra.mrb[8].mxu0 %vm338_vm0, %v334_v29 }
  0xb1   : > { %457 = vmatprep.mubr.f32.mxu0 %v5123_v0 }
  0xb4   : > { %2584 = vmatmul.mubr.msk.f32.gmra.mrb[10].mxu0 %vm338_vm0, %v335_v30 }
  0xb5   : > { %463 = vmatprep.mubr.f32.mxu0 %v5123_v0 }
  0xb8   : > { %2585 = vmatmul.mubr.msk.f32.gmra.mrb[12].mxu0 %vm338_vm0, %v336_v31 }
  0xb9   : > { %469 = vmatprep.mubr.f32.mxu0 %v5123_v0  ;;  %v541_v0 = vlaneseq }
  0xbc   : > { %2586 = vmatmul.mubr.msk.f32.gmra.mrb[14].mxu0 %vm338_vm0, %v337_v32 }
 0x173   : > { %v3259_v33 = vpop.f32.mrb[0].mxu0 }
 0x174   : > { %509 = vrot.lane.b32.xlu0 %v3259_v33, %s2963_s27  ;;  %v3263_v34 = vpop.f32.mrb[1].mxu0 }
 0x177   : > { %v3265_v35 = vpop.f32.mrb[2].mxu0 }
 0x178   : > { %608 = vrot.lane.b32.xlu0 %v3259_v33, %s2964_s29  ;;  %610 = vrot.lane.b32.xlu1 %v3265_v35, %s2964_s29  ;;  %v3271_v36 = vpop.f32.mrb[3].mxu0 }
 0x17b   : > { %v3273_v37 = vpop.f32.mrb[4].mxu0 }
 0x17c   : > { %706 = vrot.lane.b32.xlu0 %v3259_v33, %s2965_s19  ;;  %708 = vrot.lane.b32.xlu1 %v3265_v35, %s2965_s19  ;;  %v3279_v38 = vpop.f32.mrb[5].mxu0 }
 0x17f   : > { %v3281_v39 = vpop.f32.mrb[6].mxu0 }
 0x180   : > { %804 = vrot.lane.b32.xlu0 %v3259_v33, %s2966_s20  ;;  %806 = vrot.lane.b32.xlu1 %v3265_v35, %s2966_s20  ;;  %v3287_v40 = vpop.f32.mrb[7].mxu0 }
 0x183   : > { %v3289_v41 = vpop.f32.mrb[8].mxu0 }
 0x184   : > { %902 = vrot.lane.b32.xlu0 %v3259_v33, %s2967_s11  ;;  %904 = vrot.lane.b32.xlu1 %v3265_v35, %s2967_s11  ;;  %v3295_v42 = vpop.f32.mrb[9].mxu0 }
 0x187   : > { %v3313_v43 = vpop.f32.mrb[10].mxu0 }
 0x188   : > { %1000 = vrot.lane.b32.xlu0 %v3259_v33, %s2968_s10  ;;  %1002 = vrot.lane.b32.xlu1 %v3265_v35, %s2968_s10  ;;  %5181 = vst [vmem:[#allocation16_spill] sm:$0xff] %v3313_v43  ;;  %v3319_v44 = vpop.f32.mrb[11].mxu0 }
 0x189   : > { %5182 = vst [vmem:[#allocation17_spill] sm:$0xff] %v3319_v44 }
 0x18b   : > { %v3345_v45 = vpop.f32.mrb[12].mxu0 }
 0x18c   : > { %1098 = vrot.lane.b32.xlu0 %v3259_v33, %s2969_s1  ;;  %1100 = vrot.lane.b32.xlu1 %v3265_v35, %s2969_s1  ;;  %5183 = vst [vmem:[#allocation18_spill] sm:$0xff] %v3345_v45  ;;  %v3351_v46 = vpop.f32.mrb[13].mxu0 }
 0x18f   : > { %v3369_v47 = vpop.f32.mrb[14].mxu0 }
 0x190   : > { %1196 = vrot.lane.b32.xlu0 %v3259_v33, %s2970_s26  ;;  %1198 = vrot.lane.b32.xlu1 %v3265_v35, %s2970_s26  ;;  %v3375_v48 = vpop.f32.mrb[15].mxu0 }
 0x194   : > { %525 = vrot.lane.b32.xlu0 %v3263_v34, %s2963_s27  ;;  %527 = vrot.lane.b32.xlu1 %v3271_v36, %s2963_s27 }
 0x198   : > { %624 = vrot.lane.b32.xlu0 %v3263_v34, %s2964_s29  ;;  %626 = vrot.lane.b32.xlu1 %v3271_v36, %s2964_s29 }
 0x19c   : > { %722 = vrot.lane.b32.xlu0 %v3263_v34, %s2965_s19  ;;  %724 = vrot.lane.b32.xlu1 %v3271_v36, %s2965_s19 }
 0x1a0   : > { %820 = vrot.lane.b32.xlu0 %v3263_v34, %s2966_s20  ;;  %822 = vrot.lane.b32.xlu1 %v3271_v36, %s2966_s20 }
 0x1a4   : > { %918 = vrot.lane.b32.xlu0 %v3263_v34, %s2967_s11  ;;  %920 = vrot.lane.b32.xlu1 %v3271_v36, %s2967_s11 }
 0x1a8   : > { %1016 = vrot.lane.b32.xlu0 %v3263_v34, %s2968_s10  ;;  %1018 = vrot.lane.b32.xlu1 %v3271_v36, %s2968_s10 }
 0x1ac   : > { %1114 = vrot.lane.b32.xlu0 %v3263_v34, %s2969_s1  ;;  %1116 = vrot.lane.b32.xlu1 %v3271_v36, %s2969_s1 }
 0x1b0   : > { %1212 = vrot.lane.b32.xlu0 %v3263_v34, %s2970_s26  ;;  %1214 = vrot.lane.b32.xlu1 %v3271_v36, %s2970_s26 }
 0x1b4   : > { %511 = vrot.lane.b32.xlu0 %v3265_v35, %s2963_s27  ;;  %513 = vrot.lane.b32.xlu1 %v3273_v37, %s2963_s27 }
 0x1b8   : > { %612 = vrot.lane.b32.xlu0 %v3273_v37, %s2964_s29  ;;  %515 = vrot.lane.b32.xlu1 %v3281_v39, %s2963_s27 }
 0x1bc   : > { %710 = vrot.lane.b32.xlu0 %v3273_v37, %s2965_s19  ;;  %614 = vrot.lane.b32.xlu1 %v3281_v39, %s2964_s29 }
 0x1c0   : > { %808 = vrot.lane.b32.xlu0 %v3273_v37, %s2966_s20  ;;  %712 = vrot.lane.b32.xlu1 %v3281_v39, %s2965_s19 }
 0x1c4   : > { %906 = vrot.lane.b32.xlu0 %v3273_v37, %s2967_s11  ;;  %810 = vrot.lane.b32.xlu1 %v3281_v39, %s2966_s20 }
 0x1c8   : > { %1004 = vrot.lane.b32.xlu0 %v3273_v37, %s2968_s10  ;;  %908 = vrot.lane.b32.xlu1 %v3281_v39, %s2967_s11 }
 0x1cc   : > { %1102 = vrot.lane.b32.xlu0 %v3273_v37, %s2969_s1  ;;  %1006 = vrot.lane.b32.xlu1 %v3281_v39, %s2968_s10 }
 0x1d0   : > { %1200 = vrot.lane.b32.xlu0 %v3273_v37, %s2970_s26  ;;  %1104 = vrot.lane.b32.xlu1 %v3281_v39, %s2969_s1 }
 0x1d4   : > { %529 = vrot.lane.b32.xlu0 %v3279_v38, %s2963_s27  ;;  %1202 = vrot.lane.b32.xlu1 %v3281_v39, %s2970_s26 }
 0x1d8   : > { %628 = vrot.lane.b32.xlu0 %v3279_v38, %s2964_s29  ;;  %531 = vrot.lane.b32.xlu1 %v3287_v40, %s2963_s27 }
 0x1dc   : > { %726 = vrot.lane.b32.xlu0 %v3279_v38, %s2965_s19  ;;  %630 = vrot.lane.b32.xlu1 %v3287_v40, %s2964_s29 }
 0x1e0   : > { %824 = vrot.lane.b32.xlu0 %v3279_v38, %s2966_s20  ;;  %728 = vrot.lane.b32.xlu1 %v3287_v40, %s2965_s19 }
 0x1e4   : > { %922 = vrot.lane.b32.xlu0 %v3279_v38, %s2967_s11  ;;  %826 = vrot.lane.b32.xlu1 %v3287_v40, %s2966_s20 }
 0x1e6   : > { %v3405_v49 = vpop.permute.xlu0 %509 }
 0x1e8   : > { %1020 = vrot.lane.b32.xlu0 %v3279_v38, %s2968_s10  ;;  %924 = vrot.lane.b32.xlu1 %v3287_v40, %s2967_s11 }
 0x1ea   : > { %v3411_v50 = vpop.permute.xlu0 %608  ;;  %v3413_v51 = vpop.permute.xlu1 %610 }
 0x1ec   : > { %1118 = vrot.lane.b32.xlu0 %v3279_v38, %s2969_s1  ;;  %1022 = vrot.lane.b32.xlu1 %v3287_v40, %s2968_s10 }
 0x1ee   : > { %v3419_v52 = vpop.permute.xlu0 %706  ;;  %v3421_v53 = vpop.permute.xlu1 %708 }
 0x1f0   : > { %1216 = vrot.lane.b32.xlu0 %v3279_v38, %s2970_s26  ;;  %1120 = vrot.lane.b32.xlu1 %v3287_v40, %s2969_s1 }
 0x1f2   : > { %v3427_v54 = vpop.permute.xlu0 %804  ;;  %v3429_v55 = vpop.permute.xlu1 %806 }
 0x1f4   : > { %1218 = vrot.lane.b32.xlu1 %v3287_v40, %s2970_s26  ;;  %517 = vrot.lane.b32.xlu0 %v3289_v41, %s2963_s27 }
 0x1f6   : > { %v3435_v56 = vpop.permute.xlu0 %902  ;;  %v3437_v57 = vpop.permute.xlu1 %904 }
 0x1f8   : > { %616 = vrot.lane.b32.xlu1 %v3289_v41, %s2964_s29  ;;  %1008 = vrot.lane.b32.xlu0 %v3289_v41, %s2968_s10 }
 0x1fa   : > { %v3443_v58 = vpop.permute.xlu0 %1000  ;;  %v3445_v59 = vpop.permute.xlu1 %1002 }
 0x1fc   : > { %714 = vrot.lane.b32.xlu1 %v3289_v41, %s2965_s19  ;;  %1106 = vrot.lane.b32.xlu0 %v3289_v41, %s2969_s1 }
 0x1fe   : > { %v3451_v60 = vpop.permute.xlu0 %1098  ;;  %v3453_v61 = vpop.permute.xlu1 %1100 }
 0x200   : > { %812 = vrot.lane.b32.xlu1 %v3289_v41, %s2966_s20  ;;  %1204 = vrot.lane.b32.xlu0 %v3289_v41, %s2970_s26 }
 0x202   : > { %v3459_v62 = vpop.permute.xlu0 %1196  ;;  %v3461_v63 = vpop.permute.xlu1 %1198 }
 0x203   : > { %5184 = vst [vmem:[#allocation19_spill] sm:$0xff] %v3459_v62  ;;  %v483_v62 = vld [vmem:[#allocation8 + $0x230] sm:$0xff] }
 0x204   : > { %910 = vrot.lane.b32.xlu1 %v3289_v41, %s2967_s11  ;;  %533 = vrot.lane.b32.xlu0 %v3295_v42, %s2963_s27 }
 0x206   : > { %v3467_v1 = vpop.permute.xlu0 %525  ;;  %v3469_v2 = vpop.permute.xlu1 %527 }
 0x208   : > { %632 = vrot.lane.b32.xlu1 %v3295_v42, %s2964_s29  ;;  %1024 = vrot.lane.b32.xlu0 %v3295_v42, %s2968_s10 }
 0x20a   : > { %v3475_v3 = vpop.permute.xlu0 %624  ;;  %v3477_v4 = vpop.permute.xlu1 %626 }
 0x20c   : > { %730 = vrot.lane.b32.xlu1 %v3295_v42, %s2965_s19  ;;  %1122 = vrot.lane.b32.xlu0 %v3295_v42, %s2969_s1 }
 0x20e   : > { %v3483_v5 = vpop.permute.xlu0 %722  ;;  %v3485_v6 = vpop.permute.xlu1 %724 }
 0x210   : > { %828 = vrot.lane.b32.xlu1 %v3295_v42, %s2966_s20  ;;  %1220 = vrot.lane.b32.xlu0 %v3295_v42, %s2970_s26 }
 0x212   : > { %v3491_v7 = vpop.permute.xlu0 %820  ;;  %v3493_v8 = vpop.permute.xlu1 %822 }
 0x214   : > { %926 = vrot.lane.b32.xlu1 %v3295_v42, %s2967_s11  ;;  %618 = vrot.lane.b32.xlu0 %v3313_v43, %s2964_s29 }
 0x216   : > { %v3499_v9 = vpop.permute.xlu0 %918  ;;  %v3501_v10 = vpop.permute.xlu1 %920 }
 0x218   : > { %519 = vrot.lane.b32.xlu1 %v3313_v43, %s2963_s27  ;;  %716 = vrot.lane.b32.xlu0 %v3313_v43, %s2965_s19 }
 0x21a   : > { %v3507_v11 = vpop.permute.xlu0 %1016  ;;  %v3509_v12 = vpop.permute.xlu1 %1018 }
 0x21c   : > { %1010 = vrot.lane.b32.xlu1 %v3313_v43, %s2968_s10  ;;  %814 = vrot.lane.b32.xlu0 %v3313_v43, %s2966_s20 }
 0x21e   : > { %v3515_v13 = vpop.permute.xlu0 %1114  ;;  %v3517_v14 = vpop.permute.xlu1 %1116 }
 0x220   : > { %1108 = vrot.lane.b32.xlu1 %v3313_v43, %s2969_s1  ;;  %912 = vrot.lane.b32.xlu0 %v3313_v43, %s2967_s11 }
 0x222   : > { %v3523_v15 = vpop.permute.xlu0 %1212  ;;  %v3525_v16 = vpop.permute.xlu1 %1214 }
 0x223   : > { %5185 = vst [vmem:[#allocation20_spill] sm:$0xff] %v3523_v15  ;;  %v484_v15 = vld [vmem:[#allocation8 + $0x238] sm:$0xff] }
 0x224   : > { %1206 = vrot.lane.b32.xlu1 %v3313_v43, %s2970_s26  ;;  %634 = vrot.lane.b32.xlu0 %v3319_v44, %s2964_s29 }
 0x226   : > { %v512_v17 = vpop.permute.xlu0 %511  ;;  %v3531_v18 = vpop.permute.xlu1 %513 }
 0x228   : > { %535 = vrot.lane.b32.xlu1 %v3319_v44, %s2963_s27  ;;  %732 = vrot.lane.b32.xlu0 %v3319_v44, %s2965_s19 }
 0x22a   : > { %v3537_v19 = vpop.permute.xlu0 %612  ;;  %v3539_v20 = vpop.permute.xlu1 %515 }
 0x22c   : > { %1026 = vrot.lane.b32.xlu1 %v3319_v44, %s2968_s10  ;;  %830 = vrot.lane.b32.xlu0 %v3319_v44, %s2966_s20 }
 0x22e   : > { %v3545_v21 = vpop.permute.xlu0 %710  ;;  %v3547_v22 = vpop.permute.xlu1 %614 }
 0x22f   : > { %5186 = vst [vmem:[#allocation21_spill] sm:$0xff] %v3545_v21  ;;  %5187 = vst [vmem:[#allocation22_spill] sm:$0xff] %v3547_v22  ;;  %v661_v21 = vld [vmem:[#allocation8 + $0x98] sm:$0xff] }
 0x230   : > { %1124 = vrot.lane.b32.xlu1 %v3319_v44, %s2969_s1  ;;  %928 = vrot.lane.b32.xlu0 %v3319_v44, %s2967_s11 }
 0x232   : > { %v3553_v23 = vpop.permute.xlu0 %808  ;;  %v3555_v24 = vpop.permute.xlu1 %712 }
 0x233   : > { %5188 = vst [vmem:[#allocation23_spill] sm:$0xff] %v3553_v23  ;;  %5189 = vst [vmem:[#allocation24_spill] sm:$0xff] %v3555_v24 }
 0x234   : > { %1222 = vrot.lane.b32.xlu1 %v3319_v44, %s2970_s26  ;;  %521 = vrot.lane.b32.xlu0 %v3345_v45, %s2963_s27 }
 0x236   : > { %v3561_v25 = vpop.permute.xlu0 %906  ;;  %v3563_v26 = vpop.permute.xlu1 %810 }
 0x237   : > { %5190 = vst [vmem:[#allocation25_spill] sm:$0xff] %v3561_v25  ;;  %5191 = vst [vmem:[#allocation26_spill] sm:$0xff] %v3563_v26  ;;  %v479_v25 = vld [vmem:[#allocation8 + $0x210] sm:$0xff]  ;;  %v480_v26 = vld [vmem:[#allocation8 + $0x218] sm:$0xff] }
 0x238   : > { %620 = vrot.lane.b32.xlu1 %v3345_v45, %s2964_s29  ;;  %816 = vrot.lane.b32.xlu0 %v3345_v45, %s2966_s20 }
 0x23a   : > { %v3569_v27 = vpop.permute.xlu0 %1004  ;;  %v3571_v28 = vpop.permute.xlu1 %908 }
 0x23b   : > { %5192 = vst [vmem:[#allocation27_spill] sm:$0xff] %v3569_v27  ;;  %5193 = vst [vmem:[#allocation28_spill] sm:$0xff] %v3571_v28  ;;  %v563_v27 = vld [vmem:[#allocation8 + $0x18] sm:$0xff] }
 0x23c   : > { %718 = vrot.lane.b32.xlu1 %v3345_v45, %s2965_s19  ;;  %914 = vrot.lane.b32.xlu0 %v3345_v45, %s2967_s11 }
 0x23e   : > { %v3577_v29 = vpop.permute.xlu0 %1102  ;;  %v3579_v30 = vpop.permute.xlu1 %1006 }
 0x23f   : > { %5194 = vst [vmem:[#allocation29_spill] sm:$0xff] %v3577_v29  ;;  %5195 = vst [vmem:[#allocation30_spill] sm:$0xff] %v3579_v30  ;;  %v3597_v29 = vand.u32 127, %v541_v0  ;;  %v562_v30 = vld [vmem:[#allocation8 + $0x10] sm:$0xff] }
 0x240   : > { %636 = vrot.lane.b32.xlu1 %v3351_v46, %s2964_s29  ;;  %1012 = vrot.lane.b32.xlu0 %v3345_v45, %s2968_s10 }
 0x241   : > { %vm543_vm1 = vcmp.lt.s32.totalorder %v3597_v29, 17  ;;  %vm640_vm2 = vcmp.lt.s32.totalorder %v3597_v29, 16  ;;  %vm738_vm3 = vcmp.lt.s32.totalorder %v3597_v29, 15  ;;  %vm836_vm4 = vcmp.lt.s32.totalorder %v3597_v29, 1 }
 0x242   : > { %v3585_v31 = vpop.permute.xlu0 %1200  ;;  %v3587_v32 = vpop.permute.xlu1 %1104  ;;  %v545_v0 = vsel %vm543_vm1, %v512_v17, %v3469_v2  ;;  %vm934_vm5 = vcmp.lt.s32.totalorder %v3597_v29, 127  ;;  %vm1032_vm6 = vcmp.lt.s32.totalorder %v3597_v29, 113  ;;  %vm1130_vm7 = vcmp.lt.s32.totalorder %v3597_v29, 112 }
 0x243   : > { %5196 = vst [vmem:[#allocation31_spill] sm:$0xff] %v3585_v31  ;;  %5197 = vst [vmem:[#allocation32_spill] sm:$0xff] %v3587_v32  ;;  %v579_v23 = vmul.f32 %v563_v27, %v545_v0  ;;  %v650_v27 = vsel %vm640_vm2, %v3477_v4, %v3413_v51  ;;  %vm1228_vm8 = vcmp.lt.s32.totalorder %v3597_v29, 111 }
 0x244   : > { %734 = vrot.lane.b32.xlu1 %v3351_v46, %s2965_s19  ;;  %1110 = vrot.lane.b32.xlu0 %v3345_v45, %s2969_s1 }
 0x246   : > { %v3593_v44 = vpop.permute.xlu0 %529  ;;  %v3595_v43 = vpop.permute.xlu1 %1202 }
 0x247   : > { %5198 = vst [vmem:[#allocation33_spill] sm:$0xff] %v3595_v43  ;;  %v553_v43 = vsel %vm543_vm1, %v3469_v2, %v512_v17  ;;  %v495_v2 = vmul.f32 %v479_v25, %v3265_v35  ;;  %v496_v17 = vmul.f32 %v480_v26, %v3271_v36  ;;  %v478_v35 = vld [vmem:[#allocation8 + $0x208] sm:$0xff]  ;;  %v481_v26 = vld [vmem:[#allocation8 + $0x220] sm:$0xff] }
 0x248   : > { %523 = vrot.lane.b32.xlu1 %v3369_v47, %s2963_s27  ;;  %1208 = vrot.lane.b32.xlu0 %v3345_v45, %s2970_s26  ;;  %v578_v24 = vmul.f32 %v562_v30, %v553_v43  ;;  %v642_v43 = vsel %vm640_vm2, %v3413_v51, %v3477_v4  ;;  %v477_v30 = vld [vmem:[#allocation8 + $0x200] sm:$0xff] }
 0x249   : > { %v595_v25 = vadd.f32 %v579_v23, %v496_v17  ;;  %v493_v4 = vmul.f32 %v477_v30, %v3259_v33  ;;  %v3652_v23 = vmul.f32 %v478_v35, %v3263_v34  ;;  %v560_v17 = vld [vmem:[#allocation8] sm:$0xff]  ;;  %v552_v33 = vsel %vm543_vm1, %v3467_v1, %v3405_v49  ;;  %v561_v35 = vld [vmem:[#allocation8 + $0x8] sm:$0xff] }
 0x24a   : > { %v3603_v31 = vpop.permute.xlu0 %628  ;;  %v3605_v32 = vpop.permute.xlu1 %531  ;;  %v594_v36 = vadd.f32 %v578_v24, %v495_v2  ;;  %v758_v24 = vld [vmem:[#allocation8 + $0x110] sm:$0xff]  ;;  %v759_v2 = vld [vmem:[#allocation8 + $0x118] sm:$0xff] }
 0x24b   : > { %5199 = vst [vmem:[#allocation34_spill] sm:$0xff] %v3605_v32 }
 0x24c   : > { %818 = vrot.lane.b32.xlu1 %v3369_v47, %s2966_s20  ;;  %537 = vrot.lane.b32.xlu0 %v3351_v46, %s2963_s27 }
 0x24e   : > { %v3618_v45 = vpop.permute.xlu0 %726  ;;  %v3620_v28 = vpop.permute.xlu1 %630 }
 0x24f   : > { %5200 = vst [vmem:[#allocation35_spill] sm:$0xff] %v3618_v45  ;;  %5201 = vst [vmem:[#allocation36_spill] sm:$0xff] %v3620_v28  ;;  %v660_v28 = vld [vmem:[#allocation8 + $0x90] sm:$0xff] }
 0x250   : > { %916 = vrot.lane.b32.xlu1 %v3369_v47, %s2967_s11  ;;  %832 = vrot.lane.b32.xlu0 %v3351_v46, %s2966_s20  ;;  %v676_v0 = vmul.f32 %v660_v28, %v650_v27  ;;  %v740_v28 = vsel %vm738_vm3, %v3421_v53, %v3485_v6  ;;  %v3670_v27 = vmul.f32 %v481_v26, %v3273_v37  ;;  %v658_v37 = vld [vmem:[#allocation8 + $0x80] sm:$0xff]  ;;  %v659_v26 = vld [vmem:[#allocation8 + $0x88] sm:$0xff] }
 0x252   : > { %v3629_v22 = vpop.permute.xlu0 %824  ;;  %v3631_v45 = vpop.permute.xlu1 %728  ;;  %v692_v34 = vadd.f32 %v676_v0, %v594_v36  ;;  %v856_v36 = vld [vmem:[#allocation8 + $0x190] sm:$0xff]  ;;  %v641_v0 = vsel %vm640_vm2, %v3411_v50, %v3475_v3 }
 0x253   : > { %5202 = vst [vmem:[#allocation37_spill] sm:$0xff] %v3629_v22  ;;  %5203 = vst [vmem:[#allocation38_spill] sm:$0xff] %v3631_v45  ;;  %v677_v45 = vmul.f32 %v661_v21, %v642_v43  ;;  %v482_v22 = vld [vmem:[#allocation8 + $0x228] sm:$0xff]  ;;  %v748_v21 = vsel %vm738_vm3, %v3485_v6, %v3421_v53  ;;  %v3676_v53 = vmul.f32 %v483_v62, %v3281_v39 }
 0x254   : > { %1014 = vrot.lane.b32.xlu1 %v3369_v47, %s2968_s10  ;;  %930 = vrot.lane.b32.xlu0 %v3351_v46, %s2967_s11  ;;  %v3673_v30 = vmul.f32 %v482_v22, %v3279_v38  ;;  %v3679_v6 = vmul.f32 %v484_v15, %v3287_v40  ;;  %v649_v38 = vsel %vm640_vm2, %v3475_v3, %v3411_v50  ;;  %v757_v50 = vld [vmem:[#allocation8 + $0x108] sm:$0xff] }
 0x255   : > { %v693_v43 = vadd.f32 %v677_v45, %v595_v25  ;;  %v544_v45 = vsel %vm543_vm1, %v3405_v49, %v3467_v1  ;;  %v774_v39 = vmul.f32 %v758_v24, %v748_v21  ;;  %v775_v62 = vmul.f32 %v759_v2, %v740_v28  ;;  %v857_v25 = vld [vmem:[#allocation8 + $0x198] sm:$0xff] }
 0x256   : > { %v3646_v32 = vpop.permute.xlu0 %922  ;;  %v3648_v51 = vpop.permute.xlu1 %826  ;;  %v576_v15 = vmul.f32 %v560_v17, %v552_v33  ;;  %v838_v49 = vsel %vm836_vm4, %v3429_v55, %v3493_v8  ;;  %v846_v1 = vsel %vm836_vm4, %v3493_v8, %v3429_v55  ;;  %v577_v28 = vmul.f32 %v561_v35, %v544_v45  ;;  %v756_v17 = vld [vmem:[#allocation8 + $0x100] sm:$0xff] }
 0x257   : > { %v790_v24 = vadd.f32 %v774_v39, %v692_v34  ;;  %v791_v2 = vadd.f32 %v775_v62, %v693_v43  ;;  %v674_v21 = vmul.f32 %v658_v37, %v649_v38  ;;  %v747_v55 = vsel %vm738_vm3, %v3483_v5, %v3419_v52  ;;  %v854_v8 = vld [vmem:[#allocation8 + $0x180] sm:$0xff]  ;;  %v954_v39 = vld [vmem:[#allocation8 + $0x290] sm:$0xff]  ;;  %v955_v62 = vld [vmem:[#allocation8 + $0x298] sm:$0xff] }
 0x258   : > { %1112 = vrot.lane.b32.xlu1 %v3369_v47, %s2969_s1  ;;  %1028 = vrot.lane.b32.xlu0 %v3351_v46, %s2968_s10  ;;  %v739_v3 = vsel %vm738_vm3, %v3419_v52, %v3483_v5  ;;  %v845_v33 = vsel %vm836_vm4, %v3491_v7, %v3427_v54  ;;  %v872_v34 = vmul.f32 %v856_v36, %v846_v1 }
 0x259   : > { %v873_v43 = vmul.f32 %v857_v25, %v838_v49  ;;  %v592_v37 = vadd.f32 %v576_v15, %v493_v4  ;;  %v675_v38 = vmul.f32 %v659_v26, %v641_v0  ;;  %v936_v52 = vsel %vm934_vm5, %v3437_v57, %v3501_v10  ;;  %v855_v25 = vld [vmem:[#allocation8 + $0x188] sm:$0xff] }
 0x25a   : > { %v3691_v22 = vpop.permute.xlu0 %1020  ;;  %v3693_v40 = vpop.permute.xlu1 %924  ;;  %v944_v5 = vsel %vm934_vm5, %v3501_v10, %v3437_v57  ;;  %v772_v36 = vmul.f32 %v756_v17, %v747_v55  ;;  %v837_v4 = vsel %vm836_vm4, %v3427_v54, %v3491_v7  ;;  %v888_v15 = vadd.f32 %v872_v34, %v790_v24  ;;  %v952_v57 = vld [vmem:[#allocation8 + $0x280] sm:$0xff]  ;;  %v953_v10 = vld [vmem:[#allocation8 + $0x288] sm:$0xff]  ;;  %v1052_v55 = vld [vmem:[#allocation8 + $0x310] sm:$0xff] }
 0x25b   : > { %v889_v49 = vadd.f32 %v873_v43, %v791_v2  ;;  %v593_v1 = vadd.f32 %v577_v28, %v3652_v23  ;;  %v690_v26 = vadd.f32 %v674_v21, %v592_v37  ;;  %v773_v0 = vmul.f32 %v757_v50, %v739_v3  ;;  %v1053_v50 = vld [vmem:[#allocation8 + $0x318] sm:$0xff] }
 0x25c   : > { %1210 = vrot.lane.b32.xlu1 %v3369_v47, %s2970_s26  ;;  %1126 = vrot.lane.b32.xlu0 %v3351_v46, %s2969_s1  ;;  %v935_v54 = vsel %vm934_vm5, %v3435_v56, %v3499_v9  ;;  %v943_v7 = vsel %vm934_vm5, %v3499_v9, %v3435_v56  ;;  %v970_v24 = vmul.f32 %v954_v39, %v936_v52 }
 0x25d   : > { %v971_v23 = vmul.f32 %v955_v62, %v944_v5  ;;  %v691_v21 = vadd.f32 %v675_v38, %v593_v1  ;;  %v871_v17 = vmul.f32 %v855_v25, %v837_v4  ;;  %v1034_v3 = vsel %vm1032_vm6, %v3445_v59, %v3509_v12  ;;  %v1051_v62 = vld [vmem:[#allocation8 + $0x308] sm:$0xff] }
 0x25e   : > { %v3726_v35 = vpop.permute.xlu0 %1118  ;;  %v3728_v45 = vpop.permute.xlu1 %1022  ;;  %v1042_v56 = vsel %vm1032_vm6, %v3509_v12, %v3445_v59  ;;  %v788_v9 = vadd.f32 %v772_v36, %v690_v26  ;;  %v986_v34 = vadd.f32 %v970_v24, %v888_v15  ;;  %v968_v38 = vmul.f32 %v952_v57, %v935_v54  ;;  %v1148_v36 = vld [vmem:[#allocation8 + $0x380] sm:$0xff] }
 0x25f   : > { %5204 = vst [vmem:[#allocation39_spill] sm:$0xff] %v3726_v35  ;;  %v870_v35 = vmul.f32 %v854_v8, %v845_v33  ;;  %v1050_v8 = vld [vmem:[#allocation8 + $0x300] sm:$0xff]  ;;  %v1033_v33 = vsel %vm1032_vm6, %v3443_v58, %v3507_v11  ;;  %v987_v43 = vadd.f32 %v971_v23, %v889_v49  ;;  %v789_v37 = vadd.f32 %v773_v0, %v691_v21 }
 0x260   : > { %539 = vrot.lane.b32.xlu1 %v3375_v48, %s2963_s27  ;;  %1224 = vrot.lane.b32.xlu0 %v3351_v46, %s2970_s26  ;;  %v969_v39 = vmul.f32 %v953_v10, %v943_v7  ;;  %v1041_v59 = vsel %vm1032_vm6, %v3507_v11, %v3443_v58  ;;  %v1068_v52 = vmul.f32 %v1052_v55, %v1034_v3  ;;  %v485_v49 = vld [vmem:[#allocation8 + $0x240] sm:$0xff]  ;;  %v1150_v58 = vld [vmem:[#allocation8 + $0x390] sm:$0xff]  ;;  %v1151_v11 = vld [vmem:[#allocation8 + $0x398] sm:$0xff] }
 0x261   : > { %v886_v12 = vadd.f32 %v870_v35, %v788_v9  ;;  %v1069_v5 = vmul.f32 %v1053_v50, %v1042_v56  ;;  %v1131_v25 = vsel %vm1130_vm7, %v3451_v60, %v3515_v13  ;;  %v887_v1 = vadd.f32 %v871_v17, %v789_v37  ;;  %v1149_v10 = vld [vmem:[#allocation8 + $0x388] sm:$0xff]  ;;  %v1248_v3 = vld [vmem:[#allocation8 + $0x410] sm:$0xff]  ;;  %v1249_v56 = vld [vmem:[#allocation8 + $0x418] sm:$0xff] }
 0x262   : > { %v3756_v2 = vpop.permute.xlu0 %1216  ;;  %v3758_v28 = vpop.permute.xlu1 %1120  ;;  %v1066_v26 = vmul.f32 %v1050_v8, %v1033_v33  ;;  %v1132_v35 = vsel %vm1130_vm7, %v3453_v61, %v3517_v14  ;;  %v1140_v0 = vsel %vm1130_vm7, %v3517_v14, %v3453_v61  ;;  %v1067_v57 = vmul.f32 %v1051_v62, %v1041_v59  ;;  %v486_v55 = vld [vmem:[#allocation8 + $0x248] sm:$0xff] }
 0x263   : > { %v1139_v54 = vsel %vm1130_vm7, %v3515_v13, %v3451_v60  ;;  %v1084_v7 = vadd.f32 %v1068_v52, %v986_v34  ;;  %v1085_v24 = vadd.f32 %v1069_v5, %v987_v43  ;;  %v984_v23 = vadd.f32 %v968_v38, %v886_v12  ;;  %v564_v34 = vld [vmem:[#allocation8 + $0x20] sm:$0xff]  ;;  %v565_v43 = vld [vmem:[#allocation8 + $0x28] sm:$0xff] }
 0x264   : > { %834 = vrot.lane.b32.xlu1 %v3375_v48, %s2966_s20  ;;  %622 = vrot.lane.b32.xlu0 %v3369_v47, %s2964_s29  ;;  %v985_v21 = vadd.f32 %v969_v39, %v887_v1  ;;  %v1164_v17 = vmul.f32 %v1148_v36, %v1131_v25  ;;  %v3805_v61 = vmul.f32 %v485_v49, %v3289_v41  ;;  %v662_v5 = vld [vmem:[#allocation8 + $0xa0] sm:$0xff]  ;;  %v663_v25 = vld [vmem:[#allocation8 + $0xa8] sm:$0xff]  ;;  %v566_v49 = vld [vmem:[#allocation8 + $0x30] sm:$0xff] }
 0x265   : > { %v1166_v14 = vmul.f32 %v1150_v58, %v1132_v35  ;;  %v1167_v50 = vmul.f32 %v1151_v11, %v1140_v0  ;;  %v1230_v60 = vsel %vm1228_vm8, %v3461_v63, %v3525_v16  ;;  %v1238_v13 = vsel %vm1228_vm8, %v3525_v16, %v3461_v63  ;;  %v5205_v1 = vld [vmem:[#allocation34_spill] sm:$0xff]  ;;  %v5206_v0 = vld [vmem:[#allocation20_spill] sm:$0xff] }
 0x266   : > { %v3784_v4 = vpop.permute.xlu1 %1218  ;;  %v3786_v15 = vpop.permute.xlu0 %517  ;;  %v1082_v41 = vadd.f32 %v1066_v26, %v984_v23  ;;  %v1165_v33 = vmul.f32 %v1149_v10, %v1139_v54  ;;  %v546_v37 = vsel %vm543_vm1, %v3531_v18, %v3593_v44  ;;  %v554_v38 = vsel %vm543_vm1, %v3593_v44, %v3531_v18  ;;  %v5208_v23 = vld [vmem:[#allocation21_spill] sm:$0xff] }
 0x267   : > { %v1083_v39 = vadd.f32 %v1067_v57, %v985_v21  ;;  %v3830_v63 = vmul.f32 %v486_v55, %v3295_v42  ;;  %v1182_v16 = vadd.f32 %v1166_v14, %v1084_v7  ;;  %v1183_v62 = vadd.f32 %v1167_v50, %v1085_v24  ;;  %v5207_v57 = vld [vmem:[#allocation19_spill] sm:$0xff]  ;;  %v760_v24 = vld [vmem:[#allocation8 + $0x120] sm:$0xff] }
 0x268   : > { %932 = vrot.lane.b32.xlu1 %v3375_v48, %s2967_s11  ;;  %720 = vrot.lane.b32.xlu0 %v3369_v47, %s2965_s19  ;;  %v3832_v59 = vadd.f32 %v1164_v17, %v1082_v41  ;;  %v1264_v12 = vmul.f32 %v1248_v3, %v1230_v60  ;;  %v1265_v52 = vmul.f32 %v1249_v56, %v1238_v13  ;;  %v5209_v21 = vld [vmem:[#allocation35_spill] sm:$0xff]  ;;  %v761_v56 = vld [vmem:[#allocation8 + $0x128] sm:$0xff]  ;;  %v664_v60 = vld [vmem:[#allocation8 + $0xb0] sm:$0xff] }
 0x269   : > { %v651_v36 = vsel %vm640_vm2, %v3603_v31, %v3537_v19  ;;  %v580_v44 = vmul.f32 %v564_v34, %v554_v38  ;;  %v581_v18 = vmul.f32 %v565_v43, %v546_v37  ;;  %v643_v42 = vsel %vm640_vm2, %v3537_v19, %v3603_v31  ;;  %v567_v31 = vld [vmem:[#allocation8 + $0x38] sm:$0xff]  ;;  %v5212_v13 = vld [vmem:[#allocation22_spill] sm:$0xff]  ;;  %v5213_v41 = vld [vmem:[#allocation36_spill] sm:$0xff] }
 0x26a   : > { %v3815_v9 = vpop.permute.xlu1 %616  ;;  %v3817_v8 = vpop.permute.xlu0 %1008  ;;  %v555_v26 = vsel %vm543_vm1, %v5205_v1, %v3539_v20  ;;  %v3852_v35 = vadd.f32 %v1165_v33, %v1083_v39  ;;  %v1229_v10 = vsel %vm1228_vm8, %v5207_v57, %v5206_v0  ;;  %v1237_v19 = vsel %vm1228_vm8, %v5206_v0, %v5207_v57  ;;  %v665_v38 = vld [vmem:[#allocation8 + $0xb8] sm:$0xff] }
 0x26b   : > { %v547_v54 = vsel %vm543_vm1, %v3539_v20, %v5205_v1  ;;  %v678_v7 = vmul.f32 %v662_v5, %v651_v36  ;;  %v749_v17 = vsel %vm738_vm3, %v5209_v21, %v5208_v23  ;;  %v3872_v55 = vadd.f32 %v1264_v12, %v1182_v16  ;;  %v859_v5 = vld [vmem:[#allocation8 + $0x1a8] sm:$0xff]  ;;  %v1246_v1 = vld [vmem:[#allocation8 + $0x400] sm:$0xff] }
 0x26c   : > { %1030 = vrot.lane.b32.xlu1 %v3375_v48, %s2968_s10  ;;  %638 = vrot.lane.b32.xlu0 %v3375_v48, %s2964_s29  ;;  %v3874_v14 = vadd.f32 %v1265_v52, %v1183_v62  ;;  %v679_v50 = vmul.f32 %v663_v25, %v643_v42  ;;  %v582_v3 = vmul.f32 %v566_v49, %v555_v26  ;;  %v858_v52 = vld [vmem:[#allocation8 + $0x1a0] sm:$0xff]  ;;  %v5214_v36 = vld [vmem:[#allocation37_spill] sm:$0xff]  ;;  %v5215_v25 = vld [vmem:[#allocation23_spill] sm:$0xff] }
 0x26d   : > { %5210 = vst [vmem:[#allocation34_spill] sm:$0xff] %v3872_v55  ;;  %v741_v20 = vsel %vm738_vm3, %v5208_v23, %v5209_v21  ;;  %v652_v33 = vsel %vm640_vm2, %v5213_v41, %v5212_v13  ;;  %v596_v34 = vadd.f32 %v580_v44, %v3670_v27  ;;  %v597_v43 = vadd.f32 %v581_v18, %v3673_v30  ;;  %v762_v44 = vld [vmem:[#allocation8 + $0x130] sm:$0xff]  ;;  %v5216_v18 = vld [vmem:[#allocation24_spill] sm:$0xff] }
 0x26e   : > { %v3848_v58 = vpop.permute.xlu1 %714  ;;  %v3850_v11 = vpop.permute.xlu0 %1106  ;;  %5211 = vst [vmem:[#allocation20_spill] sm:$0xff] %v3874_v14  ;;  %v583_v37 = vmul.f32 %v567_v31, %v547_v54  ;;  %v644_v39 = vsel %vm640_vm2, %v5212_v13, %v5213_v41  ;;  %v776_v12 = vmul.f32 %v760_v24, %v749_v17  ;;  %v839_v27 = vsel %vm836_vm4, %v5215_v25, %v5214_v36  ;;  %v5217_v42 = vld [vmem:[#allocation38_spill] sm:$0xff]  ;;  %v763_v31 = vld [vmem:[#allocation8 + $0x138] sm:$0xff] }
 0x26f   : > { %v847_v30 = vsel %vm836_vm4, %v5214_v36, %v5215_v25  ;;  %v750_v49 = vsel %vm738_vm3, %v5217_v42, %v5216_v18  ;;  %v694_v26 = vadd.f32 %v678_v7, %v596_v34  ;;  %v777_v0 = vmul.f32 %v761_v56, %v741_v20  ;;  %v860_v17 = vld [vmem:[#allocation8 + $0x1b0] sm:$0xff]  ;;  %v1247_v56 = vld [vmem:[#allocation8 + $0x408] sm:$0xff] }
 0x270   : > { %1128 = vrot.lane.b32.xlu1 %v3375_v48, %s2969_s1  ;;  %736 = vrot.lane.b32.xlu0 %v3375_v48, %s2965_s19  ;;  %v680_v57 = vmul.f32 %v664_v60, %v652_v33  ;;  %v742_v54 = vsel %vm738_vm3, %v5216_v18, %v5217_v42  ;;  %v695_v24 = vadd.f32 %v679_v50, %v597_v43  ;;  %v5218_v13 = vld [vmem:[#allocation26_spill] sm:$0xff]  ;;  %v861_v33 = vld [vmem:[#allocation8 + $0x1b8] sm:$0xff]  ;;  %v957_v18 = vld [vmem:[#allocation8 + $0x2a8] sm:$0xff] }
 0x271   : > { %v598_v23 = vadd.f32 %v582_v3, %v3676_v53  ;;  %v681_v21 = vmul.f32 %v665_v38, %v644_v39  ;;  %v848_v7 = vsel %vm836_vm4, %v3648_v51, %v5218_v13  ;;  %v874_v20 = vmul.f32 %v858_v52, %v847_v30  ;;  %v956_v52 = vld [vmem:[#allocation8 + $0x2a0] sm:$0xff] }
 0x272   : > { %v3892_v16 = vpop.permute.xlu1 %812  ;;  %v3894_v62 = vpop.permute.xlu0 %1204  ;;  %v875_v60 = vmul.f32 %v859_v5, %v839_v27  ;;  %v778_v41 = vmul.f32 %v762_v44, %v750_v49  ;;  %v840_v34 = vsel %vm836_vm4, %v5218_v13, %v3648_v51  ;;  %v3925_v3 = vmul.f32 %v1246_v1, %v1229_v10  ;;  %v5219_v5 = vld [vmem:[#allocation25_spill] sm:$0xff]  ;;  %v5220_v13 = vld [vmem:[#allocation28_spill] sm:$0xff] }
 0x273   : > { %v599_v43 = vadd.f32 %v583_v37, %v3679_v6  ;;  %v792_v38 = vadd.f32 %v776_v12, %v694_v26  ;;  %v779_v39 = vmul.f32 %v763_v31, %v742_v54  ;;  %v793_v36 = vadd.f32 %v777_v0, %v695_v24  ;;  %v569_v31 = vld [vmem:[#allocation8 + $0x48] sm:$0xff] }
 0x274   : > { %1226 = vrot.lane.b32.xlu1 %v3375_v48, %s2970_s26  ;;  %v696_v25 = vadd.f32 %v680_v57, %v598_v23  ;;  %v937_v27 = vsel %vm934_vm5, %v5219_v5, %v3646_v32  ;;  %v876_v30 = vmul.f32 %v860_v17, %v848_v7  ;;  %v3932_v44 = vmul.f32 %v1247_v56, %v1237_v19  ;;  %v568_v57 = vld [vmem:[#allocation8 + $0x40] sm:$0xff]  ;;  %v959_v17 = vld [vmem:[#allocation8 + $0x2b8] sm:$0xff] }
 0x275   : > { %v697_v51 = vadd.f32 %v681_v21, %v599_v43  ;;  %v945_v6 = vsel %vm934_vm5, %v3646_v32, %v5219_v5  ;;  %v877_v10 = vmul.f32 %v861_v33, %v840_v34  ;;  %v3938_v37 = vadd.f32 %v874_v20, %v792_v38  ;;  %v958_v21 = vld [vmem:[#allocation8 + $0x2b0] sm:$0xff]  ;;  %v666_v33 = vld [vmem:[#allocation8 + $0xc0] sm:$0xff]  ;;  %v667_v34 = vld [vmem:[#allocation8 + $0xc8] sm:$0xff] }
 0x276   : > { %v3923_v50 = vpop.permute.xlu1 %910  ;;  %v534_v53 = vpop.permute.xlu0 %533  ;;  %v3940_v12 = vadd.f32 %v875_v60, %v793_v36  ;;  %v794_v42 = vadd.f32 %v778_v41, %v696_v25  ;;  %v3946_v19 = vadd.f32 %v3874_v14, %v3872_v55  ;;  %v3948_v0 = vmul.f32 %v956_v52, %v937_v27  ;;  %v1054_v60 = vld [vmem:[#allocation8 + $0x320] sm:$0xff]  ;;  %v5221_v41 = vld [vmem:[#allocation27_spill] sm:$0xff]  ;;  %v1056_v38 = vld [vmem:[#allocation8 + $0x330] sm:$0xff] }
 0x277   : > { %v795_v26 = vadd.f32 %v779_v39, %v697_v51  ;;  %v548_v32 = vsel %vm543_vm1, %v3786_v15, %v534_v53  ;;  %v556_v54 = vsel %vm543_vm1, %v534_v53, %v3786_v15  ;;  %v3956_v24 = vmul.f32 %v957_v18, %v945_v6  ;;  %v1057_v39 = vld [vmem:[#allocation8 + $0x338] sm:$0xff]  ;;  %v764_v18 = vld [vmem:[#allocation8 + $0x140] sm:$0xff]  ;;  %v765_v6 = vld [vmem:[#allocation8 + $0x148] sm:$0xff] }
 0x278   : > { %v892_v23 = vadd.f32 %v876_v30, %v794_v42  ;;  %v938_v7 = vsel %vm934_vm5, %v5220_v13, %v3693_v40  ;;  %v946_v56 = vsel %vm934_vm5, %v3693_v40, %v5220_v13  ;;  %v1035_v15 = vsel %vm1032_vm6, %v5221_v41, %v3691_v22  ;;  %v5222_v40 = vld [vmem:[#allocation30_spill] sm:$0xff]  ;;  %v863_v13 = vld [vmem:[#allocation8 + $0x1c8] sm:$0xff] }
 0x279   : > { %v893_v20 = vadd.f32 %v877_v10, %v795_v26  ;;  %v1036_v36 = vsel %vm1032_vm6, %v5222_v40, %v3728_v45  ;;  %v1044_v25 = vsel %vm1032_vm6, %v3728_v45, %v5222_v40  ;;  %v584_v52 = vmul.f32 %v568_v57, %v556_v54  ;;  %v5223_v54 = vld [vmem:[#allocation32_spill] sm:$0xff] }
 0x27a   : > { %v633_v49 = vpop.permute.xlu1 %632  ;;  %v3942_v1 = vpop.permute.xlu0 %1024  ;;  %v585_v5 = vmul.f32 %v569_v31, %v548_v32  ;;  %v974_v30 = vmul.f32 %v958_v21, %v938_v7  ;;  %v975_v51 = vmul.f32 %v959_v17, %v946_v56  ;;  %v1043_v45 = vsel %vm1032_vm6, %v3691_v22, %v5221_v41  ;;  %v862_v17 = vld [vmem:[#allocation8 + $0x1c0] sm:$0xff]  ;;  %v1154_v7 = vld [vmem:[#allocation8 + $0x3b0] sm:$0xff]  ;;  %v1155_v22 = vld [vmem:[#allocation8 + $0x3b8] sm:$0xff] }
 0x27b   : > { %v645_v53 = vsel %vm640_vm2, %v3815_v9, %v633_v49  ;;  %v653_v43 = vsel %vm640_vm2, %v633_v49, %v3815_v9  ;;  %v3994_v49 = vmul.f32 %v1054_v60, %v1035_v15  ;;  %v1072_v31 = vmul.f32 %v1056_v38, %v1036_v36 }
 0x27c   : > { %v682_v26 = vmul.f32 %v666_v33, %v653_v43  ;;  %v683_v57 = vmul.f32 %v667_v34, %v645_v53  ;;  %v1073_v32 = vmul.f32 %v1057_v39, %v1044_v25  ;;  %v1134_v21 = vsel %vm1130_vm7, %v5223_v54, %v3758_v28 }
 0x27d   : > { %v600_v56 = vadd.f32 %v584_v52, %v3805_v61  ;;  %v601_v60 = vadd.f32 %v585_v5, %v3830_v63  ;;  %v990_v34 = vadd.f32 %v974_v30, %v892_v23  ;;  %v991_v53 = vadd.f32 %v975_v51, %v893_v20  ;;  %v961_v23 = vld [vmem:[#allocation8 + $0x2c8] sm:$0xff]  ;;  %v1252_v20 = vld [vmem:[#allocation8 + $0x430] sm:$0xff]  ;;  %v1253_v30 = vld [vmem:[#allocation8 + $0x438] sm:$0xff] }
 0x27e   : > { %v731_v27 = vpop.permute.xlu1 %730  ;;  %v1123_v42 = vpop.permute.xlu0 %1122  ;;  %v1170_v52 = vmul.f32 %v1154_v7, %v1134_v21  ;;  %v5224_v51 = vld [vmem:[#allocation33_spill] sm:$0xff] }
 0x27f   : > { %v743_v9 = vsel %vm738_vm3, %v3848_v58, %v731_v27  ;;  %v751_v10 = vsel %vm738_vm3, %v731_v27, %v3848_v58  ;;  %v1142_v58 = vsel %vm1130_vm7, %v3758_v28, %v5223_v54  ;;  %v698_v39 = vadd.f32 %v682_v26, %v600_v56  ;;  %v960_v27 = vld [vmem:[#allocation8 + $0x2c0] sm:$0xff] }
 0x280   : > { %v780_v41 = vmul.f32 %v764_v18, %v751_v10  ;;  %v781_v15 = vmul.f32 %v765_v6, %v743_v9  ;;  %v699_v40 = vadd.f32 %v683_v57, %v601_v60  ;;  %v1088_v25 = vadd.f32 %v1072_v31, %v990_v34  ;;  %v1058_v26 = vld [vmem:[#allocation8 + $0x340] sm:$0xff]  ;;  %v1059_v57 = vld [vmem:[#allocation8 + $0x348] sm:$0xff] }
 0x281   : > { %v1089_v63 = vadd.f32 %v1073_v32, %v991_v53  ;;  %v1171_v5 = vmul.f32 %v1155_v22, %v1142_v58  ;;  %v1232_v18 = vsel %vm1228_vm8, %v5224_v51, %v3784_v4  ;;  %v1037_v31 = vsel %vm1032_vm6, %v3817_v8, %v3942_v1  ;;  %v1055_v58 = vld [vmem:[#allocation8 + $0x328] sm:$0xff] }
 0x282   : > { %v829_v33 = vpop.permute.xlu1 %828  ;;  %v1221_v38 = vpop.permute.xlu0 %1220  ;;  %v796_v6 = vadd.f32 %v780_v41, %v698_v39  ;;  %v797_v9 = vadd.f32 %v781_v15, %v699_v40  ;;  %v1045_v32 = vsel %vm1032_vm6, %v3942_v1, %v3817_v8  ;;  %v1268_v56 = vmul.f32 %v1252_v20, %v1232_v18  ;;  %v1156_v41 = vld [vmem:[#allocation8 + $0x3c0] sm:$0xff]  ;;  %v1157_v15 = vld [vmem:[#allocation8 + $0x3c8] sm:$0xff]  ;;  %v5225_v39 = vld [vmem:[#allocation39_spill] sm:$0xff] }
 0x283   : > { %v841_v43 = vsel %vm836_vm4, %v3892_v16, %v829_v33  ;;  %v849_v28 = vsel %vm836_vm4, %v829_v33, %v3892_v16  ;;  %v1240_v16 = vsel %vm1228_vm8, %v3784_v4, %v5224_v51  ;;  %v1135_v8 = vsel %vm1130_vm7, %v3850_v11, %v1123_v42  ;;  %v5226_v40 = vld [vmem:[#allocation29_spill] sm:$0xff]  ;;  %v1152_v20 = vld [vmem:[#allocation8 + $0x3a0] sm:$0xff] }
 0x284   : > { %v878_v36 = vmul.f32 %v862_v17, %v849_v28  ;;  %v879_v61 = vmul.f32 %v863_v13, %v841_v43  ;;  %v1269_v60 = vmul.f32 %v1253_v30, %v1240_v16  ;;  %v1143_v1 = vsel %vm1130_vm7, %v1123_v42, %v3850_v11  ;;  %v1153_v18 = vld [vmem:[#allocation8 + $0x3a8] sm:$0xff]  ;;  %v5227_v16 = vld [vmem:[#allocation31_spill] sm:$0xff] }
 0x285   : > { %v1075_v33 = vmul.f32 %v1059_v57, %v1045_v32  ;;  %v1071_v28 = vmul.f32 %v1055_v58, %v1043_v45  ;;  %v1172_v30 = vmul.f32 %v1156_v41, %v1135_v8  ;;  %v1173_v51 = vmul.f32 %v1157_v15, %v1143_v1 }
 0x286   : > { %v927_v10 = vpop.permute.xlu1 %926  ;;  %v4034_v21 = vpop.permute.xlu0 %618  ;;  %v894_v17 = vadd.f32 %v878_v36, %v796_v6  ;;  %v895_v13 = vadd.f32 %v879_v61, %v797_v9  ;;  %v1133_v36 = vsel %vm1130_vm7, %v5226_v40, %v5225_v39  ;;  %v1186_v61 = vadd.f32 %v1170_v52, %v1088_v25  ;;  %v1254_v25 = vld [vmem:[#allocation8 + $0x440] sm:$0xff] }
 0x287   : > { %v939_v54 = vsel %vm934_vm5, %v3923_v50, %v927_v10  ;;  %v947_v4 = vsel %vm934_vm5, %v927_v10, %v3923_v50  ;;  %v1074_v50 = vmul.f32 %v1058_v26, %v1037_v31  ;;  %v1141_v45 = vsel %vm1130_vm7, %v5225_v39, %v5226_v40  ;;  %v1250_v9 = vld [vmem:[#allocation8 + $0x420] sm:$0xff]  ;;  %v571_v39 = vld [vmem:[#allocation8 + $0x58] sm:$0xff] }
 0x288   : > { %v976_v7 = vmul.f32 %v960_v27, %v939_v54  ;;  %v977_v22 = vmul.f32 %v961_v23, %v947_v4  ;;  %v1187_v27 = vadd.f32 %v1171_v5, %v1089_v63  ;;  %v1231_v6 = vsel %vm1228_vm8, %v5227_v16, %v3756_v2  ;;  %v1255_v63 = vld [vmem:[#allocation8 + $0x448] sm:$0xff]  ;;  %v5236_v40 = vld [vmem:[#allocation16_spill] sm:$0xff] }
 0x289   : > { %v1233_v52 = vsel %vm1228_vm8, %v3894_v62, %v1221_v38  ;;  %v1241_v5 = vsel %vm1228_vm8, %v1221_v38, %v3894_v62  ;;  %v4064_v10 = vadd.f32 %v1268_v56, %v1186_v61  ;;  %v4072_v54 = vadd.f32 %v3925_v3, %v3832_v59  ;;  %v1251_v62 = vld [vmem:[#allocation8 + $0x428] sm:$0xff] }
 0x28a   : > { %v992_v34 = vadd.f32 %v976_v7, %v894_v17  ;;  %v993_v53 = vadd.f32 %v977_v22, %v895_v13  ;;  %v4042_v43 = vpop.permute.xlu1 %519  ;;  %v4048_v23 = vpop.permute.xlu0 %716  ;;  %v4066_v26 = vadd.f32 %v1269_v60, %v1187_v27  ;;  %v988_v4 = vadd.f32 %v3948_v0, %v3938_v37  ;;  %v5237_v27 = vld [vmem:[#allocation17_spill] sm:$0xff] }
 0x28b   : > { %5228 = vst [vmem:[#allocation19_spill] sm:$0xff] %v4064_v10  ;;  %5230 = vst [vmem:[#allocation35_spill] sm:$0xff] %v4072_v54  ;;  %v989_v58 = vadd.f32 %v3956_v24, %v3940_v12  ;;  %v1239_v38 = vsel %vm1228_vm8, %v3756_v2, %v5227_v16  ;;  %v1168_v13 = vmul.f32 %v1152_v20, %v1133_v36 }
 0x28c   : > { %v1090_v11 = vadd.f32 %v1074_v50, %v992_v34  ;;  %v1091_v42 = vadd.f32 %v1075_v33, %v993_v53  ;;  %5229 = vst [vmem:[#allocation21_spill] sm:$0xff] %v4066_v26  ;;  %v1169_v7 = vmul.f32 %v1153_v18, %v1141_v45  ;;  %v1270_v22 = vmul.f32 %v1254_v25, %v1233_v52  ;;  %v487_v34 = vld [vmem:[#allocation8 + $0x250] sm:$0xff]  ;;  %v488_v53 = vld [vmem:[#allocation8 + $0x258] sm:$0xff] }
 0x28d   : > { %v1271_v56 = vmul.f32 %v1255_v63, %v1241_v5  ;;  %v4087_v59 = vadd.f32 %v3932_v44, %v3852_v35  ;;  %v1086_v3 = vadd.f32 %v3994_v49, %v988_v4  ;;  %v1087_v37 = vadd.f32 %v1071_v28, %v989_v58  ;;  %v570_v28 = vld [vmem:[#allocation8 + $0x50] sm:$0xff]  ;;  %v767_v63 = vld [vmem:[#allocation8 + $0x158] sm:$0xff] }
 0x28e   : > { %v4068_v57 = vpop.permute.xlu1 %1010  ;;  %v1188_v31 = vadd.f32 %v1172_v30, %v1090_v11  ;;  %v1189_v32 = vadd.f32 %v1173_v51, %v1091_v42  ;;  %v4082_v17 = vpop.permute.xlu0 %814  ;;  %v1266_v12 = vmul.f32 %v1250_v9, %v1231_v6  ;;  %v1267_v0 = vmul.f32 %v1251_v62, %v1239_v38  ;;  %v668_v51 = vld [vmem:[#allocation8 + $0xd0] sm:$0xff]  ;;  %v669_v11 = vld [vmem:[#allocation8 + $0xd8] sm:$0xff] }
 0x28f   : > { %1298 = vadd.xlane.f32.xlu0 %v3946_v19  ;;  %5231 = vst [vmem:[#allocation22_spill] sm:$0xff] %v4087_v59  ;;  %v1303_v2 = vadd.f32 %v4066_v26, %v4064_v10  ;;  %v1184_v19 = vadd.f32 %v1168_v13, %v1086_v3  ;;  %v1185_v8 = vadd.f32 %v1169_v7, %v1087_v37  ;;  %v766_v25 = vld [vmem:[#allocation8 + $0x150] sm:$0xff]  ;;  %v865_v7 = vld [vmem:[#allocation8 + $0x1d8] sm:$0xff] }
 0x290   : > { %v4094_v60 = vadd.f32 %v1270_v22, %v1188_v31  ;;  %v4096_v41 = vadd.f32 %v1271_v56, %v1189_v32  ;;  %v1294_v50 = vadd.f32 %v4087_v59, %v4072_v54  ;;  %v503_v36 = vmul.f32 %v487_v34, %v5236_v40  ;;  %v864_v13 = vld [vmem:[#allocation8 + $0x1d0] sm:$0xff] }
 0x291   : > { %v4100_v35 = vadd.f32 %v1266_v12, %v1184_v19  ;;  %v4102_v44 = vadd.f32 %v1267_v0, %v1185_v8  ;;  %v504_v20 = vmul.f32 %v488_v53, %v5237_v27  ;;  %v962_v8 = vld [vmem:[#allocation8 + $0x2d0] sm:$0xff] }
 0x292   : > { %v4090_v24 = vpop.permute.xlu1 %1108  ;;  %5232 = vst [vmem:[#allocation36_spill] sm:$0xff] %v4094_v60  ;;  %5233 = vst [vmem:[#allocation37_spill] sm:$0xff] %v4096_v41  ;;  %v4098_v15 = vpop.permute.xlu0 %912  ;;  %v1306_v1 = vadd.f32 %v4096_v41, %v4094_v60  ;;  %v1060_v40 = vld [vmem:[#allocation8 + $0x350] sm:$0xff] }
 0x293   : > { %1304 = vadd.xlane.f32.xlu0 %v1303_v2  ;;  %5234 = vst [vmem:[#allocation23_spill] sm:$0xff] %v4100_v35  ;;  %5235 = vst [vmem:[#allocation24_spill] sm:$0xff] %v4102_v44  ;;  %v1300_v30 = vadd.f32 %v4102_v44, %v4100_v35 }
 0x296   : > { %v4104_v49 = vpop.permute.xlu1 %1206  ;;  %v635_v33 = vpop.permute.xlu0 %634 }
 0x297   : > { %1307 = vadd.xlane.f32.xlu0 %v1306_v1  ;;  %v646_v42 = vsel %vm640_vm2, %v4034_v21, %v635_v33  ;;  %v654_v18 = vsel %vm640_vm2, %v635_v33, %v4034_v21  ;;  %v963_v1 = vld [vmem:[#allocation8 + $0x2d8] sm:$0xff] }
 0x298   : > { %1295 = vadd.xlane.f32.xlu1 %v1294_v50  ;;  %v684_v31 = vmul.f32 %v668_v51, %v654_v18  ;;  %v685_v32 = vmul.f32 %v669_v11, %v646_v42  ;;  %v1159_v51 = vld [vmem:[#allocation8 + $0x3d8] sm:$0xff] }
 0x29a   : > { %v536_v61 = vpop.permute.xlu1 %535  ;;  %v733_v45 = vpop.permute.xlu0 %732 }
 0x29b   : > { %v549_v16 = vsel %vm543_vm1, %v4042_v43, %v536_v61  ;;  %v557_v6 = vsel %vm543_vm1, %v536_v61, %v4042_v43  ;;  %v744_v52 = vsel %vm738_vm3, %v4048_v23, %v733_v45  ;;  %v752_v5 = vsel %vm738_vm3, %v733_v45, %v4048_v23 }
 0x29c   : > { %v586_v21 = vmul.f32 %v570_v28, %v557_v6  ;;  %v587_v9 = vmul.f32 %v571_v39, %v549_v16  ;;  %1301 = vadd.xlane.f32.xlu1 %v1300_v30  ;;  %v782_v38 = vmul.f32 %v766_v25, %v752_v5  ;;  %v783_v43 = vmul.f32 %v767_v63, %v744_v52  ;;  %v1158_v30 = vld [vmem:[#allocation8 + $0x3d0] sm:$0xff]  ;;  %v1257_v52 = vld [vmem:[#allocation8 + $0x458] sm:$0xff] }
 0x29e   : > { %v602_v4 = vadd.f32 %v586_v21, %v503_v36  ;;  %v603_v58 = vadd.f32 %v587_v9, %v504_v20  ;;  %v1027_v62 = vpop.permute.xlu1 %1026  ;;  %v831_v22 = vpop.permute.xlu0 %830 }
 0x29f   : > { %v842_v37 = vsel %vm836_vm4, %v4082_v17, %v831_v22  ;;  %v850_v23 = vsel %vm836_vm4, %v831_v22, %v4082_v17  ;;  %v1038_v33 = vsel %vm1032_vm6, %v4068_v57, %v1027_v62  ;;  %v1046_v34 = vsel %vm1032_vm6, %v1027_v62, %v4068_v57  ;;  %v1061_v17 = vld [vmem:[#allocation8 + $0x358] sm:$0xff] }
 0x2a0   : > { %v700_v56 = vadd.f32 %v684_v31, %v602_v4  ;;  %v701_v3 = vadd.f32 %v685_v32, %v603_v58  ;;  %v880_v2 = vmul.f32 %v864_v13, %v850_v23  ;;  %v881_v19 = vmul.f32 %v865_v7, %v842_v37 }
 0x2a1   : > { %v1076_v18 = vmul.f32 %v1060_v40, %v1038_v33  ;;  %v1077_v45 = vmul.f32 %v1061_v17, %v1046_v34  ;;  %v2971_v32 = vmov 0   ;;  %v573_v33 = vld [vmem:[#allocation8 + $0x68] sm:$0xff] }
 0x2a2   : > { %v798_v12 = vadd.f32 %v782_v38, %v700_v56  ;;  %v799_v0 = vadd.f32 %v783_v43, %v701_v3  ;;  %v1125_v50 = vpop.permute.xlu1 %1124  ;;  %v929_v53 = vpop.permute.xlu0 %928  ;;  %2730 = vset.pattern.permute.xlu1 %v2971_v32  ;;  %2731 = vset.pattern.permute.xlu0 %v2971_v32  ;;  %v866_v32 = vld [vmem:[#allocation8 + $0x1e0] sm:$0xff] }
 0x2a3   : > { %v940_v36 = vsel %vm934_vm5, %v4098_v15, %v929_v53  ;;  %v948_v61 = vsel %vm934_vm5, %v929_v53, %v4098_v15  ;;  %v1136_v57 = vsel %vm1130_vm7, %v4090_v24, %v1125_v50  ;;  %v1144_v11 = vsel %vm1130_vm7, %v1125_v50, %v4090_v24  ;;  %v1256_v15 = vld [vmem:[#allocation8 + $0x450] sm:$0xff]  ;;  %v572_v50 = vld [vmem:[#allocation8 + $0x60] sm:$0xff] }
 0x2a4   : > { %v896_v28 = vadd.f32 %v880_v2, %v798_v12  ;;  %v897_v39 = vadd.f32 %v881_v19, %v799_v0  ;;  %v978_v27 = vmul.f32 %v962_v8, %v940_v36  ;;  %v979_v20 = vmul.f32 %v963_v1, %v948_v61  ;;  %v489_v8 = vld [vmem:[#allocation8 + $0x260] sm:$0xff]  ;;  %v490_v1 = vld [vmem:[#allocation8 + $0x268] sm:$0xff] }
 0x2a5   : > { %v1174_v63 = vmul.f32 %v1158_v30, %v1136_v57  ;;  %v1175_v24 = vmul.f32 %v1159_v51, %v1144_v11  ;;  %v506_v30 = vmul.f32 %v490_v1, %v3351_v46 }
 0x2a6   : > { %v1223_v42 = vpop.permute.xlu1 %1222  ;;  %v994_v16 = vadd.f32 %v978_v27, %v896_v28  ;;  %v995_v6 = vadd.f32 %v979_v20, %v897_v39  ;;  %v522_v25 = vpop.permute.xlu0 %521  ;;  %v670_v28 = vld [vmem:[#allocation8 + $0xe0] sm:$0xff]  ;;  %v671_v39 = vld [vmem:[#allocation8 + $0xe8] sm:$0xff]  ;;  %v5240_v27 = vld [vmem:[#allocation18_spill] sm:$0xff] }
 0x2a7   : > { %v1234_v5 = vsel %vm1228_vm8, %v4104_v49, %v1223_v42  ;;  %v1242_v21 = vsel %vm1228_vm8, %v1223_v42, %v4104_v49  ;;  %v505_v20 = vmul.f32 %v489_v8, %v5240_v27  ;;  %v1160_v27 = vld [vmem:[#allocation8 + $0x3e0] sm:$0xff] }
 0x2a8   : > { %v1092_v9 = vadd.f32 %v1076_v18, %v994_v16  ;;  %v1093_v31 = vadd.f32 %v1077_v45, %v995_v6  ;;  %v1272_v38 = vmul.f32 %v1256_v15, %v1234_v5  ;;  %v1273_v43 = vmul.f32 %v1257_v52, %v1242_v21  ;;  %v769_v15 = vld [vmem:[#allocation8 + $0x168] sm:$0xff] }
 0x2aa   : > { %v621_v4 = vpop.permute.xlu1 %620  ;;  %v1190_v58 = vadd.f32 %v1174_v63, %v1092_v9  ;;  %v1191_v62 = vadd.f32 %v1175_v24, %v1093_v31  ;;  %v817_v13 = vpop.permute.xlu0 %816  ;;  %v768_v63 = vld [vmem:[#allocation8 + $0x160] sm:$0xff] }
 0x2ac   : > { %v4162_v7 = vadd.f32 %v1272_v38, %v1190_v58  ;;  %v4164_v22 = vadd.f32 %v1273_v43, %v1191_v62 }
 0x2ae   : > { %5238 = vst [vmem:[#allocation38_spill] sm:$0xff] %v4162_v7  ;;  %5239 = vst [vmem:[#allocation26_spill] sm:$0xff] %v4164_v22  ;;  %v719_v56 = vpop.permute.xlu1 %718  ;;  %v915_v3 = vpop.permute.xlu0 %914  ;;  %v1309_v49 = vadd.f32 %v4164_v22, %v4162_v7 }
 0x2b0   : > { %1310 = vadd.xlane.f32.xlu1 %v1309_v49  ;;  %v964_v49 = vld [vmem:[#allocation8 + $0x2e0] sm:$0xff] }
 0x2b2   : > { %v637_v37 = vpop.permute.xlu1 %636  ;;  %v1013_v23 = vpop.permute.xlu0 %1012 }
 0x2b3   : > { %v647_v40 = vsel %vm640_vm2, %v621_v4, %v637_v37  ;;  %v655_v17 = vsel %vm640_vm2, %v637_v37, %v621_v4  ;;  %v867_v4 = vld [vmem:[#allocation8 + $0x1e8] sm:$0xff] }
 0x2b4   : > { %v686_v42 = vmul.f32 %v670_v28, %v655_v17  ;;  %v687_v18 = vmul.f32 %v671_v39, %v647_v40  ;;  %v965_v37 = vld [vmem:[#allocation8 + $0x2e8] sm:$0xff] }
 0x2b5   : > { %v1063_v28 = vld [vmem:[#allocation8 + $0x368] sm:$0xff] }
 0x2b6   : > { %v735_v12 = vpop.permute.xlu1 %734  ;;  %v4168_v0 = vpop.permute.xlu0 %1110 }
 0x2b7   : > { %v745_v52 = vsel %vm738_vm3, %v719_v56, %v735_v12 }
 0x2b8   : > { %v785_v31 = vmul.f32 %v769_v15, %v745_v52  ;;  %v1259_v15 = vld [vmem:[#allocation8 + $0x468] sm:$0xff] }
 0x2ba   : > { %v4170_v2 = vpop.permute.xlu1 %523  ;;  %v4172_v19 = vpop.permute.xlu0 %1208 }
 0x2be   : > { %v4174_v34 = vpop.permute.xlu1 %818  ;;  %v538_v53 = vpop.permute.xlu0 %537 }
 0x2bf   : > { %v550_v36 = vsel %vm543_vm1, %v522_v25, %v538_v53  ;;  %v558_v61 = vsel %vm543_vm1, %v538_v53, %v522_v25  ;;  %v753_v25 = vsel %vm738_vm3, %v735_v12, %v719_v56  ;;  %v1062_v53 = vld [vmem:[#allocation8 + $0x360] sm:$0xff] }
 0x2c0   : > { %v588_v57 = vmul.f32 %v572_v50, %v558_v61  ;;  %v589_v51 = vmul.f32 %v573_v33, %v550_v36  ;;  %v784_v9 = vmul.f32 %v768_v63, %v753_v25  ;;  %v1258_v63 = vld [vmem:[#allocation8 + $0x460] sm:$0xff] }
 0x2c2   : > { %v4186_v11 = vpop.permute.xlu1 %916  ;;  %v604_v45 = vadd.f32 %v588_v57, %v505_v20  ;;  %v605_v16 = vadd.f32 %v589_v51, %v506_v30  ;;  %v833_v6 = vpop.permute.xlu0 %832  ;;  %v1161_v20 = vld [vmem:[#allocation8 + $0x3e8] sm:$0xff] }
 0x2c3   : > { %v843_v58 = vsel %vm836_vm4, %v817_v13, %v833_v6  ;;  %v851_v62 = vsel %vm836_vm4, %v833_v6, %v817_v13 }
 0x2c4   : > { %v702_v5 = vadd.f32 %v686_v42, %v604_v45  ;;  %v703_v21 = vadd.f32 %v687_v18, %v605_v16  ;;  %v882_v1 = vmul.f32 %v866_v32, %v851_v62  ;;  %v883_v50 = vmul.f32 %v867_v4, %v843_v58 }
 0x2c6   : > { %v4192_v46 = vpop.permute.xlu1 %1014  ;;  %v931_v24 = vpop.permute.xlu0 %930  ;;  %v800_v38 = vadd.f32 %v784_v9, %v702_v5  ;;  %v801_v43 = vadd.f32 %v785_v31, %v703_v21 }
 0x2c7   : > { %v941_v56 = vsel %vm934_vm5, %v915_v3, %v931_v24  ;;  %v949_v12 = vsel %vm934_vm5, %v931_v24, %v915_v3 }
 0x2c8   : > { %v898_v40 = vadd.f32 %v882_v1, %v800_v38  ;;  %v899_v17 = vadd.f32 %v883_v50, %v801_v43  ;;  %v980_v36 = vmul.f32 %v964_v49, %v941_v56  ;;  %v981_v61 = vmul.f32 %v965_v37, %v949_v12  ;;  %v574_v12 = vld [vmem:[#allocation8 + $0x70] sm:$0xff]  ;;  %v575_v1 = vld [vmem:[#allocation8 + $0x78] sm:$0xff] }
 0x2ca   : > { %v4202_v8 = vpop.permute.xlu1 %1112  ;;  %v1029_v33 = vpop.permute.xlu0 %1028  ;;  %v997_v45 = vadd.f32 %v981_v61, %v899_v17 }
 0x2cb   : > { %v1039_v13 = vsel %vm1032_vm6, %v1013_v23, %v1029_v33  ;;  %v1047_v39 = vsel %vm1032_vm6, %v1029_v33, %v1013_v23  ;;  %v996_v23 = vadd.f32 %v980_v36, %v898_v40  ;;  %v491_v33 = vld [vmem:[#allocation8 + $0x270] sm:$0xff] }
 0x2cc   : > { %v1078_v30 = vmul.f32 %v1062_v53, %v1039_v13  ;;  %v1079_v57 = vmul.f32 %v1063_v28, %v1047_v39  ;;  %v492_v53 = vld [vmem:[#allocation8 + $0x278] sm:$0xff]  ;;  %v672_v28 = vld [vmem:[#allocation8 + $0xf0] sm:$0xff] }
 0x2cd   : > { %v673_v13 = vld [vmem:[#allocation8 + $0xf8] sm:$0xff] }
 0x2ce   : > { %v4208_v3 = vpop.permute.xlu1 %1210  ;;  %v1127_v51 = vpop.permute.xlu0 %1126  ;;  %v1094_v25 = vadd.f32 %v1078_v30, %v996_v23  ;;  %v1095_v5 = vadd.f32 %v1079_v57, %v997_v45  ;;  %v508_v30 = vmul.f32 %v492_v53, %v3375_v48 }
 0x2cf   : > { %v1137_v42 = vsel %vm1130_vm7, %v4168_v0, %v1127_v51  ;;  %v1145_v18 = vsel %vm1130_vm7, %v1127_v51, %v4168_v0  ;;  %v770_v51 = vld [vmem:[#allocation8 + $0x170] sm:$0xff] }
 0x2d0   : > { %v1176_v16 = vmul.f32 %v1160_v27, %v1137_v42  ;;  %v1177_v6 = vmul.f32 %v1161_v20, %v1145_v18  ;;  %v507_v20 = vmul.f32 %v491_v33, %v3369_v47  ;;  %v771_v42 = vld [vmem:[#allocation8 + $0x178] sm:$0xff] }
 0x2d2   : > { %v540_v52 = vpop.permute.xlu1 %539  ;;  %v1225_v21 = vpop.permute.xlu0 %1224  ;;  %v1192_v24 = vadd.f32 %v1176_v16, %v1094_v25  ;;  %v1193_v0 = vadd.f32 %v1177_v6, %v1095_v5  ;;  %v868_v6 = vld [vmem:[#allocation8 + $0x1f0] sm:$0xff] }
 0x2d3   : > { %v1235_v9 = vsel %vm1228_vm8, %v4172_v19, %v1225_v21  ;;  %v1243_v31 = vsel %vm1228_vm8, %v1225_v21, %v4172_v19  ;;  %v551_v19 = vsel %vm543_vm1, %v4170_v2, %v540_v52  ;;  %v559_v50 = vsel %vm543_vm1, %v540_v52, %v4170_v2 }
 0x2d4   : > { %v1274_v32 = vmul.f32 %v1258_v63, %v1235_v9  ;;  %v1275_v4 = vmul.f32 %v1259_v15, %v1243_v31  ;;  %v590_v40 = vmul.f32 %v574_v12, %v559_v50  ;;  %v591_v17 = vmul.f32 %v575_v1, %v551_v19  ;;  %v869_v63 = vld [vmem:[#allocation8 + $0x1f8] sm:$0xff]  ;;  %v966_v31 = vld [vmem:[#allocation8 + $0x2f0] sm:$0xff] }
 0x2d6   : > { %v835_v58 = vpop.permute.xlu1 %834  ;;  %v4222_v62 = vadd.f32 %v1274_v32, %v1192_v24  ;;  %v4224_v38 = vadd.f32 %v1275_v4, %v1193_v0  ;;  %v623_v43 = vpop.permute.xlu0 %622  ;;  %v606_v18 = vadd.f32 %v590_v40, %v507_v20  ;;  %v607_v23 = vadd.f32 %v591_v17, %v508_v30  ;;  %v967_v24 = vld [vmem:[#allocation8 + $0x2f8] sm:$0xff] }
 0x2d7   : > { %v844_v15 = vsel %vm836_vm4, %v4174_v34, %v835_v58  ;;  %v852_v47 = vsel %vm836_vm4, %v835_v58, %v4174_v34 }
 0x2d8   : > { %5241 = vst [vmem:[#allocation25_spill] sm:$0xff] %v4222_v62  ;;  %5242 = vst [vmem:[#allocation28_spill] sm:$0xff] %v4224_v38  ;;  %v1312_v49 = vadd.f32 %v4224_v38, %v4222_v62  ;;  %v884_v32 = vmul.f32 %v868_v6, %v852_v47  ;;  %v885_v4 = vmul.f32 %v869_v63, %v844_v15 }
 0x2da   : > { %v933_v37 = vpop.permute.xlu1 %932  ;;  %v721_v56 = vpop.permute.xlu0 %720  ;;  %1313 = vadd.xlane.f32.xlu0 %v1312_v49  ;;  %v1064_v49 = vld [vmem:[#allocation8 + $0x370] sm:$0xff] }
 0x2db   : > { %v942_v0 = vsel %vm934_vm5, %v4186_v11, %v933_v37  ;;  %v950_v34 = vsel %vm934_vm5, %v933_v37, %v4186_v11  ;;  %v1162_v11 = vld [vmem:[#allocation8 + $0x3f0] sm:$0xff]  ;;  %v1163_v37 = vld [vmem:[#allocation8 + $0x3f8] sm:$0xff] }
 0x2dc   : > { %v982_v19 = vmul.f32 %v966_v31, %v942_v0  ;;  %v983_v50 = vmul.f32 %v967_v24, %v950_v34 }
 0x2de   : > { %v1031_v39 = vpop.permute.xlu1 %1030  ;;  %v639_v36 = vpop.permute.xlu0 %638 }
 0x2df   : > { %v648_v61 = vsel %vm640_vm2, %v623_v43, %v639_v36  ;;  %v656_v27 = vsel %vm640_vm2, %v639_v36, %v623_v43  ;;  %v1040_v12 = vsel %vm1032_vm6, %v4192_v46, %v1031_v39  ;;  %v1048_v1 = vsel %vm1032_vm6, %v1031_v39, %v4192_v46  ;;  %v1260_v46 = vld [vmem:[#allocation8 + $0x470] sm:$0xff]  ;;  %v1261_v39 = vld [vmem:[#allocation8 + $0x478] sm:$0xff] }
 0x2e0   : > { %v688_v57 = vmul.f32 %v672_v28, %v656_v27  ;;  %v689_v2 = vmul.f32 %v673_v13, %v648_v61  ;;  %v1080_v17 = vmul.f32 %v1064_v49, %v1040_v12 }
 0x2e2   : > { %v737_v45 = vpop.permute.xlu0 %736  ;;  %v1129_v16 = vpop.permute.xlu1 %1128  ;;  %v704_v25 = vadd.f32 %v688_v57, %v606_v18  ;;  %v705_v5 = vadd.f32 %v689_v2, %v607_v23 }
 0x2e3   : > { %v746_v48 = vsel %vm738_vm3, %v721_v56, %v737_v45  ;;  %v754_v52 = vsel %vm738_vm3, %v737_v45, %v721_v56  ;;  %v1065_v56 = vld [vmem:[#allocation8 + $0x378] sm:$0xff]  ;;  %v1138_v13 = vsel %vm1130_vm7, %v4202_v8, %v1129_v16  ;;  %v1146_v40 = vsel %vm1130_vm7, %v1129_v16, %v4202_v8 }
 0x2e4   : > { %v786_v21 = vmul.f32 %v770_v51, %v754_v52  ;;  %v787_v9 = vmul.f32 %v771_v42, %v746_v48  ;;  %v1081_v36 = vmul.f32 %v1065_v56, %v1048_v1  ;;  %v1178_v51 = vmul.f32 %v1162_v11, %v1138_v13 }
 0x2e5   : > { %v1179_v42 = vmul.f32 %v1163_v37, %v1146_v40 }
 0x2e6   : > { %v802_v58 = vadd.f32 %v786_v21, %v704_v25  ;;  %v803_v43 = vadd.f32 %v787_v9, %v705_v5  ;;  %v1227_v28 = vpop.permute.xlu1 %1226 }
 0x2e7   : > { %v1236_v20 = vsel %vm1228_vm8, %v4208_v3, %v1227_v28  ;;  %v1244_v30 = vsel %vm1228_vm8, %v1227_v28, %v4208_v3 }
 0x2e8   : > { %v900_v33 = vadd.f32 %v884_v32, %v802_v58  ;;  %v901_v53 = vadd.f32 %v885_v4, %v803_v43  ;;  %v1276_v23 = vmul.f32 %v1260_v46, %v1236_v20  ;;  %v1277_v45 = vmul.f32 %v1261_v39, %v1244_v30 }
 0x2ea   : > { %v998_v61 = vadd.f32 %v982_v19, %v900_v33  ;;  %v999_v27 = vadd.f32 %v983_v50, %v901_v53 }
 0x2ec   : > { %v1096_v57 = vadd.f32 %v1080_v17, %v998_v61  ;;  %v1097_v2 = vadd.f32 %v1081_v36, %v999_v27 }
 0x2ee   : > { %v1194_v18 = vadd.f32 %v1178_v51, %v1096_v57  ;;  %v1195_v8 = vadd.f32 %v1179_v42, %v1097_v2 }
 0x2f0   : > { %v4274_v16 = vadd.f32 %v1276_v23, %v1194_v18  ;;  %v4276_v6 = vadd.f32 %v1277_v45, %v1195_v8 }
 0x2f2   : > { %5243 = vst [vmem:[#allocation27_spill] sm:$0xff] %v4274_v16  ;;  %5244 = vst [vmem:[#allocation30_spill] sm:$0xff] %v4276_v6  ;;  %v1315_v63 = vadd.f32 %v4276_v6, %v4274_v16 }
 0x2f4   : > { %1316 = vadd.xlane.f32.xlu0 %v1315_v63 }
 0x31c   : > { %v1299_v15 = vpop.xlane.xlu0 %1298 }
 0x31d   : > { %v1320_v3 = vmul.f32 0.00390625, %v1299_v15 }
 0x31f   : > { %v1332_v21 = vadd.f32 1.0, %v1320_v3 }
 0x320   : > { %v1305_v5 = vpop.xlane.xlu0 %1304 }
 0x321   : > { %v1322_v31 = vmul.f32 0.00390625, %v1305_v5 }
 0x323   : > { %v1334_v34 = vadd.f32 1.0, %v1322_v31 }
 0x324   : > { %v1308_v0 = vpop.xlane.xlu0 %1307 }
 0x325   : > { %v1296_v47 = vpop.xlane.xlu1 %1295  ;;  %v1323_v32 = vmul.f32 0.00390625, %v1308_v0 }
 0x326   : > { %v1319_v48 = vmul.f32 0.00390625, %v1296_v47 }
 0x327   : > { %v1327_v4 = vadd.f32 1.0, %v1323_v32 }
 0x328   : > { %v1331_v52 = vadd.f32 1.0, %v1319_v48 }
 0x329   : > { %v1302_v25 = vpop.xlane.xlu1 %1301 }
 0x32a   : > { %1357 = vperm.xlu1 %2730, %v1331_v52   ;;  %v1321_v9 = vmul.f32 0.00390625, %v1302_v25 }
 0x32c   : > { %v1333_v24 = vadd.f32 1.0, %v1321_v9 }
 0x32e   : > { %1362 = vperm.xlu1 %2730, %v1332_v21  }
 0x332   : > { %1367 = vperm.xlu1 %2730, %v1333_v24  }
 0x336   : > { %1372 = vperm.xlu1 %2730, %v1334_v34  }
 0x33a   : > { %1337 = vperm.xlu1 %2730, %v1327_v4   ;;  %v1496_v4 = vld [vmem:[#allocation9 + $0x40] sm:$0xff] }
 0x33d   : > { %v1311_v58 = vpop.xlane.xlu1 %1310 }
 0x33e   : > { %v1324_v43 = vmul.f32 0.00390625, %v1311_v58 }
 0x340   : > { %v1328_v49 = vadd.f32 1.0, %v1324_v43 }
 0x342   : > { %1342 = vperm.xlu0 %2731, %v1328_v49  }
 0x367   : > { %v1314_v56 = vpop.xlane.xlu0 %1313 }
 0x368   : > { %v1325_v12 = vmul.f32 0.00390625, %v1314_v56  ;;  %v1416_v56 = vld [vmem:[#allocation9 + $0x240] sm:$0xff] }
 0x36a   : > { %v1329_v1 = vadd.f32 1.0, %v1325_v12  ;;  %v1417_v12 = vld [vmem:[#allocation9 + $0x248] sm:$0xff] }
 0x36c   : > { %1347 = vperm.xlu1 %2730, %v1329_v1   ;;  %v1418_v1 = vld [vmem:[#allocation9 + $0x250] sm:$0xff] }
 0x381   : > { %v1317_v19 = vpop.xlane.xlu0 %1316 }
 0x382   : > { %v1326_v50 = vmul.f32 0.00390625, %v1317_v19  ;;  %v1497_v19 = vld [vmem:[#allocation9 + $0x48] sm:$0xff] }
 0x384   : > { %v1330_v33 = vadd.f32 1.0, %v1326_v50 }
 0x386   : > { %1352 = vperm.xlu1 %2730, %v1330_v33  }
 0x3a9   : > { %v1358_v53 = vpop.permute.xlu1 %1357 }
 0x3aa   : > { %v4281_v28 = vmul.f32 %v1358_v53, %v4094_v60  ;;  %v4286_v37 = vmul.f32 %v1358_v53, %v4096_v41 }
 0x3ac   : > { %1448 = vrot.lane.b32.xlu0 %v4281_v28, %s2963_s27  ;;  %v1432_v53 = vmul.f32 %v1416_v56, %v4281_v28 }
 0x3ad   : > { %v1363_v11 = vpop.permute.xlu1 %1362 }
 0x3ae   : > { %v4289_v13 = vmul.f32 %v1363_v11, %v4162_v7  ;;  %v4296_v40 = vmul.f32 %v1363_v11, %v4164_v22  ;;  %v1419_v11 = vld [vmem:[#allocation9 + $0x258] sm:$0xff] }
 0x3b0   : > { %1464 = vrot.lane.b32.xlu0 %v4286_v37, %s2963_s27  ;;  %1450 = vrot.lane.b32.xlu1 %v4289_v13, %s2963_s27 }
 0x3b1   : > { %v1368_v17 = vpop.permute.xlu1 %1367 }
 0x3b2   : > { %v4355_v36 = vmul.f32 %v1368_v17, %v4222_v62  ;;  %v4362_v27 = vmul.f32 %v1368_v17, %v4224_v38  ;;  %v1498_v17 = vld [vmem:[#allocation9 + $0x50] sm:$0xff]  ;;  %v1499_v38 = vld [vmem:[#allocation9 + $0x58] sm:$0xff] }
 0x3b3   : > { %v1595_v62 = vld [vmem:[#allocation9 + $0xd0] sm:$0xff] }
 0x3b4   : > { %1544 = vrot.lane.b32.xlu0 %v4281_v28, %s2964_s29  ;;  %1466 = vrot.lane.b32.xlu1 %v4296_v40, %s2963_s27 }
 0x3b5   : > { %v1373_v61 = vpop.permute.xlu1 %1372 }
 0x3b6   : > { %v4365_v46 = vmul.f32 %v1373_v61, %v4274_v16  ;;  %v4372_v39 = vmul.f32 %v1373_v61, %v4276_v6  ;;  %v1433_v6 = vmul.f32 %v1417_v12, %v4286_v37  ;;  %v1434_v16 = vmul.f32 %v1418_v1, %v4289_v13 }
 0x3b8   : > { %1560 = vrot.lane.b32.xlu0 %v4286_v37, %s2964_s29  ;;  %1546 = vrot.lane.b32.xlu1 %v4289_v13, %s2964_s29 }
 0x3b9   : > { %v1338_v20 = vpop.permute.xlu1 %1337 }
 0x3ba   : > { %v4427_v42 = vmul.f32 %v1338_v20, %v4087_v59  ;;  %v4434_v23 = vmul.f32 %v1338_v20, %v4072_v54 }
 0x3bc   : > { %1641 = vrot.lane.b32.xlu0 %v4281_v28, %s2965_s19  ;;  %1562 = vrot.lane.b32.xlu1 %v4296_v40, %s2964_s29 }
 0x3c0   : > { %1657 = vrot.lane.b32.xlu0 %v4286_v37, %s2965_s19  ;;  %1643 = vrot.lane.b32.xlu1 %v4289_v13, %s2965_s19 }
 0x3c1   : > { %v1343_v30 = vpop.permute.xlu0 %1342 }
 0x3c2   : > { %v4441_v15 = vmul.f32 %v1343_v30, %v3872_v55  ;;  %v4448_v3 = vmul.f32 %v1343_v30, %v3874_v14 }
 0x3c4   : > { %1738 = vrot.lane.b32.xlu0 %v4281_v28, %s2966_s20  ;;  %1659 = vrot.lane.b32.xlu1 %v4296_v40, %s2965_s19 }
 0x3c8   : > { %1754 = vrot.lane.b32.xlu0 %v4286_v37, %s2966_s20  ;;  %1740 = vrot.lane.b32.xlu1 %v4289_v13, %s2966_s20 }
 0x3cc   : > { %1835 = vrot.lane.b32.xlu0 %v4281_v28, %s2967_s11  ;;  %1756 = vrot.lane.b32.xlu1 %v4296_v40, %s2966_s20 }
 0x3d0   : > { %1851 = vrot.lane.b32.xlu0 %v4286_v37, %s2967_s11  ;;  %1837 = vrot.lane.b32.xlu1 %v4289_v13, %s2967_s11 }
 0x3d4   : > { %1932 = vrot.lane.b32.xlu0 %v4281_v28, %s2968_s10  ;;  %1853 = vrot.lane.b32.xlu1 %v4296_v40, %s2967_s11 }
 0x3d8   : > { %1948 = vrot.lane.b32.xlu0 %v4286_v37, %s2968_s10  ;;  %1934 = vrot.lane.b32.xlu1 %v4289_v13, %s2968_s10 }
 0x3dc   : > { %2029 = vrot.lane.b32.xlu0 %v4281_v28, %s2969_s1  ;;  %1950 = vrot.lane.b32.xlu1 %v4296_v40, %s2968_s10 }
 0x3e0   : > { %2045 = vrot.lane.b32.xlu0 %v4286_v37, %s2969_s1  ;;  %2031 = vrot.lane.b32.xlu1 %v4289_v13, %s2969_s1 }
 0x3e4   : > { %2126 = vrot.lane.b32.xlu0 %v4281_v28, %s2970_s26  ;;  %2047 = vrot.lane.b32.xlu1 %v4296_v40, %s2969_s1 }
 0x3e8   : > { %2142 = vrot.lane.b32.xlu0 %v4286_v37, %s2970_s26  ;;  %2128 = vrot.lane.b32.xlu1 %v4289_v13, %s2970_s26  ;;  %v1435_v13 = vmul.f32 %v1419_v11, %v4296_v40  ;;  %v1692_v11 = vld [vmem:[#allocation9 + $0x150] sm:$0xff] }
 0x3eb   : > { %v4414_v57 = vpop.permute.xlu1 %1347 }
 0x3ec   : > { %1452 = vrot.lane.b32.xlu0 %v4355_v36, %s2963_s27  ;;  %2144 = vrot.lane.b32.xlu1 %v4296_v40, %s2970_s26 }
 0x3f0   : > { %1468 = vrot.lane.b32.xlu0 %v4362_v27, %s2963_s27  ;;  %1454 = vrot.lane.b32.xlu1 %v4365_v46, %s2963_s27 }
 0x3f4   : > { %1548 = vrot.lane.b32.xlu0 %v4355_v36, %s2964_s29  ;;  %1470 = vrot.lane.b32.xlu1 %v4372_v39, %s2963_s27 }
 0x3f8   : > { %1564 = vrot.lane.b32.xlu0 %v4362_v27, %s2964_s29  ;;  %1550 = vrot.lane.b32.xlu1 %v4365_v46, %s2964_s29 }
 0x3fc   : > { %1645 = vrot.lane.b32.xlu0 %v4355_v36, %s2965_s19  ;;  %1566 = vrot.lane.b32.xlu1 %v4372_v39, %s2964_s29 }
 0x400   : > { %1661 = vrot.lane.b32.xlu0 %v4362_v27, %s2965_s19  ;;  %1647 = vrot.lane.b32.xlu1 %v4365_v46, %s2965_s19 }
 0x404   : > { %1742 = vrot.lane.b32.xlu0 %v4355_v36, %s2966_s20  ;;  %1663 = vrot.lane.b32.xlu1 %v4372_v39, %s2965_s19 }
 0x405   : > { %v4420_v2 = vpop.permute.xlu1 %1352 }
 0x408   : > { %1758 = vrot.lane.b32.xlu0 %v4362_v27, %s2966_s20  ;;  %1744 = vrot.lane.b32.xlu1 %v4365_v46, %s2966_s20 }
 0x40c   : > { %1839 = vrot.lane.b32.xlu0 %v4355_v36, %s2967_s11  ;;  %1760 = vrot.lane.b32.xlu1 %v4372_v39, %s2966_s20 }
 0x410   : > { %1855 = vrot.lane.b32.xlu0 %v4362_v27, %s2967_s11  ;;  %1841 = vrot.lane.b32.xlu1 %v4365_v46, %s2967_s11 }
 0x414   : > { %1936 = vrot.lane.b32.xlu0 %v4355_v36, %s2968_s10  ;;  %1857 = vrot.lane.b32.xlu1 %v4372_v39, %s2967_s11 }
 0x418   : > { %1952 = vrot.lane.b32.xlu0 %v4362_v27, %s2968_s10  ;;  %1938 = vrot.lane.b32.xlu1 %v4365_v46, %s2968_s10 }
 0x41c   : > { %2033 = vrot.lane.b32.xlu0 %v4355_v36, %s2969_s1  ;;  %1954 = vrot.lane.b32.xlu1 %v4372_v39, %s2968_s10 }
 0x41e   : > { %v1449_v51 = vpop.permute.xlu0 %1448 }
 0x420   : > { %2049 = vrot.lane.b32.xlu0 %v4362_v27, %s2969_s1  ;;  %2035 = vrot.lane.b32.xlu1 %v4365_v46, %s2969_s1 }
 0x422   : > { %v1451_v18 = vpop.permute.xlu1 %1450  ;;  %v1465_v8 = vpop.permute.xlu0 %1464 }
 0x423   : > { %v1484_v58 = vsel %vm543_vm1, %v1465_v8, %v1449_v51  ;;  %v1476_v50 = vsel %vm543_vm1, %v1449_v51, %v1465_v8  ;;  %v1593_v8 = vld [vmem:[#allocation9 + $0xc0] sm:$0xff] }
 0x424   : > { %1456 = vrot.lane.b32.xlu0 %v4427_v42, %s2963_s27  ;;  %2051 = vrot.lane.b32.xlu1 %v4372_v39, %s2969_s1  ;;  %v1512_v33 = vmul.f32 %v1496_v4, %v1484_v58  ;;  %v1513_v4 = vmul.f32 %v1497_v19, %v1476_v50  ;;  %v1594_v58 = vld [vmem:[#allocation9 + $0xc8] sm:$0xff] }
 0x425   : > { %v1691_v19 = vld [vmem:[#allocation9 + $0x148] sm:$0xff] }
 0x426   : > { %v1467_v45 = vpop.permute.xlu1 %1466  ;;  %v1545_v63 = vpop.permute.xlu0 %1544  ;;  %v1528_v37 = vadd.f32 %v1512_v33, %v1432_v53 }
 0x427   : > { %v1485_v61 = vsel %vm543_vm1, %v1467_v45, %v1451_v18  ;;  %v1477_v51 = vsel %vm543_vm1, %v1451_v18, %v1467_v45  ;;  %v1596_v45 = vld [vmem:[#allocation9 + $0xd8] sm:$0xff] }
 0x428   : > { %1536 = vrot.lane.b32.xlu0 %v4434_v23, %s2964_s29  ;;  %1440 = vrot.lane.b32.xlu1 %v4434_v23, %s2963_s27  ;;  %v1514_v18 = vmul.f32 %v1498_v17, %v1485_v61  ;;  %v1515_v1 = vmul.f32 %v1499_v38, %v1477_v51  ;;  %v1693_v17 = vld [vmem:[#allocation9 + $0x158] sm:$0xff]  ;;  %v1787_v51 = vld [vmem:[#allocation9 + $0x1c0] sm:$0xff] }
 0x42a   : > { %v1547_v47 = vpop.permute.xlu1 %1546  ;;  %v1561_v48 = vpop.permute.xlu0 %1560 }
 0x42b   : > { %v1580_v28 = vsel %vm640_vm2, %v1561_v48, %v1545_v63  ;;  %v1572_v56 = vsel %vm640_vm2, %v1545_v63, %v1561_v48  ;;  %v1690_v48 = vld [vmem:[#allocation9 + $0x140] sm:$0xff] }
 0x42c   : > { %1552 = vrot.lane.b32.xlu0 %v4427_v42, %s2964_s29  ;;  %1442 = vrot.lane.b32.xlu1 %v4441_v15, %s2963_s27  ;;  %v1609_v63 = vmul.f32 %v1593_v8, %v1580_v28  ;;  %v1610_v53 = vmul.f32 %v1594_v58, %v1572_v56  ;;  %v1788_v8 = vld [vmem:[#allocation9 + $0x1c8] sm:$0xff] }
 0x42e   : > { %v1563_v52 = vpop.permute.xlu1 %1562  ;;  %v1642_v25 = vpop.permute.xlu0 %1641 }
 0x42f   : > { %v1581_v14 = vsel %vm640_vm2, %v1563_v52, %v1547_v47  ;;  %v1573_v12 = vsel %vm640_vm2, %v1547_v47, %v1563_v52  ;;  %v1529_v52 = vadd.f32 %v1513_v4, %v1433_v6  ;;  %v1789_v4 = vld [vmem:[#allocation9 + $0x1d0] sm:$0xff] }
 0x430   : > { %1633 = vrot.lane.b32.xlu0 %v4434_v23, %s2965_s19  ;;  %1458 = vrot.lane.b32.xlu1 %v4448_v3, %s2963_s27  ;;  %v1611_v40 = vmul.f32 %v1595_v62, %v1581_v14  ;;  %v1612_v61 = vmul.f32 %v1596_v45, %v1573_v12  ;;  %v1530_v14 = vadd.f32 %v1514_v18, %v1434_v16 }
 0x431   : > { %v1625_v16 = vadd.f32 %v1609_v63, %v1528_v37 }
 0x432   : > { %v4454_v5 = vpop.permute.xlu1 %1643  ;;  %v1658_v21 = vpop.permute.xlu0 %1657  ;;  %v1627_v18 = vadd.f32 %v1611_v40, %v1530_v14  ;;  %v1981_v14 = vld [vmem:[#allocation9 + $0x340] sm:$0xff] }
 0x433   : > { %v1669_v50 = vsel %vm738_vm3, %v1642_v25, %v1658_v21  ;;  %v1677_v55 = vsel %vm738_vm3, %v1658_v21, %v1642_v25 }
 0x434   : > { %1649 = vrot.lane.b32.xlu0 %v4427_v42, %s2965_s19  ;;  %1538 = vrot.lane.b32.xlu1 %v4441_v15, %s2964_s29  ;;  %v1706_v62 = vmul.f32 %v1690_v48, %v1677_v55  ;;  %v1707_v21 = vmul.f32 %v1691_v19, %v1669_v50  ;;  %v1626_v55 = vadd.f32 %v1610_v53, %v1529_v52  ;;  %v1790_v50 = vld [vmem:[#allocation9 + $0x1d8] sm:$0xff] }
 0x436   : > { %v1660_v9 = vpop.permute.xlu1 %1659  ;;  %v4460_v31 = vpop.permute.xlu0 %1738 }
 0x437   : > { %v1670_v38 = vsel %vm738_vm3, %v4454_v5, %v1660_v9  ;;  %v1678_v47 = vsel %vm738_vm3, %v1660_v9, %v4454_v5  ;;  %v1531_v5 = vadd.f32 %v1515_v1, %v1435_v13  ;;  %v1723_v13 = vadd.f32 %v1707_v21, %v1626_v55  ;;  %v1884_v1 = vld [vmem:[#allocation9 + $0x2c0] sm:$0xff]  ;;  %v1982_v21 = vld [vmem:[#allocation9 + $0x348] sm:$0xff] }
 0x438   : > { %1730 = vrot.lane.b32.xlu0 %v4434_v23, %s2966_s20  ;;  %1554 = vrot.lane.b32.xlu1 %v4448_v3, %s2964_s29  ;;  %v1708_v9 = vmul.f32 %v1692_v11, %v1678_v47  ;;  %v1709_v28 = vmul.f32 %v1693_v17, %v1670_v38  ;;  %v1885_v11 = vld [vmem:[#allocation9 + $0x2c8] sm:$0xff] }
 0x439   : > { %v1628_v48 = vadd.f32 %v1612_v61, %v1531_v5  ;;  %v1983_v5 = vld [vmem:[#allocation9 + $0x350] sm:$0xff] }
 0x43a   : > { %v4466_v24 = vpop.permute.xlu1 %1740  ;;  %v4468_v0 = vpop.permute.xlu0 %1754  ;;  %v1724_v53 = vadd.f32 %v1708_v9, %v1627_v18 }
 0x43b   : > { %v1774_v25 = vsel %vm836_vm4, %v4468_v0, %v4460_v31  ;;  %v1766_v6 = vsel %vm836_vm4, %v4460_v31, %v4468_v0  ;;  %v1722_v0 = vadd.f32 %v1706_v62, %v1625_v16  ;;  %v1725_v40 = vadd.f32 %v1709_v28, %v1628_v48 }
 0x43c   : > { %1746 = vrot.lane.b32.xlu0 %v4427_v42, %s2966_s20  ;;  %1635 = vrot.lane.b32.xlu1 %v4441_v15, %s2965_s19  ;;  %v1803_v12 = vmul.f32 %v1787_v51, %v1774_v25  ;;  %v1804_v19 = vmul.f32 %v1788_v8, %v1766_v6  ;;  %v1887_v51 = vld [vmem:[#allocation9 + $0x2d8] sm:$0xff] }
 0x43e   : > { %v4474_v34 = vpop.permute.xlu1 %1756  ;;  %v4476_v32 = vpop.permute.xlu0 %1835  ;;  %v1819_v52 = vadd.f32 %v1803_v12, %v1722_v0 }
 0x43f   : > { %v1775_v58 = vsel %vm836_vm4, %v4474_v34, %v4466_v24  ;;  %v1767_v31 = vsel %vm836_vm4, %v4466_v24, %v4474_v34  ;;  %v1886_v34 = vld [vmem:[#allocation9 + $0x2d0] sm:$0xff] }
 0x440   : > { %1827 = vrot.lane.b32.xlu0 %v4434_v23, %s2967_s11  ;;  %1651 = vrot.lane.b32.xlu1 %v4448_v3, %s2965_s19  ;;  %v1805_v37 = vmul.f32 %v1789_v4, %v1775_v58  ;;  %v1806_v61 = vmul.f32 %v1790_v50, %v1767_v31  ;;  %v1984_v58 = vld [vmem:[#allocation9 + $0x358] sm:$0xff]  ;;  %v2080_v31 = vld [vmem:[#allocation9 + $0x3d0] sm:$0xff] }
 0x442   : > { %v4484_v43 = vpop.permute.xlu1 %1837  ;;  %v4486_v49 = vpop.permute.xlu0 %1851  ;;  %v1821_v6 = vadd.f32 %v1805_v37, %v1724_v53  ;;  %v1822_v12 = vadd.f32 %v1806_v61, %v1725_v40  ;;  %v2175_v40 = vld [vmem:[#allocation9 + $0x440] sm:$0xff] }
 0x443   : > { %v1863_v63 = vsel %vm934_vm5, %v4476_v32, %v4486_v49  ;;  %v1871_v24 = vsel %vm934_vm5, %v4486_v49, %v4476_v32  ;;  %v1820_v49 = vadd.f32 %v1804_v19, %v1723_v13  ;;  %v2078_v19 = vld [vmem:[#allocation9 + $0x3c0] sm:$0xff] }
 0x444   : > { %1843 = vrot.lane.b32.xlu0 %v4427_v42, %s2967_s11  ;;  %1732 = vrot.lane.b32.xlu1 %v4441_v15, %s2966_s20  ;;  %v1900_v62 = vmul.f32 %v1884_v1, %v1863_v63  ;;  %v2081_v1 = vld [vmem:[#allocation9 + $0x3d8] sm:$0xff] }
 0x446   : > { %v4497_v20 = vpop.permute.xlu1 %1853  ;;  %v4499_v30 = vpop.permute.xlu0 %1932  ;;  %v1916_v13 = vadd.f32 %v1900_v62, %v1819_v52 }
 0x447   : > { %v1864_v17 = vsel %vm934_vm5, %v4484_v43, %v4497_v20  ;;  %v1872_v25 = vsel %vm934_vm5, %v4497_v20, %v4484_v43  ;;  %v1901_v43 = vmul.f32 %v1885_v11, %v1871_v24  ;;  %v2176_v11 = vld [vmem:[#allocation9 + $0x448] sm:$0xff] }
 0x448   : > { %1924 = vrot.lane.b32.xlu0 %v4434_v23, %s2968_s10  ;;  %1748 = vrot.lane.b32.xlu1 %v4448_v3, %s2966_s20  ;;  %v1902_v20 = vmul.f32 %v1886_v34, %v1864_v17  ;;  %v1903_v28 = vmul.f32 %v1887_v51, %v1872_v25 }
 0x44a   : > { %v4522_v22 = vpop.permute.xlu1 %1934  ;;  %v1949_v33 = vpop.permute.xlu0 %1948  ;;  %v1918_v63 = vadd.f32 %v1902_v20, %v1821_v6  ;;  %v1919_v24 = vadd.f32 %v1903_v28, %v1822_v12  ;;  %v2177_v6 = vld [vmem:[#allocation9 + $0x450] sm:$0xff]  ;;  %v4608_v20 = vmul.f32 %v4414_v57, %v4100_v35 }
 0x44b   : > { %v1960_v32 = vsel %vm1032_vm6, %v4499_v30, %v1949_v33  ;;  %v1968_v8 = vsel %vm1032_vm6, %v1949_v33, %v4499_v30  ;;  %v2079_v33 = vld [vmem:[#allocation9 + $0x3c8] sm:$0xff] }
 0x44c   : > { %1940 = vrot.lane.b32.xlu0 %v4427_v42, %s2968_s10  ;;  %1829 = vrot.lane.b32.xlu1 %v4441_v15, %s2967_s11  ;;  %v1997_v4 = vmul.f32 %v1981_v14, %v1960_v32  ;;  %v1998_v48 = vmul.f32 %v1982_v21, %v1968_v8 }
 0x44e   : > { %v1951_v56 = vpop.permute.xlu1 %1950  ;;  %v2030_v45 = vpop.permute.xlu0 %2029  ;;  %v2013_v34 = vadd.f32 %v1997_v4, %v1916_v13 }
 0x44f   : > { %v1961_v9 = vsel %vm1032_vm6, %v4522_v22, %v1951_v56  ;;  %v1969_v30 = vsel %vm1032_vm6, %v1951_v56, %v4522_v22  ;;  %v1917_v56 = vadd.f32 %v1901_v43, %v1820_v49  ;;  %v2178_v43 = vld [vmem:[#allocation9 + $0x458] sm:$0xff] }
 0x450   : > { %2021 = vrot.lane.b32.xlu0 %v4434_v23, %s2969_s1  ;;  %1845 = vrot.lane.b32.xlu1 %v4448_v3, %s2967_s11  ;;  %v1999_v37 = vmul.f32 %v1983_v5, %v1961_v9  ;;  %v2000_v53 = vmul.f32 %v1984_v58, %v1969_v30 }
 0x451   : > { %v2014_v51 = vadd.f32 %v1998_v48, %v1917_v56  ;;  %v4620_v48 = vmul.f32 %v4414_v57, %v4102_v44 }
 0x452   : > { %v2032_v38 = vpop.permute.xlu1 %2031  ;;  %v2046_v47 = vpop.permute.xlu0 %2045  ;;  %v2015_v32 = vadd.f32 %v1999_v37, %v1918_v63  ;;  %v2016_v21 = vadd.f32 %v2000_v53, %v1919_v24  ;;  %v1501_v53 = vld [vmem:[#allocation9 + $0x68] sm:$0xff] }
 0x453   : > { %v2065_v16 = vsel %vm1130_vm7, %v2046_v47, %v2030_v45  ;;  %v2057_v50 = vsel %vm1130_vm7, %v2030_v45, %v2046_v47 }
 0x454   : > { %2037 = vrot.lane.b32.xlu0 %v4427_v42, %s2969_s1  ;;  %1926 = vrot.lane.b32.xlu1 %v4441_v15, %s2968_s10  ;;  %v2095_v45 = vmul.f32 %v2079_v33, %v2065_v16  ;;  %v2094_v17 = vmul.f32 %v2078_v19, %v2057_v50 }
 0x456   : > { %v2048_v55 = vpop.permute.xlu1 %2047  ;;  %v2127_v18 = vpop.permute.xlu0 %2126  ;;  %v2111_v8 = vadd.f32 %v2095_v45, %v2014_v51  ;;  %v2110_v5 = vadd.f32 %v2094_v17, %v2013_v34  ;;  %v1420_v45 = vld [vmem:[#allocation9 + $0x260] sm:$0xff]  ;;  %v1421_v17 = vld [vmem:[#allocation9 + $0x268] sm:$0xff] }
 0x457   : > { %v2058_v0 = vsel %vm1130_vm7, %v2032_v38, %v2048_v55  ;;  %v2066_v22 = vsel %vm1130_vm7, %v2048_v55, %v2032_v38  ;;  %v1597_v51 = vld [vmem:[#allocation9 + $0xe0] sm:$0xff] }
 0x458   : > { %2118 = vrot.lane.b32.xlu0 %v4434_v23, %s2970_s26  ;;  %1942 = vrot.lane.b32.xlu1 %v4448_v3, %s2968_s10  ;;  %v2096_v47 = vmul.f32 %v2080_v31, %v2058_v0  ;;  %v2097_v38 = vmul.f32 %v2081_v1, %v2066_v22  ;;  %v1500_v1 = vld [vmem:[#allocation9 + $0x60] sm:$0xff] }
 0x45a   : > { %v2129_v52 = vpop.permute.xlu1 %2128  ;;  %v2143_v61 = vpop.permute.xlu0 %2142  ;;  %v2112_v9 = vadd.f32 %v2096_v47, %v2015_v32  ;;  %v2113_v58 = vadd.f32 %v2097_v38, %v2016_v21  ;;  %v1598_v38 = vld [vmem:[#allocation9 + $0xe8] sm:$0xff] }
 0x45b   : > { %v2154_v25 = vsel %vm1228_vm8, %v2127_v18, %v2143_v61  ;;  %v2162_v14 = vsel %vm1228_vm8, %v2143_v61, %v2127_v18  ;;  %v1436_v61 = vmul.f32 %v1420_v45, %v4355_v36 }
 0x45c   : > { %v2191_v49 = vmul.f32 %v2175_v40, %v2154_v25  ;;  %v2192_v62 = vmul.f32 %v2176_v11, %v2162_v14  ;;  %2134 = vrot.lane.b32.xlu0 %v4427_v42, %s2970_s26  ;;  %2023 = vrot.lane.b32.xlu1 %v4441_v15, %s2969_s1  ;;  %v4641_v25 = vmul.f32 %v4420_v2, %v4064_v10 }
 0x45d   : > { %v1437_v14 = vmul.f32 %v1421_v17, %v4362_v27 }
 0x45e   : > { %v2145_v28 = vpop.permute.xlu1 %2144  ;;  %v1453_v4 = vpop.permute.xlu0 %1452  ;;  %v2208_v16 = vadd.f32 %v2192_v62, %v2111_v8  ;;  %v2207_v12 = vadd.f32 %v2191_v49, %v2110_v5 }
 0x45f   : > { %v2155_v30 = vsel %vm1228_vm8, %v2129_v52, %v2145_v28  ;;  %v2163_v33 = vsel %vm1228_vm8, %v2145_v28, %v2129_v52  ;;  %v1502_v28 = vld [vmem:[#allocation9 + $0x70] sm:$0xff] }
 0x460   : > { %v2193_v55 = vmul.f32 %v2177_v6, %v2155_v30  ;;  %v2194_v18 = vmul.f32 %v2178_v43, %v2163_v33  ;;  %1444 = vrot.lane.b32.xlu0 %v4608_v20, %s2963_s27  ;;  %2039 = vrot.lane.b32.xlu1 %v4448_v3, %s2969_s1  ;;  %v2224_v22 = vmax.f32 %v2208_v16, 0.0  ;;  %v2223_v56 = vmax.f32 %v2207_v12, 0.0 }
 0x462   : > { %v1455_v19 = vpop.permute.xlu1 %1454  ;;  %v1469_v50 = vpop.permute.xlu0 %1468  ;;  %v2210_v31 = vadd.f32 %v2194_v18, %v2113_v58  ;;  %v2209_v0 = vadd.f32 %v2193_v55, %v2112_v9  ;;  %v4654_v9 = vmul.f32 %v4420_v2, %v4066_v26  ;;  %v1422_v55 = vld [vmem:[#allocation9 + $0x270] sm:$0xff]  ;;  %v1503_v18 = vld [vmem:[#allocation9 + $0x78] sm:$0xff] }
 0x463   : > { %v1478_v13 = vsel %vm543_vm1, %v1453_v4, %v1469_v50  ;;  %v1486_v37 = vsel %vm543_vm1, %v1469_v50, %v1453_v4  ;;  %v1588_v26 = vld [vmem:[#allocation9 + $0x98] sm:$0xff] }
 0x464   : > { %1460 = vrot.lane.b32.xlu0 %v4620_v48, %s2963_s27  ;;  %2120 = vrot.lane.b32.xlu1 %v4441_v15, %s2970_s26  ;;  %v2226_v57 = vmax.f32 %v2210_v31, 0.0  ;;  %v2225_v63 = vmax.f32 %v2209_v0, 0.0  ;;  %v1516_v47 = vmul.f32 %v1500_v1, %v1486_v37  ;;  %v1517_v52 = vmul.f32 %v1501_v53, %v1478_v13  ;;  %v1423_v31 = vld [vmem:[#allocation9 + $0x278] sm:$0xff]  ;;  %v1599_v0 = vld [vmem:[#allocation9 + $0xf0] sm:$0xff]  ;;  %v1694_v1 = vld [vmem:[#allocation9 + $0x160] sm:$0xff] }
 0x465   : > { %v1600_v37 = vld [vmem:[#allocation9 + $0xf8] sm:$0xff]  ;;  %v1439_v53 = vmul.f32 %v1423_v31, %v4372_v39 }
 0x466   : > { %v1471_v40 = vpop.permute.xlu1 %1470  ;;  %v1549_v11 = vpop.permute.xlu0 %1548  ;;  %v4630_v24 = vpack.c.bf16 %v2226_v57, %v2224_v22  ;;  %v4632_v34 = vpack.c.bf16 %v2225_v63, %v2223_v56  ;;  %v1532_v62 = vadd.f32 %v1516_v47, %v1436_v61  ;;  %v1533_v6 = vadd.f32 %v1517_v52, %v1437_v14  ;;  %v1695_v22 = vld [vmem:[#allocation9 + $0x168] sm:$0xff] }
 0x467   : > { %v1487_v4 = vsel %vm543_vm1, %v1471_v40, %v1455_v19  ;;  %v1479_v12 = vsel %vm543_vm1, %v1455_v19, %v1471_v40  ;;  %v1438_v19 = vmul.f32 %v1422_v55, %v4365_v46 }
 0x468   : > { %5245 = vst [vmem:[#allocation32_spill] sm:$0xff] %v4630_v24  ;;  %5246 = vst [vmem:[#allocation33_spill] sm:$0xff] %v4632_v34  ;;  %1540 = vrot.lane.b32.xlu0 %v4608_v20, %s2964_s29  ;;  %2136 = vrot.lane.b32.xlu1 %v4448_v3, %s2970_s26  ;;  %v1518_v13 = vmul.f32 %v1502_v28, %v1487_v4  ;;  %v1519_v57 = vmul.f32 %v1503_v18, %v1479_v12  ;;  %v1782_v24 = vld [vmem:[#allocation9 + $0x198] sm:$0xff] }
 0x46a   : > { %v1551_v32 = vpop.permute.xlu1 %1550  ;;  %v1565_v49 = vpop.permute.xlu0 %1564  ;;  %v1534_v61 = vadd.f32 %v1518_v13, %v1438_v19  ;;  %v1535_v14 = vadd.f32 %v1519_v57, %v1439_v53  ;;  %v1794_v13 = vld [vmem:[#allocation9 + $0x1f8] sm:$0xff] }
 0x46b   : > { %v1574_v21 = vsel %vm640_vm2, %v1549_v11, %v1565_v49  ;;  %v1582_v8 = vsel %vm640_vm2, %v1565_v49, %v1549_v11 }
 0x46c   : > { %v1613_v43 = vmul.f32 %v1597_v51, %v1582_v8  ;;  %v1614_v5 = vmul.f32 %v1598_v38, %v1574_v21  ;;  %1446 = vrot.lane.b32.xlu1 %v4641_v25, %s2963_s27  ;;  %1556 = vrot.lane.b32.xlu0 %v4620_v48, %s2964_s29  ;;  %v1696_v51 = vld [vmem:[#allocation9 + $0x170] sm:$0xff]  ;;  %v1697_v38 = vld [vmem:[#allocation9 + $0x178] sm:$0xff] }
 0x46e   : > { %v1629_v58 = vadd.f32 %v1613_v43, %v1532_v62  ;;  %v1630_v30 = vadd.f32 %v1614_v5, %v1533_v6  ;;  %v1567_v33 = vpop.permute.xlu1 %1566  ;;  %v1646_v16 = vpop.permute.xlu0 %1645 }
 0x46f   : > { %v1575_v50 = vsel %vm640_vm2, %v1551_v32, %v1567_v33  ;;  %v1583_v2 = vsel %vm640_vm2, %v1567_v33, %v1551_v32  ;;  %v5248_v29 = vld [vmem:[#allocation33_spill] sm:$0xff] }
 0x470   : > { %1462 = vrot.lane.b32.xlu1 %v4654_v9, %s2963_s27  ;;  %1637 = vrot.lane.b32.xlu0 %v4608_v20, %s2965_s19  ;;  %v1615_v45 = vmul.f32 %v1599_v0, %v1583_v2  ;;  %v1616_v17 = vmul.f32 %v1600_v37, %v1575_v50  ;;  %v1793_v0 = vld [vmem:[#allocation9 + $0x1f0] sm:$0xff] }
 0x472   : > { %v1648_v56 = vpop.permute.xlu1 %1647  ;;  %v1662_v63 = vpop.permute.xlu0 %1661  ;;  %v1631_v8 = vadd.f32 %v1615_v45, %v1534_v61  ;;  %v1632_v5 = vadd.f32 %v1616_v17, %v1535_v14  ;;  %v1888_v45 = vld [vmem:[#allocation9 + $0x2e0] sm:$0xff] }
 0x473   : > { %v1671_v40 = vsel %vm738_vm3, %v1646_v16, %v1662_v63  ;;  %v1679_v11 = vsel %vm738_vm3, %v1662_v63, %v1646_v16 }
 0x474   : > { %v1710_v47 = vmul.f32 %v1694_v1, %v1679_v11  ;;  %v1711_v52 = vmul.f32 %v1695_v22, %v1671_v40  ;;  %1542 = vrot.lane.b32.xlu1 %v4641_v25, %s2964_s29  ;;  %1653 = vrot.lane.b32.xlu0 %v4620_v48, %s2965_s19  ;;  %v1889_v40 = vld [vmem:[#allocation9 + $0x2e8] sm:$0xff] }
 0x476   : > { %v1726_v32 = vadd.f32 %v1710_v47, %v1629_v58  ;;  %v1727_v49 = vadd.f32 %v1711_v52, %v1630_v30  ;;  %v1664_v62 = vpop.permute.xlu1 %1663  ;;  %v1743_v21 = vpop.permute.xlu0 %1742  ;;  %v1791_v58 = vld [vmem:[#allocation9 + $0x1e0] sm:$0xff]  ;;  %v1792_v30 = vld [vmem:[#allocation9 + $0x1e8] sm:$0xff] }
 0x477   : > { %v1672_v6 = vsel %vm738_vm3, %v1648_v56, %v1664_v62  ;;  %v1680_v43 = vsel %vm738_vm3, %v1664_v62, %v1648_v56 }
 0x478   : > { %v1712_v28 = vmul.f32 %v1696_v51, %v1680_v43  ;;  %v1713_v4 = vmul.f32 %v1697_v38, %v1672_v6  ;;  %1558 = vrot.lane.b32.xlu1 %v4654_v9, %s2964_s29  ;;  %1734 = vrot.lane.b32.xlu0 %v4608_v20, %s2966_s20 }
 0x47a   : > { %v1728_v33 = vadd.f32 %v1712_v28, %v1631_v8  ;;  %v1729_v16 = vadd.f32 %v1713_v4, %v1632_v5  ;;  %v1745_v55 = vpop.permute.xlu1 %1744  ;;  %v1759_v18 = vpop.permute.xlu0 %1758 }
 0x47b   : > { %v1768_v12 = vsel %vm836_vm4, %v1743_v21, %v1759_v18  ;;  %v1776_v50 = vsel %vm836_vm4, %v1759_v18, %v1743_v21 }
 0x47c   : > { %v1807_v2 = vmul.f32 %v1791_v58, %v1776_v50  ;;  %v1808_v31 = vmul.f32 %v1792_v30, %v1768_v12  ;;  %1639 = vrot.lane.b32.xlu1 %v4641_v25, %s2965_s19  ;;  %1750 = vrot.lane.b32.xlu0 %v4620_v48, %s2966_s20  ;;  %v1985_v58 = vld [vmem:[#allocation9 + $0x360] sm:$0xff]  ;;  %v1986_v30 = vld [vmem:[#allocation9 + $0x368] sm:$0xff] }
 0x47e   : > { %v1823_v37 = vadd.f32 %v1807_v2, %v1726_v32  ;;  %v1824_v1 = vadd.f32 %v1808_v31, %v1727_v49  ;;  %v1761_v22 = vpop.permute.xlu1 %1760  ;;  %v1840_v19 = vpop.permute.xlu0 %1839  ;;  %v1890_v32 = vld [vmem:[#allocation9 + $0x2f0] sm:$0xff]  ;;  %v1891_v49 = vld [vmem:[#allocation9 + $0x2f8] sm:$0xff] }
 0x47f   : > { %v1769_v57 = vsel %vm836_vm4, %v1745_v55, %v1761_v22  ;;  %v1777_v56 = vsel %vm836_vm4, %v1761_v22, %v1745_v55 }
 0x480   : > { %v1809_v63 = vmul.f32 %v1793_v0, %v1777_v56  ;;  %v1810_v53 = vmul.f32 %v1794_v13, %v1769_v57  ;;  %1655 = vrot.lane.b32.xlu1 %v4654_v9, %s2965_s19  ;;  %1831 = vrot.lane.b32.xlu0 %v4608_v20, %s2967_s11  ;;  %v1987_v0 = vld [vmem:[#allocation9 + $0x370] sm:$0xff]  ;;  %v1988_v13 = vld [vmem:[#allocation9 + $0x378] sm:$0xff]  ;;  %s5065_s19 = scalar_lea.hbm %s5119_s6, %s2605_s15 }
 0x482   : > { %v1825_v11 = vadd.f32 %v1809_v63, %v1728_v33  ;;  %v1826_v17 = vadd.f32 %v1810_v53, %v1729_v16  ;;  %v1842_v47 = vpop.permute.xlu1 %1841  ;;  %v1856_v52 = vpop.permute.xlu0 %1855 }
 0x483   : > { %v1865_v61 = vsel %vm934_vm5, %v1840_v19, %v1856_v52  ;;  %v1873_v51 = vsel %vm934_vm5, %v1856_v52, %v1840_v19 }
 0x484   : > { %v1904_v38 = vmul.f32 %v1888_v45, %v1865_v61  ;;  %v1905_v14 = vmul.f32 %v1889_v40, %v1873_v51  ;;  %1736 = vrot.lane.b32.xlu1 %v4641_v25, %s2966_s20  ;;  %1847 = vrot.lane.b32.xlu0 %v4620_v48, %s2967_s11  ;;  %v2082_v45 = vld [vmem:[#allocation9 + $0x3e0] sm:$0xff]  ;;  %v2083_v40 = vld [vmem:[#allocation9 + $0x3e8] sm:$0xff] }
 0x486   : > { %v1920_v62 = vadd.f32 %v1904_v38, %v1823_v37  ;;  %v1921_v21 = vadd.f32 %v1905_v14, %v1824_v1  ;;  %v1858_v8 = vpop.permute.xlu1 %1857  ;;  %v1937_v6 = vpop.permute.xlu0 %1936 }
 0x487   : > { %v1866_v43 = vsel %vm934_vm5, %v1842_v47, %v1858_v8  ;;  %v1874_v5 = vsel %vm934_vm5, %v1858_v8, %v1842_v47 }
 0x488   : > { %v1906_v28 = vmul.f32 %v1890_v32, %v1866_v43  ;;  %v1907_v4 = vmul.f32 %v1891_v49, %v1874_v5  ;;  %1752 = vrot.lane.b32.xlu1 %v4654_v9, %s2966_s20  ;;  %1928 = vrot.lane.b32.xlu0 %v4608_v20, %s2968_s10  ;;  %v2084_v32 = vld [vmem:[#allocation9 + $0x3f0] sm:$0xff]  ;;  %v2085_v49 = vld [vmem:[#allocation9 + $0x3f8] sm:$0xff]  ;;  %s2878_s20 = scalar_lea.vmem %s5068_s17, 1024 }
 0x489   : > { %p2879_p10 = scmp.ne.s32.totalorder %s5068_s17, %s2878_s20 }
 0x48a   : > { %v1922_v33 = vadd.f32 %v1906_v28, %v1825_v11  ;;  %v1923_v16 = vadd.f32 %v1907_v4, %v1826_v17  ;;  %v1939_v55 = vpop.permute.xlu1 %1938  ;;  %v1953_v18 = vpop.permute.xlu0 %1952 }
 0x48b   : > { %v1962_v12 = vsel %vm1032_vm6, %v1937_v6, %v1953_v18  ;;  %v1970_v50 = vsel %vm1032_vm6, %v1953_v18, %v1937_v6  ;;  %p2880_p3 = pnand %p2879_p10, %p3157_p5 }
 0x48c   : > { %v2001_v2 = vmul.f32 %v1985_v58, %v1962_v12  ;;  %v2002_v31 = vmul.f32 %v1986_v30, %v1970_v50  ;;  %1833 = vrot.lane.b32.xlu1 %v4641_v25, %s2967_s11  ;;  %1944 = vrot.lane.b32.xlu0 %v4620_v48, %s2968_s10 }
 0x48d   : > { %p2881_p7 = pneg %p2880_p3 }
 0x48e   : > { %v2017_v37 = vadd.f32 %v2001_v2, %v1920_v62  ;;  %v2018_v1 = vadd.f32 %v2002_v31, %v1921_v21  ;;  %v1955_v22 = vpop.permute.xlu1 %1954  ;;  %v2034_v19 = vpop.permute.xlu0 %2033  ;;  %v2235_v2 = vld [vmem:[%s5118_s5] sm:$0xff] }
 0x48f   : > { %v1963_v57 = vsel %vm1032_vm6, %v1939_v55, %v1955_v22  ;;  %v1971_v56 = vsel %vm1032_vm6, %v1955_v22, %v1939_v55  ;;  %v2236_v22 = vld [vmem:[%s5118_s5 + $0x8] sm:$0xff] }
 0x490   : > { %v2003_v63 = vmul.f32 %v1987_v0, %v1963_v57  ;;  %v2004_v53 = vmul.f32 %v1988_v13, %v1971_v56  ;;  %1849 = vrot.lane.b32.xlu1 %v4654_v9, %s2967_s11  ;;  %2025 = vrot.lane.b32.xlu0 %v4608_v20, %s2969_s1  ;;  %v2238_v56 = vld [vmem:[%s5118_s5 + $0x18] sm:$0xff]  ;;  %s2972_s11 = smov [#allocation11]  }
 0x492   : > { %v2019_v11 = vadd.f32 %v2003_v63, %v1922_v33  ;;  %v2020_v17 = vadd.f32 %v2004_v53, %v1923_v16  ;;  %v2036_v47 = vpop.permute.xlu1 %2035  ;;  %v2050_v52 = vpop.permute.xlu0 %2049 }
 0x493   : > { %v2059_v61 = vsel %vm1130_vm7, %v2034_v19, %v2050_v52  ;;  %v2067_v51 = vsel %vm1130_vm7, %v2050_v52, %v2034_v19 }
 0x494   : > { %v2098_v38 = vmul.f32 %v2082_v45, %v2059_v61  ;;  %v2099_v14 = vmul.f32 %v2083_v40, %v2067_v51  ;;  %1930 = vrot.lane.b32.xlu1 %v4641_v25, %s2968_s10  ;;  %2041 = vrot.lane.b32.xlu0 %v4620_v48, %s2969_s1  ;;  %v1408_v61 = vld [vmem:[#allocation9 + $0x200] sm:$0xff]  ;;  %v1409_v51 = vld [vmem:[#allocation9 + $0x208] sm:$0xff] }
 0x496   : > { %v4742_v62 = vadd.f32 %v2098_v38, %v2017_v37  ;;  %v4744_v21 = vadd.f32 %v2099_v14, %v2018_v1  ;;  %v2052_v8 = vpop.permute.xlu1 %2051  ;;  %v1457_v6 = vpop.permute.xlu0 %1456 }
 0x497   : > { %v2060_v43 = vsel %vm1130_vm7, %v2036_v47, %v2052_v8  ;;  %v2068_v5 = vsel %vm1130_vm7, %v2052_v8, %v2036_v47 }
 0x498   : > { %v2100_v28 = vmul.f32 %v2084_v32, %v2060_v43  ;;  %v2101_v4 = vmul.f32 %v2085_v49, %v2068_v5  ;;  %1946 = vrot.lane.b32.xlu1 %v4654_v9, %s2968_s10  ;;  %2122 = vrot.lane.b32.xlu0 %v4608_v20, %s2970_s26  ;;  %v1410_v32 = vld [vmem:[#allocation9 + $0x210] sm:$0xff]  ;;  %v1411_v49 = vld [vmem:[#allocation9 + $0x218] sm:$0xff]  ;;  %v1424_v5 = vmul.f32 %v1408_v61, %v4434_v23  ;;  %v1683_v61 = vld [vmem:[#allocation9 + $0x108] sm:$0xff]  ;;  %s2882_s10 = sshll.u32 %s2972_s11, 4  ;;  %s2883_s10 = int_to_ptr.vmem [resolvable:$false] %s2882_s10 }
 0x499   : > { %p2885_p12 = scmp.lt.s32.totalorder %s5068_s17, %s2883_s10 }
 0x49a   : > { %v4754_v58 = vadd.f32 %v2100_v28, %v2019_v11  ;;  %v4756_v30 = vadd.f32 %v2101_v4, %v2020_v17  ;;  %v1441_v33 = vpop.permute.xlu1 %1440  ;;  %v1537_v16 = vpop.permute.xlu0 %1536  ;;  %v1488_v11 = vld [vmem:[#allocation9] sm:$0xff]  ;;  %v1489_v17 = vld [vmem:[#allocation9 + $0x8] sm:$0xff]  ;;  %v1425_v28 = vmul.f32 %v1409_v51, %v4427_v42 }
 0x49b   : > { %v1472_v47 = vsel %vm543_vm1, %v1441_v33, %v1457_v6  ;;  %v1480_v52 = vsel %vm543_vm1, %v1457_v6, %v1441_v33  ;;  %v1585_v4 = vld [vmem:[#allocation9 + $0x80] sm:$0xff]  ;;  %v1427_v33 = vmul.f32 %v1411_v49, %v4448_v3  ;;  %v1587_v49 = vld [vmem:[#allocation9 + $0x90] sm:$0xff] }
 0x49c   : > { %2027 = vrot.lane.b32.xlu1 %v4641_v25, %s2969_s1  ;;  %2138 = vrot.lane.b32.xlu0 %v4620_v48, %s2970_s26  ;;  %v1504_v38 = vmul.f32 %v1488_v11, %v1480_v52  ;;  %v1505_v14 = vmul.f32 %v1489_v17, %v1472_v47  ;;  %v1426_v11 = vmul.f32 %v1410_v32, %v4441_v15  ;;  %v1682_v52 = vld [vmem:[#allocation9 + $0x100] sm:$0xff] }
 0x49e   : > { %v1443_v55 = vpop.permute.xlu1 %1442  ;;  %v1553_v18 = vpop.permute.xlu0 %1552  ;;  %v1520_v23 = vadd.f32 %v1504_v38, %v1424_v5  ;;  %v1521_v47 = vadd.f32 %v1505_v14, %v1425_v28  ;;  %v1779_v5 = vld [vmem:[#allocation9 + $0x180] sm:$0xff]  ;;  %v1780_v28 = vld [vmem:[#allocation9 + $0x188] sm:$0xff] }
 0x49f   : > { %v1576_v6 = vsel %vm640_vm2, %v1553_v18, %v1537_v16 }
 0x4a0   : > { %2043 = vrot.lane.b32.xlu1 %v4654_v9, %s2969_s1  ;;  %2130 = vrot.lane.b32.xlu0 %v4355_v36, %s2970_s26  ;;  %v2237_v36 = vld [vmem:[%s5118_s5 + $0x10] sm:$0xff]  ;;  %v1601_v15 = vmul.f32 %v1585_v4, %v1576_v6  ;;  %v1685_v6 = vld [vmem:[#allocation9 + $0x118] sm:$0xff]  ;;  %s2884_s1 = scalar_lea.vmem %s2883_s10, 2048 }
 0x4a1   : > { %p2886_p2 = scmp.lt.s32.totalorder %s2884_s1, %s2878_s20 }
 0x4a2   : > { %v1459_v12 = vpop.permute.xlu1 %1458  ;;  %v1634_v50 = vpop.permute.xlu0 %1633 }
 0x4a3   : > { %v1473_v17 = vsel %vm543_vm1, %v1443_v55, %v1459_v12  ;;  %v1481_v42 = vsel %vm543_vm1, %v1459_v12, %v1443_v55  ;;  %p2887_p1 = por %p2886_p2, %p2885_p12 }
 0x4a4   : > { %2124 = vrot.lane.b32.xlu1 %v4641_v25, %s2970_s26  ;;  %2146 = vrot.lane.b32.xlu0 %v4362_v27, %s2970_s26 }
 0x4a5   : > { %p2888_p4 = pnand %p2887_p1, %p2881_p7 }
 0x4a6   : > { %v1539_v31 = vpop.permute.xlu1 %1538  ;;  %v1650_v0 = vpop.permute.xlu0 %1649 }
 0x4a7   : > { %v1665_v51 = vsel %vm738_vm3, %v1634_v50, %v1650_v0  ;;  %v1673_v3 = vsel %vm738_vm3, %v1650_v0, %v1634_v50 }
 0x4a8   : > { %2140 = vrot.lane.b32.xlu1 %v4654_v9, %s2970_s26  ;;  %2241 = vperm.xlu0 %2731, %v2235_v2   ;;  %v1586_v2 = vld [vmem:[#allocation9 + $0x88] sm:$0xff]  ;;  %v1698_v4 = vmul.f32 %v1682_v52, %v1673_v3 }
 0x4aa   : > { %v1555_v13 = vpop.permute.xlu1 %1554  ;;  %v1731_v37 = vpop.permute.xlu0 %1730 }
 0x4ab   : > { %v1569_v55 = vsel %vm640_vm2, %v1539_v31, %v1555_v13  ;;  %v1577_v12 = vsel %vm640_vm2, %v1555_v13, %v1539_v31 }
 0x4ac   : > { %2132 = vrot.lane.b32.xlu1 %v4365_v46, %s2970_s26  ;;  %2251 = vperm.xlu0 %2731, %v2237_v36   ;;  %v1568_v36 = vsel %vm640_vm2, %v1537_v16, %v1553_v18  ;;  %v1603_v13 = vmul.f32 %v1587_v49, %v1577_v12 }
 0x4ad   : > { %v1602_v32 = vmul.f32 %v1586_v2, %v1568_v36  ;;  %v1699_v2 = vmul.f32 %v1683_v61, %v1665_v51  ;;  %v1684_v36 = vld [vmem:[#allocation9 + $0x110] sm:$0xff]  ;;  %v1617_v61 = vadd.f32 %v1601_v15, %v1520_v23 }
 0x4ae   : > { %v4780_v27 = vpop.permute.xlu1 %1635  ;;  %v1747_v1 = vpop.permute.xlu0 %1746 }
 0x4af   : > { %v1762_v50 = vsel %vm836_vm4, %v1731_v37, %v1747_v1  ;;  %v1770_v0 = vsel %vm836_vm4, %v1747_v1, %v1731_v37  ;;  %v1618_v51 = vadd.f32 %v1602_v32, %v1521_v47  ;;  %v1714_v49 = vadd.f32 %v1698_v4, %v1617_v61  ;;  %v1974_v47 = vld [vmem:[#allocation9 + $0x308] sm:$0xff] }
 0x4b0   : > { %2148 = vrot.lane.b32.xlu1 %v4372_v39, %s2970_s26  ;;  %v1795_v3 = vmul.f32 %v1779_v5, %v1770_v0  ;;  %v1796_v44 = vmul.f32 %v1780_v28, %v1762_v50  ;;  %v1879_v5 = vld [vmem:[#allocation9 + $0x298] sm:$0xff]  ;;  %v2070_v28 = vld [vmem:[#allocation9 + $0x380] sm:$0xff]  ;;  %v2071_v50 = vld [vmem:[#allocation9 + $0x388] sm:$0xff] }
 0x4b2   : > { %v1652_v19 = vpop.permute.xlu1 %1651  ;;  %v4787_v57 = vpop.permute.xlu0 %1827  ;;  %v1811_v34 = vadd.f32 %v1795_v3, %v1714_v49 }
 0x4b3   : > { %v1666_v10 = vsel %vm738_vm3, %v4780_v27, %v1652_v19  ;;  %v1674_v31 = vsel %vm738_vm3, %v1652_v19, %v4780_v27 }
 0x4b4   : > { %2246 = vperm.xlu1 %2730, %v2236_v22   ;;  %v1490_v22 = vld [vmem:[#allocation9 + $0x10] sm:$0xff]  ;;  %v1700_v19 = vmul.f32 %v1684_v36, %v1674_v31  ;;  %v2167_v31 = vld [vmem:[#allocation9 + $0x400] sm:$0xff] }
 0x4b5   : > { %v1506_v38 = vmul.f32 %v1490_v22, %v1481_v42  ;;  %v1604_v22 = vmul.f32 %v1588_v26, %v1569_v55  ;;  %v1701_v26 = vmul.f32 %v1685_v6, %v1666_v10  ;;  %v1715_v55 = vadd.f32 %v1699_v2, %v1618_v51 }
 0x4b6   : > { %v4792_v46 = vpop.permute.xlu1 %1732  ;;  %v1844_v63 = vpop.permute.xlu0 %1843 }
 0x4b7   : > { %v1859_v37 = vsel %vm934_vm5, %v4787_v57, %v1844_v63  ;;  %v1867_v1 = vsel %vm934_vm5, %v1844_v63, %v4787_v57  ;;  %v1522_v35 = vadd.f32 %v1506_v38, %v1426_v11  ;;  %v1812_v57 = vadd.f32 %v1796_v44, %v1715_v55  ;;  %v1781_v63 = vld [vmem:[#allocation9 + $0x190] sm:$0xff] }
 0x4b8   : > { %2256 = vperm.xlu1 %2730, %v2238_v56   ;;  %v1491_v56 = vld [vmem:[#allocation9 + $0x18] sm:$0xff] }
 0x4b9   : > { %v1507_v14 = vmul.f32 %v1491_v56, %v1473_v17  ;;  %v1876_v56 = vld [vmem:[#allocation9 + $0x280] sm:$0xff]  ;;  %v1877_v17 = vld [vmem:[#allocation9 + $0x288] sm:$0xff]  ;;  %v1619_v59 = vadd.f32 %v1603_v13, %v1522_v35 }
 0x4ba   : > { %v4794_v53 = vpop.permute.xlu1 %1748  ;;  %v4796_v45 = vpop.permute.xlu0 %1924  ;;  %v1892_v12 = vmul.f32 %v1876_v56, %v1859_v37  ;;  %v1893_v7 = vmul.f32 %v1877_v17, %v1867_v1  ;;  %v1973_v35 = vld [vmem:[#allocation9 + $0x300] sm:$0xff]  ;;  %v2168_v13 = vld [vmem:[#allocation9 + $0x408] sm:$0xff]  ;;  %v2072_v17 = vld [vmem:[#allocation9 + $0x390] sm:$0xff] }
 0x4bb   : > { %v1523_v27 = vadd.f32 %v1507_v14, %v1427_v33  ;;  %v1763_v11 = vsel %vm836_vm4, %v4792_v46, %v4794_v53  ;;  %v1771_v10 = vsel %vm836_vm4, %v4794_v53, %v4792_v46  ;;  %v1716_v33 = vadd.f32 %v1700_v19, %v1619_v59  ;;  %v1878_v14 = vld [vmem:[#allocation9 + $0x290] sm:$0xff]  ;;  %v2073_v37 = vld [vmem:[#allocation9 + $0x398] sm:$0xff] }
 0x4bc   : > { %v1908_v32 = vadd.f32 %v1892_v12, %v1811_v34  ;;  %v1909_v38 = vadd.f32 %v1893_v7, %v1812_v57  ;;  %v1797_v46 = vmul.f32 %v1781_v63, %v1771_v10  ;;  %v1798_v53 = vmul.f32 %v1782_v24, %v1763_v11  ;;  %v2169_v10 = vld [vmem:[#allocation9 + $0x410] sm:$0xff] }
 0x4bd   : > { %v1620_v54 = vadd.f32 %v1604_v22, %v1523_v27 }
 0x4be   : > { %v4798_v39 = vpop.permute.xlu1 %1829  ;;  %v4800_v40 = vpop.permute.xlu0 %1940 }
 0x4bf   : > { %v1717_v23 = vadd.f32 %v1701_v26, %v1620_v54  ;;  %v1956_v44 = vsel %vm1032_vm6, %v4796_v45, %v4800_v40  ;;  %v1964_v15 = vsel %vm1032_vm6, %v4800_v40, %v4796_v45 }
 0x4c0   : > { %v1989_v0 = vmul.f32 %v1973_v35, %v1956_v44  ;;  %v1990_v4 = vmul.f32 %v1974_v47, %v1964_v15  ;;  %v2170_v35 = vld [vmem:[#allocation9 + $0x418] sm:$0xff] }
 0x4c1   : > { %v1814_v61 = vadd.f32 %v1798_v53, %v1717_v23 }
 0x4c2   : > { %v4806_v8 = vpop.permute.xlu1 %1845  ;;  %v4808_v43 = vpop.permute.xlu0 %2021  ;;  %v2005_v26 = vadd.f32 %v1989_v0, %v1908_v32  ;;  %v2006_v49 = vadd.f32 %v1990_v4, %v1909_v38 }
 0x4c3   : > { %v1860_v54 = vsel %vm934_vm5, %v4798_v39, %v4806_v8  ;;  %v1868_v59 = vsel %vm934_vm5, %v4806_v8, %v4798_v39  ;;  %v1975_v39 = vld [vmem:[#allocation9 + $0x310] sm:$0xff]  ;;  %v1976_v8 = vld [vmem:[#allocation9 + $0x318] sm:$0xff] }
 0x4c4   : > { %v1894_v36 = vmul.f32 %v1878_v14, %v1860_v54  ;;  %v1895_v6 = vmul.f32 %v1879_v5, %v1868_v59 }
 0x4c6   : > { %v4826_v16 = vpop.permute.xlu1 %1926  ;;  %v4828_v18 = vpop.permute.xlu0 %2037  ;;  %v1911_v12 = vadd.f32 %v1895_v6, %v1814_v61 }
 0x4c7   : > { %v2053_v7 = vsel %vm1130_vm7, %v4808_v43, %v4828_v18  ;;  %v2061_v34 = vsel %vm1130_vm7, %v4828_v18, %v4808_v43 }
 0x4c8   : > { %v2086_v22 = vmul.f32 %v2070_v28, %v2053_v7  ;;  %v2087_v56 = vmul.f32 %v2071_v50, %v2061_v34 }
 0x4ca   : > { %v1943_v42 = vpop.permute.xlu1 %1942  ;;  %v2119_v52 = vpop.permute.xlu0 %2118  ;;  %v2102_v11 = vadd.f32 %v2086_v22, %v2005_v26  ;;  %v2103_v47 = vadd.f32 %v2087_v56, %v2006_v49  ;;  %v1412_v49 = vld [vmem:[#allocation9 + $0x220] sm:$0xff] }
 0x4cb   : > { %v1957_v24 = vsel %vm1032_vm6, %v4826_v16, %v1943_v42  ;;  %v1965_v2 = vsel %vm1032_vm6, %v1943_v42, %v4826_v16  ;;  %v1813_v42 = vadd.f32 %v1797_v46, %v1716_v33 }
 0x4cc   : > { %v1991_v51 = vmul.f32 %v1975_v39, %v1957_v24  ;;  %v1992_v3 = vmul.f32 %v1976_v8, %v1965_v2 }
 0x4ce   : > { %v2024_v41 = vpop.permute.xlu1 %2023  ;;  %v2135_v60 = vpop.permute.xlu0 %2134 }
 0x4cf   : > { %v2150_v43 = vsel %vm1228_vm8, %v2119_v52, %v2135_v60  ;;  %v2158_v18 = vsel %vm1228_vm8, %v2135_v60, %v2119_v52  ;;  %v1910_v52 = vadd.f32 %v1894_v36, %v1813_v42 }
 0x4d0   : > { %v2183_v55 = vmul.f32 %v2167_v31, %v2150_v43  ;;  %v2184_v60 = vmul.f32 %v2168_v13, %v2158_v18 }
 0x4d1   : > { %v2007_v44 = vadd.f32 %v1991_v51, %v1910_v52  ;;  %v1492_v51 = vld [vmem:[#allocation9 + $0x20] sm:$0xff] }
 0x4d2   : > { %v2040_v45 = vpop.permute.xlu1 %2039  ;;  %v4882_v40 = vpop.permute.xlu0 %1444  ;;  %v2200_v38 = vadd.f32 %v2184_v60, %v2103_v47  ;;  %v2199_v14 = vadd.f32 %v2183_v55, %v2102_v11  ;;  %v1413_v55 = vld [vmem:[#allocation9 + $0x228] sm:$0xff]  ;;  %v1589_v47 = vld [vmem:[#allocation9 + $0xa0] sm:$0xff] }
 0x4d3   : > { %v2054_v1 = vsel %vm1130_vm7, %v2024_v41, %v2040_v45  ;;  %v2062_v16 = vsel %vm1130_vm7, %v2040_v45, %v2024_v41  ;;  %v2008_v41 = vadd.f32 %v1992_v3, %v1911_v12  ;;  %v1493_v3 = vld [vmem:[#allocation9 + $0x28] sm:$0xff]  ;;  %v1414_v12 = vld [vmem:[#allocation9 + $0x230] sm:$0xff] }
 0x4d4   : > { %v2088_v57 = vmul.f32 %v2072_v17, %v2054_v1  ;;  %v2089_v63 = vmul.f32 %v2073_v37, %v2062_v16  ;;  %v2216_v34 = vmax.f32 %v2200_v38, 0.0  ;;  %v2215_v0 = vmax.f32 %v2199_v14, 0.0 }
 0x4d6   : > { %v2121_v27 = vpop.permute.xlu1 %2120  ;;  %v1461_v19 = vpop.permute.xlu0 %1460  ;;  %v2104_v5 = vadd.f32 %v2088_v57, %v2007_v44  ;;  %v2105_v46 = vadd.f32 %v2089_v63, %v2008_v41  ;;  %v1415_v57 = vld [vmem:[#allocation9 + $0x238] sm:$0xff]  ;;  %v1590_v44 = vld [vmem:[#allocation9 + $0xa8] sm:$0xff] }
 0x4d7   : > { %v1482_v26 = vsel %vm543_vm1, %v1461_v19, %v4882_v40 }
 0x4d8   : > { %v1508_v60 = vmul.f32 %v1492_v51, %v1482_v26  ;;  %v1688_v51 = vld [vmem:[#allocation9 + $0x130] sm:$0xff] }
 0x4da   : > { %v2137_v33 = vpop.permute.xlu1 %2136  ;;  %v1541_v23 = vpop.permute.xlu0 %1540 }
 0x4db   : > { %v2151_v15 = vsel %vm1228_vm8, %v2121_v27, %v2137_v33  ;;  %v2159_v32 = vsel %vm1228_vm8, %v2137_v33, %v2121_v27  ;;  %v1474_v27 = vsel %vm543_vm1, %v4882_v40, %v1461_v19  ;;  %v1430_v19 = vmul.f32 %v1414_v12, %v4641_v25 }
 0x4dc   : > { %v2185_v54 = vmul.f32 %v2169_v10, %v2151_v15  ;;  %v2186_v59 = vmul.f32 %v2170_v35, %v2159_v32  ;;  %v1509_v52 = vmul.f32 %v1493_v3, %v1474_v27  ;;  %v1428_v10 = vmul.f32 %v1412_v49, %v4608_v20  ;;  %v1494_v15 = vld [vmem:[#allocation9 + $0x30] sm:$0xff]  ;;  %v1495_v32 = vld [vmem:[#allocation9 + $0x38] sm:$0xff]  ;;  %v1880_v49 = vld [vmem:[#allocation9 + $0x2a0] sm:$0xff] }
 0x4dd   : > { %v1429_v35 = vmul.f32 %v1413_v55, %v4620_v48  ;;  %v1431_v33 = vmul.f32 %v1415_v57, %v4654_v9  ;;  %v1689_v3 = vld [vmem:[#allocation9 + $0x138] sm:$0xff]  ;;  %v1881_v55 = vld [vmem:[#allocation9 + $0x2a8] sm:$0xff] }
 0x4de   : > { %v1447_v53 = vpop.permute.xlu1 %1446  ;;  %v1557_v28 = vpop.permute.xlu0 %1556  ;;  %v2202_v50 = vadd.f32 %v2186_v59, %v2105_v46  ;;  %v2201_v7 = vadd.f32 %v2185_v54, %v2104_v5  ;;  %v1524_v48 = vadd.f32 %v1508_v60, %v1428_v10  ;;  %v1686_v5 = vld [vmem:[#allocation9 + $0x120] sm:$0xff]  ;;  %v1687_v54 = vld [vmem:[#allocation9 + $0x128] sm:$0xff] }
 0x4df   : > { %v1570_v41 = vsel %vm640_vm2, %v1541_v23, %v1557_v28  ;;  %v1578_v40 = vsel %vm640_vm2, %v1557_v28, %v1541_v23  ;;  %v1525_v14 = vadd.f32 %v1509_v52, %v1429_v35 }
 0x4e0   : > { %v2218_v45 = vmax.f32 %v2202_v50, 0.0  ;;  %v2217_v4 = vmax.f32 %v2201_v7, 0.0  ;;  %v1605_v46 = vmul.f32 %v1589_v47, %v1578_v40  ;;  %v1606_v28 = vmul.f32 %v1590_v44, %v1570_v41  ;;  %v1591_v50 = vld [vmem:[#allocation9 + $0xb0] sm:$0xff]  ;;  %v1592_v7 = vld [vmem:[#allocation9 + $0xb8] sm:$0xff] }
 0x4e2   : > { %v1463_v39 = vpop.permute.xlu1 %1462  ;;  %v1638_v8 = vpop.permute.xlu0 %1637  ;;  %v2622_v24 = vpack.c.bf16 %v2218_v45, %v2216_v34  ;;  %v2624_v2 = vpack.c.bf16 %v2217_v4, %v2215_v0  ;;  %v1783_v4 = vld [vmem:[#allocation9 + $0x1a0] sm:$0xff]  ;;  %v1621_v12 = vadd.f32 %v1605_v46, %v1524_v48  ;;  %v1622_v57 = vadd.f32 %v1606_v28, %v1525_v14  ;;  %v1978_v28 = vld [vmem:[#allocation9 + $0x328] sm:$0xff] }
 0x4e3   : > { %v1475_v38 = vsel %vm543_vm1, %v1447_v53, %v1463_v39  ;;  %v1483_v20 = vsel %vm543_vm1, %v1463_v39, %v1447_v53  ;;  %v1784_v39 = vld [vmem:[#allocation9 + $0x1a8] sm:$0xff]  ;;  %v1977_v46 = vld [vmem:[#allocation9 + $0x320] sm:$0xff] }
 0x4e4   : > { %2623 = vmatprep.subr.bf16.mxu1 %v2622_v24  ;;  %v1510_v45 = vmul.f32 %v1494_v15, %v1483_v20  ;;  %v1511_v0 = vmul.f32 %v1495_v32, %v1475_v38 }
 0x4e5   : > { %2625 = vmatpush1.bf16.msra.mxu1 %v2624_v2 }
 0x4e6   : > { %v1543_v36 = vpop.permute.xlu1 %1542  ;;  %v1654_v6 = vpop.permute.xlu0 %1653  ;;  %v1526_v47 = vadd.f32 %v1510_v45, %v1430_v19  ;;  %v1882_v45 = vld [vmem:[#allocation9 + $0x2b0] sm:$0xff] }
 0x4e7   : > { %v1667_v59 = vsel %vm738_vm3, %v1638_v8, %v1654_v6  ;;  %v1675_v25 = vsel %vm738_vm3, %v1654_v6, %v1638_v8 }
 0x4e8   : > { %v1702_v2 = vmul.f32 %v1686_v5, %v1675_v25  ;;  %v1703_v6 = vmul.f32 %v1687_v54, %v1667_v59  ;;  %v1786_v25 = vld [vmem:[#allocation9 + $0x1b8] sm:$0xff] }
 0x4ea   : > { %v1559_v31 = vpop.permute.xlu1 %1558  ;;  %v1735_v13 = vpop.permute.xlu0 %1734  ;;  %v1718_v41 = vadd.f32 %v1702_v2, %v1621_v12  ;;  %v1719_v40 = vadd.f32 %v1703_v6, %v1622_v57  ;;  %v2076_v12 = vld [vmem:[#allocation9 + $0x3b0] sm:$0xff]  ;;  %v2077_v57 = vld [vmem:[#allocation9 + $0x3b8] sm:$0xff] }
 0x4eb   : > { %v1571_v53 = vsel %vm640_vm2, %v1543_v36, %v1559_v31  ;;  %v1579_v34 = vsel %vm640_vm2, %v1559_v31, %v1543_v36 }
 0x4ec   : > { %v1607_v31 = vmul.f32 %v1591_v50, %v1579_v34  ;;  %v1608_v26 = vmul.f32 %v1592_v7, %v1571_v53 }
 0x4ee   : > { %v1640_v43 = vpop.permute.xlu1 %1639  ;;  %v1751_v18 = vpop.permute.xlu0 %1750  ;;  %v1623_v38 = vadd.f32 %v1607_v31, %v1526_v47 }
 0x4ef   : > { %v1764_v8 = vsel %vm836_vm4, %v1735_v13, %v1751_v18  ;;  %v1772_v24 = vsel %vm836_vm4, %v1751_v18, %v1735_v13 }
 0x4f0   : > { %v1799_v10 = vmul.f32 %v1783_v4, %v1772_v24  ;;  %v1800_v35 = vmul.f32 %v1784_v39, %v1764_v8  ;;  %v2074_v8 = vld [vmem:[#allocation9 + $0x3a0] sm:$0xff]  ;;  %v2075_v24 = vld [vmem:[#allocation9 + $0x3a8] sm:$0xff] }
 0x4f2   : > { %v1656_v22 = vpop.permute.xlu1 %1655  ;;  %v4902_v56 = vpop.permute.xlu0 %1831  ;;  %v1815_v59 = vadd.f32 %v1799_v10, %v1718_v41 }
 0x4f3   : > { %v1668_v27 = vsel %vm738_vm3, %v1640_v43, %v1656_v22  ;;  %v1676_v36 = vsel %vm738_vm3, %v1656_v22, %v1640_v43  ;;  %v1527_v43 = vadd.f32 %v1511_v0, %v1431_v33  ;;  %v1883_v0 = vld [vmem:[#allocation9 + $0x2b8] sm:$0xff] }
 0x4f4   : > { %v1704_v22 = vmul.f32 %v1688_v51, %v1676_v36  ;;  %v1705_v44 = vmul.f32 %v1689_v3, %v1668_v27  ;;  %v1979_v3 = vld [vmem:[#allocation9 + $0x330] sm:$0xff]  ;;  %v1980_v27 = vld [vmem:[#allocation9 + $0x338] sm:$0xff] }
 0x4f5   : > { %v1624_v20 = vadd.f32 %v1608_v26, %v1527_v43  ;;  %v2171_v26 = vld [vmem:[#allocation9 + $0x420] sm:$0xff] }
 0x4f6   : > { %v4904_v17 = vpop.permute.xlu1 %1736  ;;  %v1848_v37 = vpop.permute.xlu0 %1847  ;;  %v1720_v48 = vadd.f32 %v1704_v22, %v1623_v38 }
 0x4f7   : > { %v1861_v60 = vsel %vm934_vm5, %v4902_v56, %v1848_v37  ;;  %v1869_v13 = vsel %vm934_vm5, %v1848_v37, %v4902_v56  ;;  %v1816_v56 = vadd.f32 %v1800_v35, %v1719_v40  ;;  %v1785_v37 = vld [vmem:[#allocation9 + $0x1b0] sm:$0xff]  ;;  %v1721_v14 = vadd.f32 %v1705_v44, %v1624_v20 }
 0x4f8   : > { %v1896_v15 = vmul.f32 %v1880_v49, %v1861_v60  ;;  %v1897_v32 = vmul.f32 %v1881_v55, %v1869_v13  ;;  %v2172_v49 = vld [vmem:[#allocation9 + $0x428] sm:$0xff] }
 0x4fa   : > { %v4906_v1 = vpop.permute.xlu1 %1752  ;;  %v4908_v16 = vpop.permute.xlu0 %1928  ;;  %v1912_v53 = vadd.f32 %v1896_v15, %v1815_v59  ;;  %v1913_v34 = vadd.f32 %v1897_v32, %v1816_v56  ;;  %v2173_v56 = vld [vmem:[#allocation9 + $0x430] sm:$0xff] }
 0x4fb   : > { %v1765_v19 = vsel %vm836_vm4, %v4904_v17, %v4906_v1  ;;  %v1773_v33 = vsel %vm836_vm4, %v4906_v1, %v4904_v17 }
 0x4fc   : > { %v1801_v4 = vmul.f32 %v1785_v37, %v1773_v33  ;;  %v1802_v39 = vmul.f32 %v1786_v25, %v1765_v19  ;;  %v2174_v37 = vld [vmem:[#allocation9 + $0x438] sm:$0xff] }
 0x4fe   : > { %v4910_v42 = vpop.permute.xlu1 %1833  ;;  %v4912_v61 = vpop.permute.xlu0 %1944  ;;  %v1818_v35 = vadd.f32 %v1802_v39, %v1721_v14 }
 0x4ff   : > { %v1958_v50 = vsel %vm1032_vm6, %v4908_v16, %v4912_v61  ;;  %v1966_v7 = vsel %vm1032_vm6, %v4912_v61, %v4908_v16 }
 0x500   : > { %v1993_v6 = vmul.f32 %v1977_v46, %v1958_v50  ;;  %v1994_v51 = vmul.f32 %v1978_v28, %v1966_v7 }
 0x502   : > { %v4920_v63 = vpop.permute.xlu1 %1849  ;;  %v4922_v11 = vpop.permute.xlu0 %2025  ;;  %v2009_v44 = vadd.f32 %v1993_v6, %v1912_v53  ;;  %v2010_v41 = vadd.f32 %v1994_v51, %v1913_v34 }
 0x503   : > { %v1862_v17 = vsel %vm934_vm5, %v4910_v42, %v4920_v63  ;;  %v1870_v1 = vsel %vm934_vm5, %v4920_v63, %v4910_v42 }
 0x504   : > { %v1898_v36 = vmul.f32 %v1882_v45, %v1862_v17  ;;  %v1899_v31 = vmul.f32 %v1883_v0, %v1870_v1  ;;  %v2179_v45 = vld [vmem:[#allocation9 + $0x460] sm:$0xff]  ;;  %v2180_v0 = vld [vmem:[#allocation9 + $0x468] sm:$0xff] }
 0x506   : > { %v4940_v23 = vpop.permute.xlu1 %1930  ;;  %v4942_v9 = vpop.permute.xlu0 %2041  ;;  %v1915_v32 = vadd.f32 %v1899_v31, %v1818_v35 }
 0x507   : > { %v2055_v16 = vsel %vm1130_vm7, %v4922_v11, %v4942_v9  ;;  %v2063_v61 = vsel %vm1130_vm7, %v4942_v9, %v4922_v11 }
 0x508   : > { %v2090_v60 = vmul.f32 %v2074_v8, %v2055_v16  ;;  %v2091_v13 = vmul.f32 %v2075_v24, %v2063_v61 }
 0x50a   : > { %v1947_v18 = vpop.permute.xlu1 %1946  ;;  %v2123_v52 = vpop.permute.xlu0 %2122  ;;  %v2107_v59 = vadd.f32 %v2091_v13, %v2010_v41 }
 0x50b   : > { %v1959_v42 = vsel %vm1032_vm6, %v4940_v23, %v1947_v18  ;;  %v1967_v63 = vsel %vm1032_vm6, %v1947_v18, %v4940_v23  ;;  %v1817_v18 = vadd.f32 %v1801_v4, %v1720_v48 }
 0x50c   : > { %v1995_v47 = vmul.f32 %v1979_v3, %v1959_v42  ;;  %v1996_v43 = vmul.f32 %v1980_v27, %v1967_v63  ;;  %v2181_v3 = vld [vmem:[#allocation9 + $0x470] sm:$0xff]  ;;  %v2182_v27 = vld [vmem:[#allocation9 + $0x478] sm:$0xff] }
 0x50d   : > { %v1914_v15 = vadd.f32 %v1898_v36, %v1817_v18 }
 0x50e   : > { %v2028_v5 = vpop.permute.xlu1 %2027  ;;  %v2139_v54 = vpop.permute.xlu0 %2138  ;;  %v2012_v19 = vadd.f32 %v1996_v43, %v1915_v32  ;;  %v2234_v43 = vld [vmem:[%s5117_s4 + $0x18] sm:$0xff] }
 0x50f   : > { %v2152_v11 = vsel %vm1228_vm8, %v2123_v52, %v2139_v54  ;;  %v2160_v9 = vsel %vm1228_vm8, %v2139_v54, %v2123_v52  ;;  %v2106_v54 = vadd.f32 %v2090_v60, %v2009_v44  ;;  %v2011_v25 = vadd.f32 %v1995_v47, %v1914_v15  ;;  %v2233_v47 = vld [vmem:[%s5117_s4 + $0x10] sm:$0xff] }
 0x510   : > { %v2187_v40 = vmul.f32 %v2171_v26, %v2152_v11  ;;  %v2188_v52 = vmul.f32 %v2172_v49, %v2160_v9 }
 0x512   : > { %v2044_v2 = vpop.permute.xlu1 %2043  ;;  %v2131_v55 = vpop.permute.xlu0 %2130  ;;  %v2203_v48 = vadd.f32 %v2187_v40, %v2106_v54  ;;  %v2204_v14 = vadd.f32 %v2188_v52, %v2107_v59 }
 0x513   : > { %v2056_v10 = vsel %vm1130_vm7, %v2028_v5, %v2044_v2  ;;  %v2064_v23 = vsel %vm1130_vm7, %v2044_v2, %v2028_v5 }
 0x514   : > { %v2092_v38 = vmul.f32 %v2076_v12, %v2056_v10  ;;  %v2093_v20 = vmul.f32 %v2077_v57, %v2064_v23  ;;  %v2219_v24 = vmax.f32 %v2203_v48, 0.0  ;;  %v2220_v16 = vmax.f32 %v2204_v14, 0.0  ;;  %v5247_v12 = vld [vmem:[#allocation32_spill] sm:$0xff] }
 0x516   : > { %v2125_v22 = vpop.permute.xlu1 %2124  ;;  %v2147_v5 = vpop.permute.xlu0 %2146  ;;  %v2108_v50 = vadd.f32 %v2092_v38, %v2011_v25  ;;  %v2109_v7 = vadd.f32 %v2093_v20, %v2012_v19 }
 0x517   : > { %v2156_v17 = vsel %vm1228_vm8, %v2131_v55, %v2147_v5  ;;  %v2164_v1 = vsel %vm1228_vm8, %v2147_v5, %v2131_v55 }
 0x518   : > { %v2195_v61 = vmul.f32 %v2179_v45, %v2156_v17  ;;  %v2196_v2 = vmul.f32 %v2180_v0, %v2164_v1 }
 0x51a   : > { %v2141_v33 = vpop.permute.xlu1 %2140  ;;  %v2211_v49 = vadd.f32 %v2195_v61, %v4742_v62  ;;  %v2212_v11 = vadd.f32 %v2196_v2, %v4744_v21  ;;  %v2231_v21 = vld [vmem:[%s5117_s4] sm:$0xff] }
 0x51b   : > { %v2153_v46 = vsel %vm1228_vm8, %v2125_v22, %v2141_v33  ;;  %v2161_v28 = vsel %vm1228_vm8, %v2141_v33, %v2125_v22 }
 0x51c   : > { %v2189_v53 = vmul.f32 %v2173_v56, %v2153_v46  ;;  %v2190_v34 = vmul.f32 %v2174_v37, %v2161_v28  ;;  %v2227_v57 = vmax.f32 %v2211_v49, 0.0  ;;  %v2228_v10 = vmax.f32 %v2212_v11, 0.0 }
 0x51e   : > { %v2205_v4 = vadd.f32 %v2189_v53, %v2108_v50  ;;  %v2206_v39 = vadd.f32 %v2190_v34, %v2109_v7  ;;  %v2133_v8 = vpop.permute.xlu1 %2132 }
 0x520   : > { %v2221_v6 = vmax.f32 %v2205_v4, 0.0  ;;  %v2222_v51 = vmax.f32 %v2206_v39, 0.0 }
 0x522   : > { %v2149_v42 = vpop.permute.xlu1 %2148  ;;  %v2626_v63 = vpack.c.bf16 %v2222_v51, %v2220_v16  ;;  %v2628_v36 = vpack.c.bf16 %v2221_v6, %v2219_v24 }
 0x523   : > { %v2157_v31 = vsel %vm1228_vm8, %v2133_v8, %v2149_v42  ;;  %v2165_v26 = vsel %vm1228_vm8, %v2149_v42, %v2133_v8 }
 0x524   : > { %v2197_v9 = vmul.f32 %v2181_v3, %v2157_v31  ;;  %v2198_v55 = vmul.f32 %v2182_v27, %v2165_v26  ;;  %2627 = vmatprep.subr.bf16.mxu1 %v2626_v63  ;;  %v5250_v26 = vld [vmem:[#allocation36_spill] sm:$0xff] }
 0x525   : > { %2629 = vmatpush1.bf16.msra.mxu1 %v2628_v36 }
 0x526   : > { %v2213_v60 = vadd.f32 %v2197_v9, %v4754_v58  ;;  %v2214_v13 = vadd.f32 %v2198_v55, %v4756_v30  ;;  %2631 = vmatprep.subr.bf16.mxu1 %v5247_v12  ;;  %v5249_v58 = vmov 0.0   ;;  %v2232_v30 = vld [vmem:[%s5117_s4 + $0x8] sm:$0xff] }
 0x527   : > { %v2242_v22 = vpop.permute.xlu0 %2241  ;;  %v5251_v9 = vld [vmem:[#allocation37_spill] sm:$0xff] }
 0x528   : > { %v2229_v23 = vmax.f32 %v2213_v60, 0.0  ;;  %v2230_v18 = vmax.f32 %v2214_v13, 0.0  ;;  %v5252_v60 = vld [vmem:[#allocation35_spill] sm:$0xff] }
 0x529   : > { %2633 = vmatpush1.bf16.msra.mxu1 %v5248_v29  ;;  %v5254_v29 = vld [vmem:[#allocation38_spill] sm:$0xff] }
 0x52a   : > { %v2634_v35 = vpack.c.bf16 %v2230_v18, %v2228_v10  ;;  %v2636_v62 = vpack.c.bf16 %v2229_v23, %v2227_v57  ;;  %v5253_v10 = vld [vmem:[#allocation22_spill] sm:$0xff] }
 0x52b   : > { %v2252_v25 = vpop.permute.xlu0 %2251 }
 0x52c   : > { %2635 = vmatprep.subr.bf16.mxu1 %v2634_v35 }
 0x52d   : > { %2637 = vmatpush1.bf16.msra.mxu1 %v2636_v62  ;;  %v5255_v62 = vld [vmem:[#allocation26_spill] sm:$0xff] }
 0x530   : > { %2587 = vmatmul.mubr.msk.f32.vlgmr.msra.gmra.mrb[0].mxu1 %vm338_vm0, %v2231_v21 }
 0x531   : > { %2341 = vmatprep.mubr.f32.mxu1 %v5249_v58 }
 0x533   : > { %v2247_v32 = vpop.permute.xlu1 %2246 }
 0x534   : > { %2588 = vmatmul.mubr.msk.f32.gmra.mrb[2].mxu1 %vm338_vm0, %v2232_v30 }
 0x535   : > { %2347 = vmatprep.mubr.f32.mxu1 %v5249_v58 }
 0x537   : > { %v2257_v28 = vpop.permute.xlu1 %2256 }
 0x538   : > { %2589 = vmatmul.mubr.msk.f32.gmra.mrb[4].mxu1 %vm338_vm0, %v2233_v47 }
 0x539   : > { %2353 = vmatprep.mubr.f32.mxu1 %v5249_v58  ;;  %v5256_v58 = vld [vmem:[#allocation34_spill] sm:$0xff] }
 0x53c   : > { %2590 = vmatmul.mubr.msk.f32.gmra.mrb[6].mxu1 %vm338_vm0, %v2234_v43  ;;  %v5257_v43 = vld [vmem:[#allocation20_spill] sm:$0xff] }
 0x603   : > { %v2337_v44 = vpop.f32.mrb[0].mxu1 }
 0x604   : > { %v2338_v41 = vadd.f32 %v2337_v44, %v2242_v22  ;;  %v2339_v40 = vpop.f32.mrb[1].mxu1 }
 0x605   : > { %v2340_v52 = vadd.f32 %v2339_v40, %v2242_v22 }
 0x606   : > { %v2591_v15 = vmul.f32 -1.442695, %v2338_v41  ;;  %v5258_v41 = vld [vmem:[#allocation25_spill] sm:$0xff] }
 0x607   : > { %v2592_v38 = vmul.f32 -1.442695, %v2340_v52  ;;  %v2343_v20 = vpop.f32.mrb[2].mxu1  ;;  %v5259_v52 = vld [vmem:[#allocation28_spill] sm:$0xff] }
 0x608   : > { %2732 = vpow2.f32 %v2591_v15  ;;  %v2344_v54 = vadd.f32 %v2343_v20, %v2247_v32  ;;  %v2345_v59 = vpop.f32.mrb[3].mxu1 }
 0x609   : > { %2734 = vpow2.f32 %v2592_v38  ;;  %v2346_v56 = vadd.f32 %v2345_v59, %v2247_v32  ;;  %v5260_v32 = vld [vmem:[#allocation23_spill] sm:$0xff] }
 0x60a   : > { %v2593_v37 = vmul.f32 -1.442695, %v2344_v54  ;;  %v5261_v54 = vld [vmem:[#allocation24_spill] sm:$0xff] }
 0x60b   : > { %v2594_v19 = vmul.f32 -1.442695, %v2346_v56  ;;  %v2349_v5 = vpop.f32.mrb[4].mxu1  ;;  %v5262_v56 = vld [vmem:[#allocation27_spill] sm:$0xff] }
 0x60c   : > { %2736 = vpow2.f32 %v2593_v37  ;;  %v2350_v33 = vadd.f32 %v2349_v5, %v2252_v25  ;;  %v2351_v48 = vpop.f32.mrb[5].mxu1 }
 0x60d   : > { %2738 = vpow2.f32 %v2594_v19  ;;  %v2352_v14 = vadd.f32 %v2351_v48, %v2252_v25  ;;  %v5263_v19 = vld [vmem:[#allocation19_spill] sm:$0xff] }
 0x60e   : > { %v2595_v46 = vmul.f32 -1.442695, %v2350_v33  ;;  %v5264_v33 = vld [vmem:[#allocation30_spill] sm:$0xff] }
 0x60f   : > { %v2596_v50 = vmul.f32 -1.442695, %v2352_v14  ;;  %v2355_v7 = vpop.f32.mrb[6].mxu1  ;;  %v5265_v14 = vld [vmem:[#allocation21_spill] sm:$0xff] }
 0x610   : > { %2740 = vpow2.f32 %v2595_v46  ;;  %v2356_v53 = vadd.f32 %v2355_v7, %v2257_v28  ;;  %v2357_v34 = vpop.f32.mrb[7].mxu1 }
 0x611   : > { %2742 = vpow2.f32 %v2596_v50  ;;  %v2358_v45 = vadd.f32 %v2357_v34, %v2257_v28 }
 0x612   : > { %v2733_v0 = vpop.eup %2732  ;;  %v2597_v17 = vmul.f32 -1.442695, %v2356_v53 }
 0x613   : > { %v2735_v1 = vpop.eup %2734  ;;  %v2400_v4 = vadd.f32 1.0, %v2733_v0  ;;  %v2598_v39 = vmul.f32 -1.442695, %v2358_v45 }
 0x614   : > { %v2401_v8 = vadd.f32 1.0, %v2735_v1  ;;  %2744 = vpow2.f32 %v2597_v17 }
 0x615   : > { %2746 = vrcp.f32 %v2400_v4 }
 0x616   : > { %v2737_v24 = vpop.eup %2736  ;;  %2748 = vrcp.f32 %v2401_v8 }
 0x617   : > { %v2739_v16 = vpop.eup %2738  ;;  %v2402_v61 = vadd.f32 1.0, %v2737_v24  ;;  %2750 = vpow2.f32 %v2598_v39 }
 0x618   : > { %v2403_v2 = vadd.f32 1.0, %v2739_v16 }
 0x619   : > { %2752 = vrcp.f32 %v2402_v61 }
 0x61a   : > { %v2741_v6 = vpop.eup %2740  ;;  %2754 = vrcp.f32 %v2403_v2 }
 0x61b   : > { %v2743_v51 = vpop.eup %2742  ;;  %v2404_v3 = vadd.f32 1.0, %v2741_v6 }
 0x61c   : > { %v2405_v27 = vadd.f32 1.0, %v2743_v51 }
 0x61d   : > { %2756 = vrcp.f32 %v2404_v3 }
 0x61e   : > { %v2745_v42 = vpop.eup %2744  ;;  %2758 = vrcp.f32 %v2405_v27 }
 0x61f   : > { %v2747_v63 = vpop.eup %2746  ;;  %v2406_v36 = vadd.f32 1.0, %v2745_v42 }
 0x620   : > { %v2749_v31 = vpop.eup %2748  ;;  %v2424_v49 = vmul.f32 %v2747_v63, %v5250_v26 }
 0x621   : > { %v2751_v11 = vpop.eup %2750  ;;  %v2425_v55 = vmul.f32 %v2749_v31, %v5251_v9  ;;  %2760 = vrcp.f32 %v2406_v36 }
 0x622   : > { %v2432_v13 = vadd.f32 %v2424_v49, %v5252_v60  ;;  %v2407_v12 = vadd.f32 1.0, %v2751_v11 }
 0x623   : > { %v2753_v57 = vpop.eup %2752  ;;  %v2433_v23 = vadd.f32 %v2425_v55, %v5253_v10 }
 0x624   : > { %v2755_v18 = vpop.eup %2754  ;;  %2440 = vst [vmem:[%s313_s14] sm:$0xff] %v2432_v13  ;;  %v2426_v35 = vmul.f32 %v2753_v57, %v5254_v29  ;;  %2762 = vrcp.f32 %v2407_v12 }
 0x625   : > { %2441 = vst [vmem:[%s313_s14 + $0x8] sm:$0xff] %v2433_v23  ;;  %v2427_v21 = vmul.f32 %v2755_v18, %v5255_v62 }
 0x626   : > { %v2434_v30 = vadd.f32 %v2426_v35, %v5256_v58 }
 0x627   : > { %v2757_v47 = vpop.eup %2756  ;;  %v2435_v22 = vadd.f32 %v2427_v21, %v5257_v43 }
 0x628   : > { %v2759_v44 = vpop.eup %2758  ;;  %2442 = vst [vmem:[%s313_s14 + $0x10] sm:$0xff] %v2434_v30  ;;  %v2428_v40 = vmul.f32 %v2757_v47, %v5258_v41 }
 0x629   : > { %2443 = vst [vmem:[%s313_s14 + $0x18] sm:$0xff] %v2435_v22  ;;  %v2429_v15 = vmul.f32 %v2759_v44, %v5259_v52 }
 0x62a   : > { %v2436_v38 = vadd.f32 %v2428_v40, %v5260_v32 }
 0x62b   : > { %v2761_v20 = vpop.eup %2760  ;;  %v2437_v59 = vadd.f32 %v2429_v15, %v5261_v54 }
 0x62c   : > { %2444 = vst [vmem:[%s313_s14 + $0x20] sm:$0xff] %v2436_v38  ;;  %v2430_v37 = vmul.f32 %v2761_v20, %v5262_v56 }
 0x62d   : > { %2445 = vst [vmem:[%s313_s14 + $0x28] sm:$0xff] %v2437_v59 }
 0x62e   : > { %v2763_v25 = vpop.eup %2762  ;;  %v2438_v5 = vadd.f32 %v2430_v37, %v5263_v19 }
 0x62f   : > { %v2431_v48 = vmul.f32 %v2763_v25, %v5264_v33 }
 0x630   : > { %2446 = vst [vmem:[%s313_s14 + $0x30] sm:$0xff] %v2438_v5 }
 0x631   : > { %v2439_v46 = vadd.f32 %v2431_v48, %v5265_v14 }
 0x633   : > { %2447 = vst [vmem:[%s313_s14 + $0x38] sm:$0xff] %v2439_v46 }
 0x634   : > { %2891 = shalt.err (!%p2888_p4)
}
 0x635   : > { %s2892_s26 = scalar_lea.hbm %s5065_s19, 1024  ;;  %s2896_s8 = scalar_lea.hbm %s5119_s6, 2048 }
 0x636   : > { %p2893_p9 = scmp.ne.s32.totalorder %s5065_s19, %s2892_s26  ;;  %p2897_p8 = scmp.lt.u32.totalorder %s5065_s19, %s5119_s6 }
 0x637   : > { %p2898_p13 = scmp.lt.u32.totalorder %s2896_s8, %s2892_s26  ;;  %p2900_p10 = scmp.lt.u32.totalorder %s2892_s26, %s5065_s19 }
 0x638   : > { %p2894_p0 = pnand %p2893_p9, %p3157_p5 }
 0x639   : > { %p2899_p6 = por %p2898_p13, %p2897_p8 }
 0x63a   : > { %p2895_p11 = pneg %p2894_p0 }
 0x63b   : > { %p2901_p3 = por %p2900_p10, %p2899_p6 }
 0x63d   : > { %p2902_p7 = pnand %p2901_p3, %p2895_p11 }
 0x63f   : > { %2905 = shalt.err (!%p2902_p7)
}
 0x640   : > { %s2973_s18 = smov 256  }
 0x641   : > { %2652 = dma.vmem_to_hbm [thread:$0]  (%p3157_p5), %s5068_s17, 1024, %s5065_s19, %s2449_s25, %s2973_s18, %s2973_s18, %s2964_s29  }
 0x642 PF: > { %s2477_s27 = sand.u32 1, %s2940_s21   ;;  %p5266_p12 = scmp.ne.s32.totalorder %s5167_s28, 0 }
 0x643   : > { %p5267_p2 = scmp.ge.s32.totalorder %s2952_s24, 2  ;;  %s2478_s20 = scalar_lea.sflag [#allocation5], %s2477_s27 }
 0x645   : > { %p2669_p1 = pnand %p5267_p2, %p5266_p12 }
 0x647   : > { %2935 = dma.done.wait (!%p2669_p1), %s2478_s20, 1024  }
 0x648   : > { %2937 = vsyncadd (!%p2669_p1), %s2478_s20, 4294966272  ;;  %p21_p4 = scmp.ge.s32.totalorder %s3122_s12, 4   ;;  %s5268_s21 = smov %s2944_s22 }
 0x649   : > { %s5269_s22 = smov %s2948_s23  ;;  %s5270_s23 = smov %s3153_s30 }
 0x64a   : > { %s5271_s24 = smov %s3122_s12  ;;  %23 = sbr.rel (!%p21_p4) target bundleno = 9 (0x9), region = 117 }
 0x651   :  { %2483 = vsyncpa [#allocation4], 1 }
 0x652   :  { %2485 = vsyncpa [#allocation4 + $0x1], 1 }
 0x653   :  { %2486 = vsyncpa [#allocation7], 1 }
 0x654   :  { %2487 = vsyncpa [#allocation10], 1 }
 0x655   :  { %2488 = vsyncpa [#allocation5], 1 }
 0x656   :  { %2490 = vsyncpa [#allocation5 + $0x1], 1 }

</bundles_post_ra>
